<compile_context>
chip_gen: v7x
topology: tpu7x:2x2x1
jax: 0.10.0
libtpu: 0.0.40
codegen_flags: <defaults>
</compile_context>

<pallas_src>
import functools

import jax
import jax.numpy as jnp
from jax.experimental import pallas as pl
from jax.experimental.pallas import tpu as pltpu

_VMEM = pl.BlockSpec(memory_space=pltpu.MemorySpace.VMEM)


# ----------------------------- Pallas kernels ------------------------------

def _conv_pool_kernel(c_ref, w_ref, b_ref, o_ref):
    """Fused conv (im2col matmul) + bias + ReLU + 2x2 max-pool.

    c_ref: (4, M, K) bf16 — leading dim = the 4 pool-window positions,
           rows = N*pooled_H*pooled_W output positions, cols = (kh,kw,cin).
    w_ref: (K, Cout) bf16;  b_ref: (1, Cout) f32;  o_ref: (M, Cout) bf16.
    """
    m = jnp.dot(c_ref[0], w_ref[...], preferred_element_type=jnp.float32)
    for i in range(1, 4):
        m = jnp.maximum(
            m, jnp.dot(c_ref[i], w_ref[...], preferred_element_type=jnp.float32))
    o_ref[...] = jnp.maximum(m + b_ref[...], 0.0).astype(o_ref.dtype)


def _tail_kernel(c_ref, w3_ref, b3_ref, w1_ref, b1_ref, w2_ref, b2_ref, o_ref):
    """conv3+ReLU+pool3 + Linear(320,128)+sigmoid + Linear(128,2)+softmax.

    c_ref : (4*R, N, K3) bf16, leading index = pool_pos*R + pooled_row.
    w3_ref: (K3, 64) bf16;  b3_ref: (1, 64) f32.
    w1_ref: (R, 64, 128) bf16 — fc1 weight regrouped per pooled row so the
            accumulation reproduces torch's NCHW flatten order exactly.
    b1_ref: (1, 128) f32;  w2_ref: (128, 2) f32;  b2_ref: (1, 2) f32.
    o_ref : (N, 2) f32 softmax probabilities.
    """
    n = o_ref.shape[0]
    nrows = c_ref.shape[0] // 4
    h = jnp.zeros((n, b1_ref.shape[1]), jnp.float32)
    for hh in range(nrows):
        m = jnp.dot(c_ref[hh], w3_ref[...], preferred_element_type=jnp.float32)
        for i in range(1, 4):
            m = jnp.maximum(
                m, jnp.dot(c_ref[i * nrows + hh], w3_ref[...],
                           preferred_element_type=jnp.float32))
        p = jnp.maximum(m + b3_ref[...], 0.0)                     # (N, 64) f32
        h = h + jnp.dot(p.astype(jnp.bfloat16), w1_ref[hh],
                        preferred_element_type=jnp.float32)
    h = h + b1_ref[...]
    h = 1.0 / (1.0 + jnp.exp(-h))                                  # sigmoid (f32)
    z = jnp.dot(h, w2_ref[...], preferred_element_type=jnp.float32) + b2_ref[...]
    z = z - jnp.max(z, axis=-1, keepdims=True)                     # softmax dim=1
    e = jnp.exp(z)
    o_ref[...] = e / jnp.sum(e, axis=-1, keepdims=True)


# ------------------------------ wrappers ------------------------------------

def _conv_pool(cols4, wmat, bias):
    m = cols4.shape[1]
    cout = wmat.shape[1]
    return pl.pallas_call(
        _conv_pool_kernel,
        out_shape=jax.ShapeDtypeStruct((m, cout), jnp.bfloat16),
        in_specs=[_VMEM, _VMEM, _VMEM],
        out_specs=_VMEM,
    )(cols4, wmat, bias)


def _tail(cols, w3, b3, w1, b1, w2, b2):
    n = cols.shape[1]
    return pl.pallas_call(
        _tail_kernel,
        out_shape=jax.ShapeDtypeStruct((n, 2), jnp.float32),
        in_specs=[_VMEM] * 7,
        out_specs=_VMEM,
    )(cols, w3, b3, w1, b1, w2, b2)


def _im2col_pooled(x_nhwc, kh_size, kw_size, stride, ohp, owp):
    """Patch slabs grouped by 2x2 pool-window position (cheap XLA glue).

    Returns (4, N, ohp, owp, kh*kw*C): [py*2+px, n, r, s, :] is the conv input
    patch producing conv output (2r+py, 2s+px) for sample n, patch index
    ordered (kh, kw, cin) to match the weight matrices from prepare_params.
    """
    n, _, _, c = x_nhwc.shape
    sh, sw = stride
    slabs = []
    for py in range(2):
        for px in range(2):
            taps = []
            for kh in range(kh_size):
                for kw in range(kw_size):
                    r0 = py * sh + kh
                    c0 = px * sw + kw
                    taps.append(jax.lax.slice(
                        x_nhwc,
                        (0, r0, c0, 0),
                        (n, r0 + (ohp - 1) * 2 * sh + 1,
                         c0 + (owp - 1) * 2 * sw + 1, c),
                        (1, 2 * sh, 2 * sw, 1)))              # (N, ohp, owp, C)
            slabs.append(jnp.concatenate(taps, axis=-1))
    return jnp.stack(slabs, axis=0)


# ------------------------------ full forward --------------------------------

def convnn_forward(x, pp):
    """x: (N, 1, D, H, W) float32 (PyTorch NCDHW).  pp: prepare_params output."""
    n = x.shape[0]
    d, hgt, wid = x.shape[2], x.shape[3], x.shape[4]

    # normal1(folded) + conv1 + relu + pool1 (+ squeeze(2)):
    # Conv3d(1,16,(D,5,5),(1,2,2)) == 2-D conv over (H,W) with Cin = D.
    x_cl = x.reshape(n, d, hgt, wid).transpose(0, 2, 3, 1).astype(jnp.bfloat16)
    oh1, ow1 = (hgt - 5) // 2 + 1, (wid - 5) // 2 + 1
    oh1p, ow1p = oh1 // 2, ow1 // 2
    cols1 = _im2col_pooled(x_cl, 5, 5, (2, 2), oh1p, ow1p)
    cols1 = cols1.reshape(4, n * oh1p * ow1p, 5 * 5 * d)
    y1 = _conv_pool(cols1, pp["w1"], pp["b1"]).reshape(n, oh1p, ow1p, 16)

    # normal2(folded) + conv2 + relu + pool2
    oh2p, ow2p = (oh1p - 2) // 2, (ow1p - 2) // 2
    cols2 = _im2col_pooled(y1, 3, 3, (1, 1), oh2p, ow2p)
    cols2 = cols2.reshape(4, n * oh2p * ow2p, 3 * 3 * 16)
    y2 = _conv_pool(cols2, pp["w2"], pp["b2"]).reshape(n, oh2p, ow2p, 32)

    # normal3(folded) + conv3 + relu + pool3 + flatten + fc1 + sigmoid + fc2
    # + softmax, fused in one kernel.  drop1/drop2: identity (inference).
    oh3p, ow3p = (oh2p - 2) // 2, (ow2p - 2) // 2              # expected (5, 1)
    cols3 = _im2col_pooled(y2, 3, 3, (1, 1), oh3p, ow3p)       # (4, N, 5, 1, 288)
    cols3 = cols3.reshape(4, n, oh3p * ow3p, 3 * 3 * 32)
    cols3 = cols3.transpose(0, 2, 1, 3).reshape(4 * oh3p * ow3p, n, 3 * 3 * 32)
    return _tail(cols3, pp["w3"], pp["b3"], pp["fc1_w"], pp["fc1_b"],
                 pp["fc2_w"], pp["fc2_b"])


# ------------------------------ params --------------------------------------

def _bn_scale_shift(gamma, beta, rmean, rvar, eps=1e-5):
    scale = gamma / jnp.sqrt(rvar + eps)
    shift = beta - rmean * scale
    return scale, shift


def prepare_params(p, D):
    """One-time weight prep: fold eval-mode BNs into the convs, reorder weights
    to channels-last matmul layout, regroup fc1 for NCHW-flatten order, cast
    MXU operands to bf16 (biases stay f32)."""
    # BN1 (1 channel, before conv1): scalar scale/shift.
    s1, t1 = _bn_scale_shift(*p["bn1"])
    w1 = p["conv1_w"].reshape(16, D, 5, 5)                # Cin=1 folded into depth
    w1f = w1 * s1[0]
    b1f = p["conv1_b"] + t1[0] * w1.reshape(16, -1).sum(axis=1)
    w1m = jnp.transpose(w1f, (2, 3, 1, 0)).reshape(5 * 5 * D, 16)

    s2, t2 = _bn_scale_shift(*p["bn2"])
    w2f = p["conv2_w"] * s2[None, :, None, None]
    b2f = p["conv2_b"] + (p["conv2_w"] * t2[None, :, None, None]).sum(axis=(1, 2, 3))
    w2m = jnp.transpose(w2f, (2, 3, 1, 0)).reshape(3 * 3 * 16, 32)

    s3, t3 = _bn_scale_shift(*p["bn3"])
    w3f = p["conv3_w"] * s3[None, :, None, None]
    b3f = p["conv3_b"] + (p["conv3_w"] * t3[None, :, None, None]).sum(axis=(1, 2, 3))
    w3m = jnp.transpose(w3f, (2, 3, 1, 0)).reshape(3 * 3 * 32, 64)

    # fc1 weight stored as (in=320, out=128) with in-index = c*5 + h (torch NCHW
    # flatten, w==1); regroup into per-pooled-row blocks over channels-last rows.
    fc1_blocks = p["fc1_w"].reshape(64, 5, 128).transpose(1, 0, 2)   # (5, 64, 128)

    f32, bf16 = jnp.float32, jnp.bfloat16
    return {
        "w1": w1m.astype(bf16), "b1": b1f.reshape(1, -1).astype(f32),
        "w2": w2m.astype(bf16), "b2": b2f.reshape(1, -1).astype(f32),
        "w3": w3m.astype(bf16), "b3": b3f.reshape(1, -1).astype(f32),
        "fc1_w": fc1_blocks.astype(bf16),
        "fc1_b": p["fc1_b"].reshape(1, -1).astype(f32),
        "fc2_w": p["fc2_w"].astype(f32),
        "fc2_b": p["fc2_b"].reshape(1, -1).astype(f32),
    }


def init_params(key, D):
    ks = jax.random.split(key, 13)

    def n(k, shape, s=0.05):
        return (s * jax.random.normal(k, shape)).astype(jnp.float32)

    def bn(k, c):
        k1, k2, k3, k4 = jax.random.split(k, 4)
        gamma = (1.0 + 0.1 * jax.random.normal(k1, (c,))).astype(jnp.float32)
        beta = (0.1 * jax.random.normal(k2, (c,))).astype(jnp.float32)
        rm = (0.1 * jax.random.normal(k3, (c,))).astype(jnp.float32)
        rv = (1.0 + 0.1 * jnp.abs(jax.random.normal(k4, (c,)))).astype(jnp.float32)
        return (gamma, beta, rm, rv)

    return {
        "bn1": bn(ks[0], 1),
        "conv1_w": n(ks[1], (16, 1, D, 5, 5)),
        "conv1_b": n(ks[2], (16,)),
        "bn2": bn(ks[3], 16),
        "conv2_w": n(ks[4], (32, 16, 3, 3)),
        "conv2_b": n(ks[5], (32,)),
        "bn3": bn(ks[6], 32),
        "conv3_w": n(ks[7], (64, 32, 3, 3)),
        "conv3_b": n(ks[8], (64,)),
        # stored as (in, out) == torch Linear weight.T
        "fc1_w": n(ks[9], (320, 128)),
        "fc1_b": n(ks[10], (128,)),
        "fc2_w": n(ks[11], (128, 2)),
        "fc2_b": n(ks[12], (2,)),
    }


if __name__ == "__main__":
    key = jax.random.PRNGKey(0)
    kx, kp = jax.random.split(key)
    # Smallest shape consistent with the hard-coded Linear(320, 128):
    # (N, C=1, D, H, W) -> conv/pool stack -> (N, 64, 5, 1) -> flatten 320.
    X_train_shape = (2, 1, 3, 108, 44)
    x = jax.random.normal(kx, X_train_shape, dtype=jnp.float32)
    params = init_params(kp, D=X_train_shape[2])
    pp = prepare_params(params, D=X_train_shape[2])     # folded weights, once

    fwd = jax.jit(functools.partial(convnn_forward, pp=pp))
    out = jax.block_until_ready(fwd(x))

    assert out.shape == (X_train_shape[0], 2), out.shape
    assert bool(jnp.all(jnp.isfinite(out)))
    assert bool(jnp.allclose(jnp.sum(out, axis=1), 1.0, atol=1e-5))
    print("KERNEL_OK")
</pallas_src>

<mosaic_0001>
module attributes {stable_mosaic.version = 11 : i64} {
  func.func @_conv_pool_kernel(%arg0: memref<4x520x75xbf16, #tpu.memory_space<vmem>>, %arg1: memref<75x16xbf16, #tpu.memory_space<vmem>>, %arg2: memref<1x16xf32, #tpu.memory_space<vmem>>, %arg3: memref<520x16xbf16, #tpu.memory_space<vmem>>) attributes {dimension_semantics = [], scalar_prefetch = 0 : i64, scratch_operands = 0 : i64, tpu.core_type = #tpu.core_type<tc>} {
    %c0 = arith.constant 0 : index
    %c0_0 = arith.constant 0 : index
    %c0_1 = arith.constant 0 : index
    %0 = vector.load %arg0[%c0, %c0_0, %c0_1] : memref<4x520x75xbf16, #tpu.memory_space<vmem>>, vector<1x520x75xbf16>
    %1 = vector.shape_cast %0 : vector<1x520x75xbf16> to vector<520x75xbf16>
    %c0_2 = arith.constant 0 : index
    %c0_3 = arith.constant 0 : index
    %2 = vector.load %arg1[%c0_2, %c0_3] : memref<75x16xbf16, #tpu.memory_space<vmem>>, vector<75x16xbf16>
    %cst = arith.constant dense<0.000000e+00> : vector<520x16xf32>
    %3 = tpu.matmul %1, %2, %cst {dimension_numbers = #tpu.dot_dimension_numbers<[1], [0], [0], [1], [0, 0, 1, 1], [], []>} : vector<520x75xbf16>, vector<75x16xbf16>, vector<520x16xf32> -> vector<520x16xf32>
    %c1 = arith.constant 1 : index
    %c0_4 = arith.constant 0 : index
    %c0_5 = arith.constant 0 : index
    %4 = vector.load %arg0[%c1, %c0_4, %c0_5] : memref<4x520x75xbf16, #tpu.memory_space<vmem>>, vector<1x520x75xbf16>
    %5 = vector.shape_cast %4 : vector<1x520x75xbf16> to vector<520x75xbf16>
    %c0_6 = arith.constant 0 : index
    %c0_7 = arith.constant 0 : index
    %6 = vector.load %arg1[%c0_6, %c0_7] : memref<75x16xbf16, #tpu.memory_space<vmem>>, vector<75x16xbf16>
    %cst_8 = arith.constant dense<0.000000e+00> : vector<520x16xf32>
    %7 = tpu.matmul %5, %6, %cst_8 {dimension_numbers = #tpu.dot_dimension_numbers<[1], [0], [0], [1], [0, 0, 1, 1], [], []>} : vector<520x75xbf16>, vector<75x16xbf16>, vector<520x16xf32> -> vector<520x16xf32>
    %8 = arith.maximumf %3, %7 : vector<520x16xf32>
    %c2 = arith.constant 2 : index
    %c0_9 = arith.constant 0 : index
    %c0_10 = arith.constant 0 : index
    %9 = vector.load %arg0[%c2, %c0_9, %c0_10] : memref<4x520x75xbf16, #tpu.memory_space<vmem>>, vector<1x520x75xbf16>
    %10 = vector.shape_cast %9 : vector<1x520x75xbf16> to vector<520x75xbf16>
    %c0_11 = arith.constant 0 : index
    %c0_12 = arith.constant 0 : index
    %11 = vector.load %arg1[%c0_11, %c0_12] : memref<75x16xbf16, #tpu.memory_space<vmem>>, vector<75x16xbf16>
    %cst_13 = arith.constant dense<0.000000e+00> : vector<520x16xf32>
    %12 = tpu.matmul %10, %11, %cst_13 {dimension_numbers = #tpu.dot_dimension_numbers<[1], [0], [0], [1], [0, 0, 1, 1], [], []>} : vector<520x75xbf16>, vector<75x16xbf16>, vector<520x16xf32> -> vector<520x16xf32>
    %13 = arith.maximumf %8, %12 : vector<520x16xf32>
    %c3 = arith.constant 3 : index
    %c0_14 = arith.constant 0 : index
    %c0_15 = arith.constant 0 : index
    %14 = vector.load %arg0[%c3, %c0_14, %c0_15] : memref<4x520x75xbf16, #tpu.memory_space<vmem>>, vector<1x520x75xbf16>
    %15 = vector.shape_cast %14 : vector<1x520x75xbf16> to vector<520x75xbf16>
    %c0_16 = arith.constant 0 : index
    %c0_17 = arith.constant 0 : index
    %16 = vector.load %arg1[%c0_16, %c0_17] : memref<75x16xbf16, #tpu.memory_space<vmem>>, vector<75x16xbf16>
    %cst_18 = arith.constant dense<0.000000e+00> : vector<520x16xf32>
    %17 = tpu.matmul %15, %16, %cst_18 {dimension_numbers = #tpu.dot_dimension_numbers<[1], [0], [0], [1], [0, 0, 1, 1], [], []>} : vector<520x75xbf16>, vector<75x16xbf16>, vector<520x16xf32> -> vector<520x16xf32>
    %18 = arith.maximumf %13, %17 : vector<520x16xf32>
    %c0_19 = arith.constant 0 : index
    %c0_20 = arith.constant 0 : index
    %19 = vector.load %arg2[%c0_19, %c0_20] : memref<1x16xf32, #tpu.memory_space<vmem>>, vector<1x16xf32>
    %20 = vector.broadcast %19 : vector<1x16xf32> to vector<520x16xf32>
    %21 = arith.addf %18, %20 : vector<520x16xf32>
    %cst_21 = arith.constant 0.000000e+00 : f32
    %22 = vector.broadcast %cst_21 : f32 to vector<520x16xf32>
    %23 = arith.maximumf %21, %22 : vector<520x16xf32>
    %24 = arith.truncf %23 : vector<520x16xf32> to vector<520x16xbf16>
    %c0_22 = arith.constant 0 : index
    %c0_23 = arith.constant 0 : index
    %25 = vector.load %arg3[%c0_22, %c0_23] : memref<520x16xbf16, #tpu.memory_space<vmem>>, vector<520x16xbf16>
    tpu.vector_store %arg3[%c0_22, %c0_23], %24 {strides = array<i32>} : memref<520x16xbf16, #tpu.memory_space<vmem>>, vector<520x16xbf16>,
    return
  }
}

module attributes {stable_mosaic.version = 11 : i64} {
  func.func @_conv_pool_kernel(%arg0: memref<4x96x144xbf16, #tpu.memory_space<vmem>>, %arg1: memref<144x32xbf16, #tpu.memory_space<vmem>>, %arg2: memref<1x32xf32, #tpu.memory_space<vmem>>, %arg3: memref<96x32xbf16, #tpu.memory_space<vmem>>) attributes {dimension_semantics = [], scalar_prefetch = 0 : i64, scratch_operands = 0 : i64, tpu.core_type = #tpu.core_type<tc>} {
    %c0 = arith.constant 0 : index
    %c0_0 = arith.constant 0 : index
    %c0_1 = arith.constant 0 : index
    %0 = vector.load %arg0[%c0, %c0_0, %c0_1] : memref<4x96x144xbf16, #tpu.memory_space<vmem>>, vector<1x96x144xbf16>
    %1 = vector.shape_cast %0 : vector<1x96x144xbf16> to vector<96x144xbf16>
    %c0_2 = arith.constant 0 : index
    %c0_3 = arith.constant 0 : index
    %2 = vector.load %arg1[%c0_2, %c0_3] : memref<144x32xbf16, #tpu.memory_space<vmem>>, vector<144x32xbf16>
    %cst = arith.constant dense<0.000000e+00> : vector<96x32xf32>
    %3 = tpu.matmul %1, %2, %cst {dimension_numbers = #tpu.dot_dimension_numbers<[1], [0], [0], [1], [0, 0, 1, 1], [], []>} : vector<96x144xbf16>, vector<144x32xbf16>, vector<96x32xf32> -> vector<96x32xf32>
    %c1 = arith.constant 1 : index
    %c0_4 = arith.constant 0 : index
    %c0_5 = arith.constant 0 : index
    %4 = vector.load %arg0[%c1, %c0_4, %c0_5] : memref<4x96x144xbf16, #tpu.memory_space<vmem>>, vector<1x96x144xbf16>
    %5 = vector.shape_cast %4 : vector<1x96x144xbf16> to vector<96x144xbf16>
    %c0_6 = arith.constant 0 : index
    %c0_7 = arith.constant 0 : index
    %6 = vector.load %arg1[%c0_6, %c0_7] : memref<144x32xbf16, #tpu.memory_space<vmem>>, vector<144x32xbf16>
    %cst_8 = arith.constant dense<0.000000e+00> : vector<96x32xf32>
    %7 = tpu.matmul %5, %6, %cst_8 {dimension_numbers = #tpu.dot_dimension_numbers<[1], [0], [0], [1], [0, 0, 1, 1], [], []>} : vector<96x144xbf16>, vector<144x32xbf16>, vector<96x32xf32> -> vector<96x32xf32>
    %8 = arith.maximumf %3, %7 : vector<96x32xf32>
    %c2 = arith.constant 2 : index
    %c0_9 = arith.constant 0 : index
    %c0_10 = arith.constant 0 : index
    %9 = vector.load %arg0[%c2, %c0_9, %c0_10] : memref<4x96x144xbf16, #tpu.memory_space<vmem>>, vector<1x96x144xbf16>
    %10 = vector.shape_cast %9 : vector<1x96x144xbf16> to vector<96x144xbf16>
    %c0_11 = arith.constant 0 : index
    %c0_12 = arith.constant 0 : index
    %11 = vector.load %arg1[%c0_11, %c0_12] : memref<144x32xbf16, #tpu.memory_space<vmem>>, vector<144x32xbf16>
    %cst_13 = arith.constant dense<0.000000e+00> : vector<96x32xf32>
    %12 = tpu.matmul %10, %11, %cst_13 {dimension_numbers = #tpu.dot_dimension_numbers<[1], [0], [0], [1], [0, 0, 1, 1], [], []>} : vector<96x144xbf16>, vector<144x32xbf16>, vector<96x32xf32> -> vector<96x32xf32>
    %13 = arith.maximumf %8, %12 : vector<96x32xf32>
    %c3 = arith.constant 3 : index
    %c0_14 = arith.constant 0 : index
    %c0_15 = arith.constant 0 : index
    %14 = vector.load %arg0[%c3, %c0_14, %c0_15] : memref<4x96x144xbf16, #tpu.memory_space<vmem>>, vector<1x96x144xbf16>
    %15 = vector.shape_cast %14 : vector<1x96x144xbf16> to vector<96x144xbf16>
    %c0_16 = arith.constant 0 : index
    %c0_17 = arith.constant 0 : index
    %16 = vector.load %arg1[%c0_16, %c0_17] : memref<144x32xbf16, #tpu.memory_space<vmem>>, vector<144x32xbf16>
    %cst_18 = arith.constant dense<0.000000e+00> : vector<96x32xf32>
    %17 = tpu.matmul %15, %16, %cst_18 {dimension_numbers = #tpu.dot_dimension_numbers<[1], [0], [0], [1], [0, 0, 1, 1], [], []>} : vector<96x144xbf16>, vector<144x32xbf16>, vector<96x32xf32> -> vector<96x32xf32>
    %18 = arith.maximumf %13, %17 : vector<96x32xf32>
    %c0_19 = arith.constant 0 : index
    %c0_20 = arith.constant 0 : index
    %19 = vector.load %arg2[%c0_19, %c0_20] : memref<1x32xf32, #tpu.memory_space<vmem>>, vector<1x32xf32>
    %20 = vector.broadcast %19 : vector<1x32xf32> to vector<96x32xf32>
    %21 = arith.addf %18, %20 : vector<96x32xf32>
    %cst_21 = arith.constant 0.000000e+00 : f32
    %22 = vector.broadcast %cst_21 : f32 to vector<96x32xf32>
    %23 = arith.maximumf %21, %22 : vector<96x32xf32>
    %24 = arith.truncf %23 : vector<96x32xf32> to vector<96x32xbf16>
    %c0_22 = arith.constant 0 : index
    %c0_23 = arith.constant 0 : index
    %25 = vector.load %arg3[%c0_22, %c0_23] : memref<96x32xbf16, #tpu.memory_space<vmem>>, vector<96x32xbf16>
    tpu.vector_store %arg3[%c0_22, %c0_23], %24 {strides = array<i32>} : memref<96x32xbf16, #tpu.memory_space<vmem>>, vector<96x32xbf16>,
    return
  }
}

module attributes {stable_mosaic.version = 11 : i64} {
  func.func @_tail_kernel(%arg0: memref<20x2x288xbf16, #tpu.memory_space<vmem>>, %arg1: memref<288x64xbf16, #tpu.memory_space<vmem>>, %arg2: memref<1x64xf32, #tpu.memory_space<vmem>>, %arg3: memref<5x64x128xbf16, #tpu.memory_space<vmem>>, %arg4: memref<1x128xf32, #tpu.memory_space<vmem>>, %arg5: memref<128x2xf32, #tpu.memory_space<vmem>>, %arg6: memref<1x2xf32, #tpu.memory_space<vmem>>, %arg7: memref<2x2xf32, #tpu.memory_space<vmem>>) attributes {dimension_semantics = [], scalar_prefetch = 0 : i64, scratch_operands = 0 : i64, tpu.core_type = #tpu.core_type<tc>} {
    %cst = arith.constant 0.000000e+00 : f32
    %0 = vector.broadcast %cst : f32 to vector<2x128xf32>
    %c0 = arith.constant 0 : index
    %c0_0 = arith.constant 0 : index
    %c0_1 = arith.constant 0 : index
    %1 = vector.load %arg0[%c0, %c0_0, %c0_1] : memref<20x2x288xbf16, #tpu.memory_space<vmem>>, vector<1x2x288xbf16>
    %2 = vector.shape_cast %1 : vector<1x2x288xbf16> to vector<2x288xbf16>
    %c0_2 = arith.constant 0 : index
    %c0_3 = arith.constant 0 : index
    %3 = vector.load %arg1[%c0_2, %c0_3] : memref<288x64xbf16, #tpu.memory_space<vmem>>, vector<288x64xbf16>
    %cst_4 = arith.constant dense<0.000000e+00> : vector<2x64xf32>
    %4 = tpu.matmul %2, %3, %cst_4 {dimension_numbers = #tpu.dot_dimension_numbers<[1], [0], [0], [1], [0, 0, 1, 1], [], []>} : vector<2x288xbf16>, vector<288x64xbf16>, vector<2x64xf32> -> vector<2x64xf32>
    %c5 = arith.constant 5 : index
    %c0_5 = arith.constant 0 : index
    %c0_6 = arith.constant 0 : index
    %5 = vector.load %arg0[%c5, %c0_5, %c0_6] : memref<20x2x288xbf16, #tpu.memory_space<vmem>>, vector<1x2x288xbf16>
    %6 = vector.shape_cast %5 : vector<1x2x288xbf16> to vector<2x288xbf16>
    %c0_7 = arith.constant 0 : index
    %c0_8 = arith.constant 0 : index
    %7 = vector.load %arg1[%c0_7, %c0_8] : memref<288x64xbf16, #tpu.memory_space<vmem>>, vector<288x64xbf16>
    %cst_9 = arith.constant dense<0.000000e+00> : vector<2x64xf32>
    %8 = tpu.matmul %6, %7, %cst_9 {dimension_numbers = #tpu.dot_dimension_numbers<[1], [0], [0], [1], [0, 0, 1, 1], [], []>} : vector<2x288xbf16>, vector<288x64xbf16>, vector<2x64xf32> -> vector<2x64xf32>
    %9 = arith.maximumf %4, %8 : vector<2x64xf32>
    %c10 = arith.constant 10 : index
    %c0_10 = arith.constant 0 : index
    %c0_11 = arith.constant 0 : index
    %10 = vector.load %arg0[%c10, %c0_10, %c0_11] : memref<20x2x288xbf16, #tpu.memory_space<vmem>>, vector<1x2x288xbf16>
    %11 = vector.shape_cast %10 : vector<1x2x288xbf16> to vector<2x288xbf16>
    %c0_12 = arith.constant 0 : index
    %c0_13 = arith.constant 0 : index
    %12 = vector.load %arg1[%c0_12, %c0_13] : memref<288x64xbf16, #tpu.memory_space<vmem>>, vector<288x64xbf16>
    %cst_14 = arith.constant dense<0.000000e+00> : vector<2x64xf32>
    %13 = tpu.matmul %11, %12, %cst_14 {dimension_numbers = #tpu.dot_dimension_numbers<[1], [0], [0], [1], [0, 0, 1, 1], [], []>} : vector<2x288xbf16>, vector<288x64xbf16>, vector<2x64xf32> -> vector<2x64xf32>
    %14 = arith.maximumf %9, %13 : vector<2x64xf32>
    %c15 = arith.constant 15 : index
    %c0_15 = arith.constant 0 : index
    %c0_16 = arith.constant 0 : index
    %15 = vector.load %arg0[%c15, %c0_15, %c0_16] : memref<20x2x288xbf16, #tpu.memory_space<vmem>>, vector<1x2x288xbf16>
    %16 = vector.shape_cast %15 : vector<1x2x288xbf16> to vector<2x288xbf16>
    %c0_17 = arith.constant 0 : index
    %c0_18 = arith.constant 0 : index
    %17 = vector.load %arg1[%c0_17, %c0_18] : memref<288x64xbf16, #tpu.memory_space<vmem>>, vector<288x64xbf16>
    %cst_19 = arith.constant dense<0.000000e+00> : vector<2x64xf32>
    %18 = tpu.matmul %16, %17, %cst_19 {dimension_numbers = #tpu.dot_dimension_numbers<[1], [0], [0], [1], [0, 0, 1, 1], [], []>} : vector<2x288xbf16>, vector<288x64xbf16>, vector<2x64xf32> -> vector<2x64xf32>
    %19 = arith.maximumf %14, %18 : vector<2x64xf32>
    %c0_20 = arith.constant 0 : index
    %c0_21 = arith.constant 0 : index
    %20 = vector.load %arg2[%c0_20, %c0_21] : memref<1x64xf32, #tpu.memory_space<vmem>>, vector<1x64xf32>
    %21 = vector.broadcast %20 : vector<1x64xf32> to vector<2x64xf32>
    %22 = arith.addf %19, %21 : vector<2x64xf32>
    %cst_22 = arith.constant 0.000000e+00 : f32
    %23 = vector.broadcast %cst_22 : f32 to vector<2x64xf32>
    %24 = arith.maximumf %22, %23 : vector<2x64xf32>
    %25 = arith.truncf %24 : vector<2x64xf32> to vector<2x64xbf16>
    %c0_23 = arith.constant 0 : index
    %c0_24 = arith.constant 0 : index
    %c0_25 = arith.constant 0 : index
    %26 = vector.load %arg3[%c0_23, %c0_24, %c0_25] : memref<5x64x128xbf16, #tpu.memory_space<vmem>>, vector<1x64x128xbf16>
    %27 = vector.shape_cast %26 : vector<1x64x128xbf16> to vector<64x128xbf16>
    %cst_26 = arith.constant dense<0.000000e+00> : vector<2x128xf32>
    %28 = tpu.matmul %25, %27, %cst_26 {dimension_numbers = #tpu.dot_dimension_numbers<[1], [0], [0], [1], [0, 0, 1, 1], [], []>} : vector<2x64xbf16>, vector<64x128xbf16>, vector<2x128xf32> -> vector<2x128xf32>
    %29 = arith.addf %0, %28 : vector<2x128xf32>
    %c1 = arith.constant 1 : index
    %c0_27 = arith.constant 0 : index
    %c0_28 = arith.constant 0 : index
    %30 = vector.load %arg0[%c1, %c0_27, %c0_28] : memref<20x2x288xbf16, #tpu.memory_space<vmem>>, vector<1x2x288xbf16>
    %31 = vector.shape_cast %30 : vector<1x2x288xbf16> to vector<2x288xbf16>
    %c0_29 = arith.constant 0 : index
    %c0_30 = arith.constant 0 : index
    %32 = vector.load %arg1[%c0_29, %c0_30] : memref<288x64xbf16, #tpu.memory_space<vmem>>, vector<288x64xbf16>
    %cst_31 = arith.constant dense<0.000000e+00> : vector<2x64xf32>
    %33 = tpu.matmul %31, %32, %cst_31 {dimension_numbers = #tpu.dot_dimension_numbers<[1], [0], [0], [1], [0, 0, 1, 1], [], []>} : vector<2x288xbf16>, vector<288x64xbf16>, vector<2x64xf32> -> vector<2x64xf32>
    %c6 = arith.constant 6 : index
    %c0_32 = arith.constant 0 : index
    %c0_33 = arith.constant 0 : index
    %34 = vector.load %arg0[%c6, %c0_32, %c0_33] : memref<20x2x288xbf16, #tpu.memory_space<vmem>>, vector<1x2x288xbf16>
    %35 = vector.shape_cast %34 : vector<1x2x288xbf16> to vector<2x288xbf16>
    %c0_34 = arith.constant 0 : index
    %c0_35 = arith.constant 0 : index
    %36 = vector.load %arg1[%c0_34, %c0_35] : memref<288x64xbf16, #tpu.memory_space<vmem>>, vector<288x64xbf16>
    %cst_36 = arith.constant dense<0.000000e+00> : vector<2x64xf32>
    %37 = tpu.matmul %35, %36, %cst_36 {dimension_numbers = #tpu.dot_dimension_numbers<[1], [0], [0], [1], [0, 0, 1, 1], [], []>} : vector<2x288xbf16>, vector<288x64xbf16>, vector<2x64xf32> -> vector<2x64xf32>
    %38 = arith.maximumf %33, %37 : vector<2x64xf32>
    %c11 = arith.constant 11 : index
    %c0_37 = arith.constant 0 : index
    %c0_38 = arith.constant 0 : index
    %39 = vector.load %arg0[%c11, %c0_37, %c0_38] : memref<20x2x288xbf16, #tpu.memory_space<vmem>>, vector<1x2x288xbf16>
    %40 = vector.shape_cast %39 : vector<1x2x288xbf16> to vector<2x288xbf16>
    %c0_39 = arith.constant 0 : index
    %c0_40 = arith.constant 0 : index
    %41 = vector.load %arg1[%c0_39, %c0_40] : memref<288x64xbf16, #tpu.memory_space<vmem>>, vector<288x64xbf16>
    %cst_41 = arith.constant dense<0.000000e+00> : vector<2x64xf32>
    %42 = tpu.matmul %40, %41, %cst_41 {dimension_numbers = #tpu.dot_dimension_numbers<[1], [0], [0], [1], [0, 0, 1, 1], [], []>} : vector<2x288xbf16>, vector<288x64xbf16>, vector<2x64xf32> -> vector<2x64xf32>
    %43 = arith.maximumf %38, %42 : vector<2x64xf32>
    %c16 = arith.constant 16 : index
    %c0_42 = arith.constant 0 : index
    %c0_43 = arith.constant 0 : index
    %44 = vector.load %arg0[%c16, %c0_42, %c0_43] : memref<20x2x288xbf16, #tpu.memory_space<vmem>>, vector<1x2x288xbf16>
    %45 = vector.shape_cast %44 : vector<1x2x288xbf16> to vector<2x288xbf16>
    %c0_44 = arith.constant 0 : index
    %c0_45 = arith.constant 0 : index
    %46 = vector.load %arg1[%c0_44, %c0_45] : memref<288x64xbf16, #tpu.memory_space<vmem>>, vector<288x64xbf16>
    %cst_46 = arith.constant dense<0.000000e+00> : vector<2x64xf32>
    %47 = tpu.matmul %45, %46, %cst_46 {dimension_numbers = #tpu.dot_dimension_numbers<[1], [0], [0], [1], [0, 0, 1, 1], [], []>} : vector<2x288xbf16>, vector<288x64xbf16>, vector<2x64xf32> -> vector<2x64xf32>
    %48 = arith.maximumf %43, %47 : vector<2x64xf32>
    %c0_47 = arith.constant 0 : index
    %c0_48 = arith.constant 0 : index
    %49 = vector.load %arg2[%c0_47, %c0_48] : memref<1x64xf32, #tpu.memory_space<vmem>>, vector<1x64xf32>
    %50 = vector.broadcast %49 : vector<1x64xf32> to vector<2x64xf32>
    %51 = arith.addf %48, %50 : vector<2x64xf32>
    %cst_49 = arith.constant 0.000000e+00 : f32
    %52 = vector.broadcast %cst_49 : f32 to vector<2x64xf32>
    %53 = arith.maximumf %51, %52 : vector<2x64xf32>
    %54 = arith.truncf %53 : vector<2x64xf32> to vector<2x64xbf16>
    %c1_50 = arith.constant 1 : index
    %c0_51 = arith.constant 0 : index
    %c0_52 = arith.constant 0 : index
    %55 = vector.load %arg3[%c1_50, %c0_51, %c0_52] : memref<5x64x128xbf16, #tpu.memory_space<vmem>>, vector<1x64x128xbf16>
    %56 = vector.shape_cast %55 : vector<1x64x128xbf16> to vector<64x128xbf16>
    %cst_53 = arith.constant dense<0.000000e+00> : vector<2x128xf32>
    %57 = tpu.matmul %54, %56, %cst_53 {dimension_numbers = #tpu.dot_dimension_numbers<[1], [0], [0], [1], [0, 0, 1, 1], [], []>} : vector<2x64xbf16>, vector<64x128xbf16>, vector<2x128xf32> -> vector<2x128xf32>
    %58 = arith.addf %29, %57 : vector<2x128xf32>
    %c2 = arith.constant 2 : index
    %c0_54 = arith.constant 0 : index
    %c0_55 = arith.constant 0 : index
    %59 = vector.load %arg0[%c2, %c0_54, %c0_55] : memref<20x2x288xbf16, #tpu.memory_space<vmem>>, vector<1x2x288xbf16>
    %60 = vector.shape_cast %59 : vector<1x2x288xbf16> to vector<2x288xbf16>
    %c0_56 = arith.constant 0 : index
    %c0_57 = arith.constant 0 : index
    %61 = vector.load %arg1[%c0_56, %c0_57] : memref<288x64xbf16, #tpu.memory_space<vmem>>, vector<288x64xbf16>
    %cst_58 = arith.constant dense<0.000000e+00> : vector<2x64xf32>
    %62 = tpu.matmul %60, %61, %cst_58 {dimension_numbers = #tpu.dot_dimension_numbers<[1], [0], [0], [1], [0, 0, 1, 1], [], []>} : vector<2x288xbf16>, vector<288x64xbf16>, vector<2x64xf32> -> vector<2x64xf32>
    %c7 = arith.constant 7 : index
    %c0_59 = arith.constant 0 : index
    %c0_60 = arith.constant 0 : index
    %63 = vector.load %arg0[%c7, %c0_59, %c0_60] : memref<20x2x288xbf16, #tpu.memory_space<vmem>>, vector<1x2x288xbf16>
    %64 = vector.shape_cast %63 : vector<1x2x288xbf16> to vector<2x288xbf16>
    %c0_61 = arith.constant 0 : index
    %c0_62 = arith.constant 0 : index
    %65 = vector.load %arg1[%c0_61, %c0_62] : memref<288x64xbf16, #tpu.memory_space<vmem>>, vector<288x64xbf16>
    %cst_63 = arith.constant dense<0.000000e+00> : vector<2x64xf32>
    %66 = tpu.matmul %64, %65, %cst_63 {dimension_numbers = #tpu.dot_dimension_numbers<[1], [0], [0], [1], [0, 0, 1, 1], [], []>} : vector<2x288xbf16>, vector<288x64xbf16>, vector<2x64xf32> -> vector<2x64xf32>
    %67 = arith.maximumf %62, %66 : vector<2x64xf32>
    %c12 = arith.constant 12 : index
    %c0_64 = arith.constant 0 : index
    %c0_65 = arith.constant 0 : index
    %68 = vector.load %arg0[%c12, %c0_64, %c0_65] : memref<20x2x288xbf16, #tpu.memory_space<vmem>>, vector<1x2x288xbf16>
    %69 = vector.shape_cast %68 : vector<1x2x288xbf16> to vector<2x288xbf16>
    %c0_66 = arith.constant 0 : index
    %c0_67 = arith.constant 0 : index
    %70 = vector.load %arg1[%c0_66, %c0_67] : memref<288x64xbf16, #tpu.memory_space<vmem>>, vector<288x64xbf16>
    %cst_68 = arith.constant dense<0.000000e+00> : vector<2x64xf32>
    %71 = tpu.matmul %69, %70, %cst_68 {dimension_numbers = #tpu.dot_dimension_numbers<[1], [0], [0], [1], [0, 0, 1, 1], [], []>} : vector<2x288xbf16>, vector<288x64xbf16>, vector<2x64xf32> -> vector<2x64xf32>
    %72 = arith.maximumf %67, %71 : vector<2x64xf32>
    %c17 = arith.constant 17 : index
    %c0_69 = arith.constant 0 : index
    %c0_70 = arith.constant 0 : index
    %73 = vector.load %arg0[%c17, %c0_69, %c0_70] : memref<20x2x288xbf16, #tpu.memory_space<vmem>>, vector<1x2x288xbf16>
    %74 = vector.shape_cast %73 : vector<1x2x288xbf16> to vector<2x288xbf16>
    %c0_71 = arith.constant 0 : index
    %c0_72 = arith.constant 0 : index
    %75 = vector.load %arg1[%c0_71, %c0_72] : memref<288x64xbf16, #tpu.memory_space<vmem>>, vector<288x64xbf16>
    %cst_73 = arith.constant dense<0.000000e+00> : vector<2x64xf32>
    %76 = tpu.matmul %74, %75, %cst_73 {dimension_numbers = #tpu.dot_dimension_numbers<[1], [0], [0], [1], [0, 0, 1, 1], [], []>} : vector<2x288xbf16>, vector<288x64xbf16>, vector<2x64xf32> -> vector<2x64xf32>
    %77 = arith.maximumf %72, %76 : vector<2x64xf32>
    %c0_74 = arith.constant 0 : index
    %c0_75 = arith.constant 0 : index
    %78 = vector.load %arg2[%c0_74, %c0_75] : memref<1x64xf32, #tpu.memory_space<vmem>>, vector<1x64xf32>
    %79 = vector.broadcast %78 : vector<1x64xf32> to vector<2x64xf32>
    %80 = arith.addf %77, %79 : vector<2x64xf32>
    %cst_76 = arith.constant 0.000000e+00 : f32
    %81 = vector.broadcast %cst_76 : f32 to vector<2x64xf32>
    %82 = arith.maximumf %80, %81 : vector<2x64xf32>
    %83 = arith.truncf %82 : vector<2x64xf32> to vector<2x64xbf16>
    %c2_77 = arith.constant 2 : index
    %c0_78 = arith.constant 0 : index
    %c0_79 = arith.constant 0 : index
    %84 = vector.load %arg3[%c2_77, %c0_78, %c0_79] : memref<5x64x128xbf16, #tpu.memory_space<vmem>>, vector<1x64x128xbf16>
    %85 = vector.shape_cast %84 : vector<1x64x128xbf16> to vector<64x128xbf16>
    %cst_80 = arith.constant dense<0.000000e+00> : vector<2x128xf32>
    %86 = tpu.matmul %83, %85, %cst_80 {dimension_numbers = #tpu.dot_dimension_numbers<[1], [0], [0], [1], [0, 0, 1, 1], [], []>} : vector<2x64xbf16>, vector<64x128xbf16>, vector<2x128xf32> -> vector<2x128xf32>
    %87 = arith.addf %58, %86 : vector<2x128xf32>
    %c3 = arith.constant 3 : index
    %c0_81 = arith.constant 0 : index
    %c0_82 = arith.constant 0 : index
    %88 = vector.load %arg0[%c3, %c0_81, %c0_82] : memref<20x2x288xbf16, #tpu.memory_space<vmem>>, vector<1x2x288xbf16>
    %89 = vector.shape_cast %88 : vector<1x2x288xbf16> to vector<2x288xbf16>
    %c0_83 = arith.constant 0 : index
    %c0_84 = arith.constant 0 : index
    %90 = vector.load %arg1[%c0_83, %c0_84] : memref<288x64xbf16, #tpu.memory_space<vmem>>, vector<288x64xbf16>
    %cst_85 = arith.constant dense<0.000000e+00> : vector<2x64xf32>
    %91 = tpu.matmul %89, %90, %cst_85 {dimension_numbers = #tpu.dot_dimension_numbers<[1], [0], [0], [1], [0, 0, 1, 1], [], []>} : vector<2x288xbf16>, vector<288x64xbf16>, vector<2x64xf32> -> vector<2x64xf32>
    %c8 = arith.constant 8 : index
    %c0_86 = arith.constant 0 : index
    %c0_87 = arith.constant 0 : index
    %92 = vector.load %arg0[%c8, %c0_86, %c0_87] : memref<20x2x288xbf16, #tpu.memory_space<vmem>>, vector<1x2x288xbf16>
    %93 = vector.shape_cast %92 : vector<1x2x288xbf16> to vector<2x288xbf16>
    %c0_88 = arith.constant 0 : index
    %c0_89 = arith.constant 0 : index
    %94 = vector.load %arg1[%c0_88, %c0_89] : memref<288x64xbf16, #tpu.memory_space<vmem>>, vector<288x64xbf16>
    %cst_90 = arith.constant dense<0.000000e+00> : vector<2x64xf32>
    %95 = tpu.matmul %93, %94, %cst_90 {dimension_numbers = #tpu.dot_dimension_numbers<[1], [0], [0], [1], [0, 0, 1, 1], [], []>} : vector<2x288xbf16>, vector<288x64xbf16>, vector<2x64xf32> -> vector<2x64xf32>
    %96 = arith.maximumf %91, %95 : vector<2x64xf32>
    %c13 = arith.constant 13 : index
    %c0_91 = arith.constant 0 : index
    %c0_92 = arith.constant 0 : index
    %97 = vector.load %arg0[%c13, %c0_91, %c0_92] : memref<20x2x288xbf16, #tpu.memory_space<vmem>>, vector<1x2x288xbf16>
    %98 = vector.shape_cast %97 : vector<1x2x288xbf16> to vector<2x288xbf16>
    %c0_93 = arith.constant 0 : index
    %c0_94 = arith.constant 0 : index
    %99 = vector.load %arg1[%c0_93, %c0_94] : memref<288x64xbf16, #tpu.memory_space<vmem>>, vector<288x64xbf16>
    %cst_95 = arith.constant dense<0.000000e+00> : vector<2x64xf32>
    %100 = tpu.matmul %98, %99, %cst_95 {dimension_numbers = #tpu.dot_dimension_numbers<[1], [0], [0], [1], [0, 0, 1, 1], [], []>} : vector<2x288xbf16>, vector<288x64xbf16>, vector<2x64xf32> -> vector<2x64xf32>
    %101 = arith.maximumf %96, %100 : vector<2x64xf32>
    %c18 = arith.constant 18 : index
    %c0_96 = arith.constant 0 : index
    %c0_97 = arith.constant 0 : index
    %102 = vector.load %arg0[%c18, %c0_96, %c0_97] : memref<20x2x288xbf16, #tpu.memory_space<vmem>>, vector<1x2x288xbf16>
    %103 = vector.shape_cast %102 : vector<1x2x288xbf16> to vector<2x288xbf16>
    %c0_98 = arith.constant 0 : index
    %c0_99 = arith.constant 0 : index
    %104 = vector.load %arg1[%c0_98, %c0_99] : memref<288x64xbf16, #tpu.memory_space<vmem>>, vector<288x64xbf16>
    %cst_100 = arith.constant dense<0.000000e+00> : vector<2x64xf32>
    %105 = tpu.matmul %103, %104, %cst_100 {dimension_numbers = #tpu.dot_dimension_numbers<[1], [0], [0], [1], [0, 0, 1, 1], [], []>} : vector<2x288xbf16>, vector<288x64xbf16>, vector<2x64xf32> -> vector<2x64xf32>
    %106 = arith.maximumf %101, %105 : vector<2x64xf32>
    %c0_101 = arith.constant 0 : index
    %c0_102 = arith.constant 0 : index
    %107 = vector.load %arg2[%c0_101, %c0_102] : memref<1x64xf32, #tpu.memory_space<vmem>>, vector<1x64xf32>
    %108 = vector.broadcast %107 : vector<1x64xf32> to vector<2x64xf32>
    %109 = arith.addf %106, %108 : vector<2x64xf32>
    %cst_103 = arith.constant 0.000000e+00 : f32
    %110 = vector.broadcast %cst_103 : f32 to vector<2x64xf32>
    %111 = arith.maximumf %109, %110 : vector<2x64xf32>
    %112 = arith.truncf %111 : vector<2x64xf32> to vector<2x64xbf16>
    %c3_104 = arith.constant 3 : index
    %c0_105 = arith.constant 0 : index
    %c0_106 = arith.constant 0 : index
    %113 = vector.load %arg3[%c3_104, %c0_105, %c0_106] : memref<5x64x128xbf16, #tpu.memory_space<vmem>>, vector<1x64x128xbf16>
    %114 = vector.shape_cast %113 : vector<1x64x128xbf16> to vector<64x128xbf16>
    %cst_107 = arith.constant dense<0.000000e+00> : vector<2x128xf32>
    %115 = tpu.matmul %112, %114, %cst_107 {dimension_numbers = #tpu.dot_dimension_numbers<[1], [0], [0], [1], [0, 0, 1, 1], [], []>} : vector<2x64xbf16>, vector<64x128xbf16>, vector<2x128xf32> -> vector<2x128xf32>
    %116 = arith.addf %87, %115 : vector<2x128xf32>
    %c4 = arith.constant 4 : index
    %c0_108 = arith.constant 0 : index
    %c0_109 = arith.constant 0 : index
    %117 = vector.load %arg0[%c4, %c0_108, %c0_109] : memref<20x2x288xbf16, #tpu.memory_space<vmem>>, vector<1x2x288xbf16>
    %118 = vector.shape_cast %117 : vector<1x2x288xbf16> to vector<2x288xbf16>
    %c0_110 = arith.constant 0 : index
    %c0_111 = arith.constant 0 : index
    %119 = vector.load %arg1[%c0_110, %c0_111] : memref<288x64xbf16, #tpu.memory_space<vmem>>, vector<288x64xbf16>
    %cst_112 = arith.constant dense<0.000000e+00> : vector<2x64xf32>
    %120 = tpu.matmul %118, %119, %cst_112 {dimension_numbers = #tpu.dot_dimension_numbers<[1], [0], [0], [1], [0, 0, 1, 1], [], []>} : vector<2x288xbf16>, vector<288x64xbf16>, vector<2x64xf32> -> vector<2x64xf32>
    %c9 = arith.constant 9 : index
    %c0_113 = arith.constant 0 : index
    %c0_114 = arith.constant 0 : index
    %121 = vector.load %arg0[%c9, %c0_113, %c0_114] : memref<20x2x288xbf16, #tpu.memory_space<vmem>>, vector<1x2x288xbf16>
    %122 = vector.shape_cast %121 : vector<1x2x288xbf16> to vector<2x288xbf16>
    %c0_115 = arith.constant 0 : index
    %c0_116 = arith.constant 0 : index
    %123 = vector.load %arg1[%c0_115, %c0_116] : memref<288x64xbf16, #tpu.memory_space<vmem>>, vector<288x64xbf16>
    %cst_117 = arith.constant dense<0.000000e+00> : vector<2x64xf32>
    %124 = tpu.matmul %122, %123, %cst_117 {dimension_numbers = #tpu.dot_dimension_numbers<[1], [0], [0], [1], [0, 0, 1, 1], [], []>} : vector<2x288xbf16>, vector<288x64xbf16>, vector<2x64xf32> -> vector<2x64xf32>
    %125 = arith.maximumf %120, %124 : vector<2x64xf32>
    %c14 = arith.constant 14 : index
    %c0_118 = arith.constant 0 : index
    %c0_119 = arith.constant 0 : index
    %126 = vector.load %arg0[%c14, %c0_118, %c0_119] : memref<20x2x288xbf16, #tpu.memory_space<vmem>>, vector<1x2x288xbf16>
    %127 = vector.shape_cast %126 : vector<1x2x288xbf16> to vector<2x288xbf16>
    %c0_120 = arith.constant 0 : index
    %c0_121 = arith.constant 0 : index
    %128 = vector.load %arg1[%c0_120, %c0_121] : memref<288x64xbf16, #tpu.memory_space<vmem>>, vector<288x64xbf16>
    %cst_122 = arith.constant dense<0.000000e+00> : vector<2x64xf32>
    %129 = tpu.matmul %127, %128, %cst_122 {dimension_numbers = #tpu.dot_dimension_numbers<[1], [0], [0], [1], [0, 0, 1, 1], [], []>} : vector<2x288xbf16>, vector<288x64xbf16>, vector<2x64xf32> -> vector<2x64xf32>
    %130 = arith.maximumf %125, %129 : vector<2x64xf32>
    %c19 = arith.constant 19 : index
    %c0_123 = arith.constant 0 : index
    %c0_124 = arith.constant 0 : index
    %131 = vector.load %arg0[%c19, %c0_123, %c0_124] : memref<20x2x288xbf16, #tpu.memory_space<vmem>>, vector<1x2x288xbf16>
    %132 = vector.shape_cast %131 : vector<1x2x288xbf16> to vector<2x288xbf16>
    %c0_125 = arith.constant 0 : index
    %c0_126 = arith.constant 0 : index
    %133 = vector.load %arg1[%c0_125, %c0_126] : memref<288x64xbf16, #tpu.memory_space<vmem>>, vector<288x64xbf16>
    %cst_127 = arith.constant dense<0.000000e+00> : vector<2x64xf32>
    %134 = tpu.matmul %132, %133, %cst_127 {dimension_numbers = #tpu.dot_dimension_numbers<[1], [0], [0], [1], [0, 0, 1, 1], [], []>} : vector<2x288xbf16>, vector<288x64xbf16>, vector<2x64xf32> -> vector<2x64xf32>
    %135 = arith.maximumf %130, %134 : vector<2x64xf32>
    %c0_128 = arith.constant 0 : index
    %c0_129 = arith.constant 0 : index
    %136 = vector.load %arg2[%c0_128, %c0_129] : memref<1x64xf32, #tpu.memory_space<vmem>>, vector<1x64xf32>
    %137 = vector.broadcast %136 : vector<1x64xf32> to vector<2x64xf32>
    %138 = arith.addf %135, %137 : vector<2x64xf32>
    %cst_130 = arith.constant 0.000000e+00 : f32
    %139 = vector.broadcast %cst_130 : f32 to vector<2x64xf32>
    %140 = arith.maximumf %138, %139 : vector<2x64xf32>
    %141 = arith.truncf %140 : vector<2x64xf32> to vector<2x64xbf16>
    %c4_131 = arith.constant 4 : index
    %c0_132 = arith.constant 0 : index
    %c0_133 = arith.constant 0 : index
    %142 = vector.load %arg3[%c4_131, %c0_132, %c0_133] : memref<5x64x128xbf16, #tpu.memory_space<vmem>>, vector<1x64x128xbf16>
    %143 = vector.shape_cast %142 : vector<1x64x128xbf16> to vector<64x128xbf16>
    %cst_134 = arith.constant dense<0.000000e+00> : vector<2x128xf32>
    %144 = tpu.matmul %141, %143, %cst_134 {dimension_numbers = #tpu.dot_dimension_numbers<[1], [0], [0], [1], [0, 0, 1, 1], [], []>} : vector<2x64xbf16>, vector<64x128xbf16>, vector<2x128xf32> -> vector<2x128xf32>
    %145 = arith.addf %116, %144 : vector<2x128xf32>
    %c0_135 = arith.constant 0 : index
    %c0_136 = arith.constant 0 : index
    %146 = vector.load %arg4[%c0_135, %c0_136] : memref<1x128xf32, #tpu.memory_space<vmem>>, vector<1x128xf32>
    %147 = vector.broadcast %146 : vector<1x128xf32> to vector<2x128xf32>
    %148 = arith.addf %145, %147 : vector<2x128xf32>
    %cst_137 = arith.constant 0.000000e+00 : f32
    %149 = vector.broadcast %cst_137 : f32 to vector<2x128xf32>
    %150 = arith.subf %149, %148 : vector<2x128xf32>
    %151 = math.exp %150 : vector<2x128xf32>
    %cst_138 = arith.constant 1.000000e+00 : f32
    %152 = vector.broadcast %cst_138 : f32 to vector<2x128xf32>
    %153 = arith.addf %152, %151 : vector<2x128xf32>
    %cst_139 = arith.constant 1.000000e+00 : f32
    %154 = vector.broadcast %cst_139 : f32 to vector<2x128xf32>
    %155 = arith.divf %154, %153 : vector<2x128xf32>
    %c0_140 = arith.constant 0 : index
    %c0_141 = arith.constant 0 : index
    %156 = vector.load %arg5[%c0_140, %c0_141] : memref<128x2xf32, #tpu.memory_space<vmem>>, vector<128x2xf32>
    %cst_142 = arith.constant dense<0.000000e+00> : vector<2x2xf32>
    %157 = tpu.matmul %155, %156, %cst_142 {dimension_numbers = #tpu.dot_dimension_numbers<[1], [0], [0], [1], [0, 0, 1, 1], [], []>} : vector<2x128xf32>, vector<128x2xf32>, vector<2x2xf32> -> vector<2x2xf32>
    %c0_143 = arith.constant 0 : index
    %c0_144 = arith.constant 0 : index
    %158 = vector.load %arg6[%c0_143, %c0_144] : memref<1x2xf32, #tpu.memory_space<vmem>>, vector<1x2xf32>
    %159 = vector.broadcast %158 : vector<1x2xf32> to vector<2x2xf32>
    %160 = arith.addf %157, %159 : vector<2x2xf32>
    %cst_145 = arith.constant dense<0xFF800000> : vector<2xf32>
    %161 = vector.multi_reduction <maximumf>, %160, %cst_145 [1] : vector<2x2xf32> to vector<2xf32>
    %162 = vector.shape_cast %161 : vector<2xf32> to vector<2x1xf32>
    %163 = vector.broadcast %162 : vector<2x1xf32> to vector<2x2xf32>
    %164 = arith.subf %160, %163 : vector<2x2xf32>
    %165 = math.exp %164 : vector<2x2xf32>
    %cst_146 = arith.constant dense<0.000000e+00> : vector<2xf32>
    %166 = vector.multi_reduction <add>, %165, %cst_146 [1] : vector<2x2xf32> to vector<2xf32>
    %167 = vector.shape_cast %166 : vector<2xf32> to vector<2x1xf32>
    %168 = vector.broadcast %167 : vector<2x1xf32> to vector<2x2xf32>
    %169 = arith.divf %165, %168 : vector<2x2xf32>
    %c0_147 = arith.constant 0 : index
    %c0_148 = arith.constant 0 : index
    %170 = vector.load %arg7[%c0_147, %c0_148] : memref<2x2xf32, #tpu.memory_space<vmem>>, vector<2x2xf32>
    tpu.vector_store %arg7[%c0_147, %c0_148], %169 {strides = array<i32>} : memref<2x2xf32, #tpu.memory_space<vmem>>, vector<2x2xf32>,
    return
  }
}

</mosaic_0001>

<bundles_post_ra>
// kernel: convnn_forward.3
= control target key start
LH: loop header
LB: loop body
LE: loop exit
PB: predicated region body
PF: predicated region fallthrough
CT: control target
= control target key end

     0   :  { %v6450_v0 = vmov 0.0   ;;  %vm4677_vm0 = vmmov 0   ;;  %vm382_vm1 = vcmask 1044480   ;;  %vm383_vm2 = vcmask 1045504   ;;  %s6446_s1 = inlined_call_operand.vmem [shape: bf16[75,16], index: 1, kind: input, shape index: {}]   ;;  %s6447_s0 = inlined_call_operand.vmem [shape: bf16[4,520,75], index: 0, kind: input, shape index: {}]   ;;  %s6448_s2 = inlined_call_operand.vmem [shape: f32[1,16], index: 2, kind: input, shape index: {}]   ;;  %s6449_s3 = inlined_call_operand.vmem [shape: bf16[520,16], index: 3, kind: output, shape index: {}]  }
   0x1   :  { %3967 = vmatprep.subr.bf16.mxu0 %v6450_v0  ;;  %4109 = vmatprep.subr.bf16.mxu1 %v6450_v0  ;;  %v4538_v1 = vld [vmem:[%s6446_s1] sm:$0xff]   ;;  %v4539_v2 = vld [vmem:[%s6446_s1 + $0x8] sm:$0xff]   ;;  %v4540_v3 = vld [vmem:[%s6446_s1 + $0x10] sm:$0xff]   ;;  %v4678_v4 = vmov 65535   ;;  %vm282_vm3 = vcmask 613376   ;;  %vm3150_vm4 = vcmask 125952  }
   0x2   :  { %3968 = vmatpush3.bf16.msra.mxu0 %v4538_v1  ;;  %4110 = vmatpush3.bf16.msra.mxu1 %v4538_v1  ;;  %v384_v5 = vsel %vm382_vm1, 4294967295, %v4678_v4  ;;  %v4541_v6 = vld [vmem:[%s6446_s1 + $0x18] sm:$0xff]   ;;  %v4542_v7 = vld [vmem:[%s6446_s1 + $0x20] sm:$0x3f]   ;;  %v4545_v12 = vld [vmem:[%s6447_s0 + $0x8] sm:$0xff]  }
   0x3   :  { %3969 = vmatprep.subr.bf16.mxu0 %v6450_v0  ;;  %4111 = vmatprep.subr.bf16.mxu1 %v6450_v0  ;;  %v385_v8 = vsel %vm383_vm2, %v384_v5, 0  ;;  %v4543_v10 = vld [vmem:[%s6447_s0] sm:$0xff]   ;;  %v4546_v13 = vld [vmem:[%s6447_s0 + $0x10c] sm:$0xff]   ;;  %v4548_v15 = vld [vmem:[%s6447_s0 + $0x114] sm:$0xff]  }
   0x4   :  { %3977 = vmatprep.mubr.msk.bf16.mxu0 %vm4677_vm0, %v6450_v0  ;;  %4119 = vmatprep.mubr.msk.bf16.mxu1 %vm4677_vm0, %v6450_v0  ;;  %v387_v9 = vand.u32 %v4542_v7, %v385_v8  ;;  %v4544_v11 = vld [vmem:[%s6447_s0 + $0x104] sm:$0xff]   ;;  %v4547_v14 = vld [vmem:[%s6447_s0 + $0x10] sm:$0xff]   ;;  %v4549_v16 = vld [vmem:[%s6447_s0 + $0x18] sm:$0xff]  }
   0x5   :  { %v4550_v17 = vld [vmem:[%s6447_s0 + $0x11c] sm:$0xff]   ;;  %v4552_v19 = vld [vmem:[%s6447_s0 + $0x124] sm:$0xff]   ;;  %v4554_v21 = vld [vmem:[%s6447_s0 + $0x12c] sm:$0xff]  }
   0x6   :  { %3970 = vmatpush3.bf16.msra.mxu0 %v4539_v2  ;;  %4112 = vmatpush3.bf16.msra.mxu1 %v4539_v2  ;;  %v4551_v18 = vld [vmem:[%s6447_s0 + $0x20] sm:$0xff]   ;;  %v4553_v20 = vld [vmem:[%s6447_s0 + $0x28] sm:$0xff]   ;;  %v4555_v22 = vld [vmem:[%s6447_s0 + $0x30] sm:$0xff]  }
   0x7   :  { %3971 = vmatprep.subr.bf16.mxu0 %v6450_v0  ;;  %4113 = vmatprep.subr.bf16.mxu1 %v6450_v0  ;;  %v4556_v23 = vld [vmem:[%s6447_s0 + $0x134] sm:$0xff]   ;;  %v4558_v25 = vld [vmem:[%s6447_s0 + $0x13c] sm:$0xff]   ;;  %v4560_v27 = vld [vmem:[%s6447_s0 + $0x144] sm:$0xff]  }
   0x8   :  { %v4557_v24 = vld [vmem:[%s6447_s0 + $0x38] sm:$0xff]   ;;  %v4559_v26 = vld [vmem:[%s6447_s0 + $0x40] sm:$0xff]   ;;  %v4561_v28 = vld [vmem:[%s6447_s0 + $0x48] sm:$0xff]  }
   0x9   :  { %v4562_v29 = vld [vmem:[%s6447_s0 + $0x14c] sm:$0xff]   ;;  %v4564_v31 = vld [vmem:[%s6447_s0 + $0x154] sm:$0xff]   ;;  %v4566_v33 = vld [vmem:[%s6447_s0 + $0x15c] sm:$0xff]  }
   0xa   :  { %3972 = vmatpush3.bf16.msra.mxu0 %v4540_v3  ;;  %4114 = vmatpush3.bf16.msra.mxu1 %v4540_v3  ;;  %v4563_v30 = vld [vmem:[%s6447_s0 + $0x50] sm:$0xff]   ;;  %v4565_v32 = vld [vmem:[%s6447_s0 + $0x58] sm:$0xff]   ;;  %v4567_v34 = vld [vmem:[%s6447_s0 + $0x60] sm:$0xff]  }
   0xb   :  { %3973 = vmatprep.subr.bf16.mxu0 %v6450_v0  ;;  %4115 = vmatprep.subr.bf16.mxu1 %v6450_v0  ;;  %v4568_v35 = vld [vmem:[%s6447_s0 + $0x164] sm:$0xff]   ;;  %v4570_v37 = vld [vmem:[%s6447_s0 + $0x16c] sm:$0xff]   ;;  %v4572_v39 = vld [vmem:[%s6447_s0 + $0x174] sm:$0xff]  }
   0xc   :  { %v4569_v36 = vld [vmem:[%s6447_s0 + $0x68] sm:$0xff]   ;;  %v4571_v38 = vld [vmem:[%s6447_s0 + $0x70] sm:$0xff]   ;;  %v4573_v40 = vld [vmem:[%s6447_s0 + $0x78] sm:$0xff]  }
   0xd   :  { %v4574_v41 = vld [vmem:[%s6447_s0 + $0x17c] sm:$0xff]   ;;  %v4576_v43 = vld [vmem:[%s6447_s0 + $0x184] sm:$0xff]   ;;  %v4578_v45 = vld [vmem:[%s6447_s0 + $0x18c] sm:$0xff]  }
   0xe   :  { %3974 = vmatpush3.bf16.msra.mxu0 %v4541_v6  ;;  %4116 = vmatpush3.bf16.msra.mxu1 %v4541_v6  ;;  %v4575_v42 = vld [vmem:[%s6447_s0 + $0x80] sm:$0xff]   ;;  %v4577_v44 = vld [vmem:[%s6447_s0 + $0x88] sm:$0xff]   ;;  %v4579_v46 = vld [vmem:[%s6447_s0 + $0x90] sm:$0xff]  }
   0xf   :  { %3975 = vmatprep.subr.bf16.mxu0 %v6450_v0  ;;  %4117 = vmatprep.subr.bf16.mxu1 %v6450_v0  ;;  %v4580_v47 = vld [vmem:[%s6447_s0 + $0x194] sm:$0xff]   ;;  %v4582_v49 = vld [vmem:[%s6447_s0 + $0x19c] sm:$0xff]   ;;  %v4584_v51 = vld [vmem:[%s6447_s0 + $0x1a4] sm:$0xff]  }
  0x10   :  { %v4581_v48 = vld [vmem:[%s6447_s0 + $0x98] sm:$0xff]   ;;  %v4583_v50 = vld [vmem:[%s6447_s0 + $0xa0] sm:$0xff]   ;;  %v4585_v52 = vld [vmem:[%s6447_s0 + $0xa8] sm:$0xff]  }
  0x11   :  { %v4586_v53 = vld [vmem:[%s6447_s0 + $0x1ac] sm:$0xff]   ;;  %v4588_v55 = vld [vmem:[%s6447_s0 + $0x1b4] sm:$0xff]   ;;  %v4590_v57 = vld [vmem:[%s6447_s0 + $0x1bc] sm:$0xff]  }
  0x12   :  { %3976 = vmatpush3.bf16.msra.mxu0 %v387_v9  ;;  %4118 = vmatpush3.bf16.msra.mxu1 %v387_v9  ;;  %v4587_v54 = vld [vmem:[%s6447_s0 + $0xb0] sm:$0xff]   ;;  %v4589_v56 = vld [vmem:[%s6447_s0 + $0xb8] sm:$0xff]   ;;  %v4591_v58 = vld [vmem:[%s6447_s0 + $0xc0] sm:$0xff]  }
  0x13   :  { %4251 = vmatprep.subr.bf16.mxu0 %v6450_v0  ;;  %4393 = vmatprep.subr.bf16.mxu1 %v6450_v0  ;;  %v4592_v59 = vld [vmem:[%s6447_s0 + $0x1c4] sm:$0xff]   ;;  %v4594_v61 = vld [vmem:[%s6447_s0 + $0x1cc] sm:$0xff]   ;;  %v4596_v63 = vld [vmem:[%s6447_s0 + $0x1d4] sm:$0xff]  }
  0x14   :  { %v4593_v60 = vld [vmem:[%s6447_s0 + $0xc8] sm:$0xff]   ;;  %v4595_v62 = vld [vmem:[%s6447_s0 + $0xd0] sm:$0xff]   ;;  %v4597_v5 = vld [vmem:[%s6447_s0 + $0xd8] sm:$0xff]  }
  0x15   :  { %3978 = vmatmul.mubr.msk.bf16.vlgmr.msra.gmra.mrb[0].mxu0 %vm282_vm3, %v4543_v10  ;;  %4120 = vmatmul.mubr.msk.bf16.vlgmr.msra.gmra.mrb[0].mxu1 %vm282_vm3, %v4544_v11 }
  0x16   :  { %4252 = vmatpush3.bf16.msra.mxu0 %v4538_v1  ;;  %4394 = vmatpush3.bf16.msra.mxu1 %v4538_v1 }
  0x17   :  { %3981 = vmatprep.mubr.msk.bf16.mxu0 %vm4677_vm0, %v6450_v0  ;;  %4123 = vmatprep.mubr.msk.bf16.mxu1 %vm4677_vm0, %v6450_v0 }
  0x18   :  { %4253 = vmatprep.subr.bf16.mxu0 %v6450_v0  ;;  %4395 = vmatprep.subr.bf16.mxu1 %v6450_v0 }
  0x1a   :  { %4254 = vmatpush3.bf16.msra.mxu0 %v4539_v2  ;;  %4396 = vmatpush3.bf16.msra.mxu1 %v4539_v2 }
  0x1b   :  { %4255 = vmatprep.subr.bf16.mxu0 %v6450_v0  ;;  %4397 = vmatprep.subr.bf16.mxu1 %v6450_v0 }
  0x1d   :  { %3982 = vmatmul.mubr.msk.bf16.gmra.mrb[4].mxu0 %vm282_vm3, %v4545_v12  ;;  %4124 = vmatmul.mubr.msk.bf16.gmra.mrb[4].mxu1 %vm282_vm3, %v4546_v13 }
  0x1e   :  { %3985 = vmatprep.mubr.msk.bf16.mxu0 %vm4677_vm0, %v6450_v0  ;;  %4127 = vmatprep.mubr.msk.bf16.mxu1 %vm4677_vm0, %v6450_v0 }
  0x1f   :  { %4256 = vmatpush3.bf16.msra.mxu0 %v4540_v3  ;;  %4398 = vmatpush3.bf16.msra.mxu1 %v4540_v3 }
  0x20   :  { %4257 = vmatprep.subr.bf16.mxu0 %v6450_v0  ;;  %4399 = vmatprep.subr.bf16.mxu1 %v6450_v0 }
  0x23   :  { %4258 = vmatpush3.bf16.msra.mxu0 %v4541_v6  ;;  %4400 = vmatpush3.bf16.msra.mxu1 %v4541_v6  ;;  %v4598_v6 = vld [vmem:[%s6447_s0 + $0x1dc] sm:$0xff]  }
  0x24   :  { %4259 = vmatprep.subr.bf16.mxu0 %v6450_v0  ;;  %4401 = vmatprep.subr.bf16.mxu1 %v6450_v0 }
  0x25   :  { %3986 = vmatmul.mubr.msk.bf16.gmra.mrb[8].mxu0 %vm282_vm3, %v4547_v14  ;;  %4128 = vmatmul.mubr.msk.bf16.gmra.mrb[8].mxu1 %vm282_vm3, %v4548_v15 }
  0x26   :  { %3989 = vmatprep.mubr.msk.bf16.mxu0 %vm4677_vm0, %v6450_v0  ;;  %4131 = vmatprep.mubr.msk.bf16.mxu1 %vm4677_vm0, %v6450_v0 }
  0x27   :  { %4260 = vmatpush3.bf16.msra.mxu0 %v387_v9  ;;  %4402 = vmatpush3.bf16.msra.mxu1 %v387_v9 }
  0x2d   :  { %3990 = vmatmul.mubr.msk.bf16.gmra.mrb[12].mxu0 %vm282_vm3, %v4549_v16  ;;  %4132 = vmatmul.mubr.msk.bf16.gmra.mrb[12].mxu1 %vm282_vm3, %v4550_v17  ;;  %v4599_v17 = vld [vmem:[%s6447_s0 + $0xe0] sm:$0xff]  }
  0x2e   :  { %3993 = vmatprep.mubr.msk.bf16.mxu0 %vm4677_vm0, %v6450_v0  ;;  %4135 = vmatprep.mubr.msk.bf16.mxu1 %vm4677_vm0, %v6450_v0 }
  0x35   :  { %3994 = vmatmul.mubr.msk.bf16.gmra.mrb[16].mxu0 %vm282_vm3, %v4551_v18  ;;  %4136 = vmatmul.mubr.msk.bf16.gmra.mrb[16].mxu1 %vm282_vm3, %v4552_v19  ;;  %v4600_v18 = vld [vmem:[%s6447_s0 + $0x1e4] sm:$0xff]  }
  0x36   :  { %3997 = vmatprep.mubr.msk.bf16.mxu0 %vm4677_vm0, %v6450_v0  ;;  %4139 = vmatprep.mubr.msk.bf16.mxu1 %vm4677_vm0, %v6450_v0 }
  0x3d   :  { %3998 = vmatmul.mubr.msk.bf16.gmra.mrb[20].mxu0 %vm282_vm3, %v4553_v20  ;;  %4140 = vmatmul.mubr.msk.bf16.gmra.mrb[20].mxu1 %vm282_vm3, %v4554_v21 }
  0x3e   :  { %4001 = vmatprep.mubr.msk.bf16.mxu0 %vm4677_vm0, %v6450_v0  ;;  %4143 = vmatprep.mubr.msk.bf16.mxu1 %vm4677_vm0, %v6450_v0 }
  0x45   :  { %4002 = vmatmul.mubr.msk.bf16.gmra.mrb[24].mxu0 %vm282_vm3, %v4555_v22  ;;  %4144 = vmatmul.mubr.msk.bf16.gmra.mrb[24].mxu1 %vm282_vm3, %v4556_v23 }
  0x46   :  { %4005 = vmatprep.mubr.msk.bf16.mxu0 %vm4677_vm0, %v6450_v0  ;;  %4147 = vmatprep.mubr.msk.bf16.mxu1 %vm4677_vm0, %v6450_v0 }
  0x4d   :  { %4006 = vmatmul.mubr.msk.bf16.gmra.mrb[28].mxu0 %vm282_vm3, %v4557_v24  ;;  %4148 = vmatmul.mubr.msk.bf16.gmra.mrb[28].mxu1 %vm282_vm3, %v4558_v25 }
  0x4e   :  { %4009 = vmatprep.mubr.msk.bf16.mxu0 %vm4677_vm0, %v6450_v0  ;;  %4151 = vmatprep.mubr.msk.bf16.mxu1 %vm4677_vm0, %v6450_v0 }
  0x55   :  { %4010 = vmatmul.mubr.msk.bf16.gmra.mrb[32].mxu0 %vm282_vm3, %v4559_v26  ;;  %4152 = vmatmul.mubr.msk.bf16.gmra.mrb[32].mxu1 %vm282_vm3, %v4560_v27 }
  0x56   :  { %4013 = vmatprep.mubr.msk.bf16.mxu0 %vm4677_vm0, %v6450_v0  ;;  %4155 = vmatprep.mubr.msk.bf16.mxu1 %vm4677_vm0, %v6450_v0 }
  0x5d   :  { %4014 = vmatmul.mubr.msk.bf16.gmra.mrb[36].mxu0 %vm282_vm3, %v4561_v28  ;;  %4156 = vmatmul.mubr.msk.bf16.gmra.mrb[36].mxu1 %vm282_vm3, %v4562_v29 }
  0x5e   :  { %4017 = vmatprep.mubr.msk.bf16.mxu0 %vm4677_vm0, %v6450_v0  ;;  %4159 = vmatprep.mubr.msk.bf16.mxu1 %vm4677_vm0, %v6450_v0 }
  0x65   :  { %4018 = vmatmul.mubr.msk.bf16.gmra.mrb[40].mxu0 %vm282_vm3, %v4563_v30  ;;  %4160 = vmatmul.mubr.msk.bf16.gmra.mrb[40].mxu1 %vm282_vm3, %v4564_v31  ;;  %v4601_v30 = vld [vmem:[%s6447_s0 + $0xe8] sm:$0xff]  }
  0x66   :  { %4021 = vmatprep.mubr.msk.bf16.mxu0 %vm4677_vm0, %v6450_v0  ;;  %4163 = vmatprep.mubr.msk.bf16.mxu1 %vm4677_vm0, %v6450_v0  ;;  %v4602_v31 = vld [vmem:[%s6447_s0 + $0x1ec] sm:$0xff]  }
  0x6d   :  { %4022 = vmatmul.mubr.msk.bf16.gmra.mrb[44].mxu0 %vm282_vm3, %v4565_v32  ;;  %4164 = vmatmul.mubr.msk.bf16.gmra.mrb[44].mxu1 %vm282_vm3, %v4566_v33 }
  0x6e   :  { %4025 = vmatprep.mubr.msk.bf16.mxu0 %vm4677_vm0, %v6450_v0  ;;  %4167 = vmatprep.mubr.msk.bf16.mxu1 %vm4677_vm0, %v6450_v0 }
  0x75   :  { %4026 = vmatmul.mubr.msk.bf16.gmra.mrb[48].mxu0 %vm282_vm3, %v4567_v34  ;;  %4168 = vmatmul.mubr.msk.bf16.gmra.mrb[48].mxu1 %vm282_vm3, %v4568_v35 }
  0x76   :  { %4029 = vmatprep.mubr.msk.bf16.mxu0 %vm4677_vm0, %v6450_v0  ;;  %4171 = vmatprep.mubr.msk.bf16.mxu1 %vm4677_vm0, %v6450_v0 }
  0x7d   :  { %4030 = vmatmul.mubr.msk.bf16.gmra.mrb[52].mxu0 %vm282_vm3, %v4569_v36  ;;  %4172 = vmatmul.mubr.msk.bf16.gmra.mrb[52].mxu1 %vm282_vm3, %v4570_v37 }
  0x7e   :  { %4033 = vmatprep.mubr.msk.bf16.mxu0 %vm4677_vm0, %v6450_v0  ;;  %4175 = vmatprep.mubr.msk.bf16.mxu1 %vm4677_vm0, %v6450_v0 }
  0x85   :  { %4034 = vmatmul.mubr.msk.bf16.gmra.mrb[56].mxu0 %vm282_vm3, %v4571_v38  ;;  %4176 = vmatmul.mubr.msk.bf16.gmra.mrb[56].mxu1 %vm282_vm3, %v4572_v39 }
  0x86   :  { %4037 = vmatprep.mubr.msk.bf16.mxu0 %vm4677_vm0, %v6450_v0  ;;  %4179 = vmatprep.mubr.msk.bf16.mxu1 %vm4677_vm0, %v6450_v0 }
  0x8d   :  { %4038 = vmatmul.mubr.msk.bf16.gmra.mrb[60].mxu0 %vm282_vm3, %v4573_v40  ;;  %4180 = vmatmul.mubr.msk.bf16.gmra.mrb[60].mxu1 %vm282_vm3, %v4574_v41 }
  0x8e   :  { %4041 = vmatprep.mubr.msk.bf16.mxu0 %vm4677_vm0, %v6450_v0  ;;  %4183 = vmatprep.mubr.msk.bf16.mxu1 %vm4677_vm0, %v6450_v0 }
  0x95   :  { %4042 = vmatmul.mubr.msk.bf16.gmra.mrb[64].mxu0 %vm282_vm3, %v4575_v42  ;;  %4184 = vmatmul.mubr.msk.bf16.gmra.mrb[64].mxu1 %vm282_vm3, %v4576_v43  ;;  %v4603_v42 = vld [vmem:[%s6447_s0 + $0xf0] sm:$0xff]  }
  0x96   :  { %4045 = vmatprep.mubr.msk.bf16.mxu0 %vm4677_vm0, %v6450_v0  ;;  %4187 = vmatprep.mubr.msk.bf16.mxu1 %vm4677_vm0, %v6450_v0  ;;  %v4604_v43 = vld [vmem:[%s6447_s0 + $0x1f4] sm:$0xff]  }
  0x9d   :  { %4046 = vmatmul.mubr.msk.bf16.gmra.mrb[68].mxu0 %vm282_vm3, %v4577_v44  ;;  %4188 = vmatmul.mubr.msk.bf16.gmra.mrb[68].mxu1 %vm282_vm3, %v4578_v45 }
  0x9e   :  { %4049 = vmatprep.mubr.msk.bf16.mxu0 %vm4677_vm0, %v6450_v0  ;;  %4191 = vmatprep.mubr.msk.bf16.mxu1 %vm4677_vm0, %v6450_v0 }
  0xa5   :  { %4050 = vmatmul.mubr.msk.bf16.gmra.mrb[72].mxu0 %vm282_vm3, %v4579_v46  ;;  %4192 = vmatmul.mubr.msk.bf16.gmra.mrb[72].mxu1 %vm282_vm3, %v4580_v47 }
  0xa6   :  { %4053 = vmatprep.mubr.msk.bf16.mxu0 %vm4677_vm0, %v6450_v0  ;;  %4195 = vmatprep.mubr.msk.bf16.mxu1 %vm4677_vm0, %v6450_v0 }
  0xad   :  { %4054 = vmatmul.mubr.msk.bf16.gmra.mrb[76].mxu0 %vm282_vm3, %v4581_v48  ;;  %4196 = vmatmul.mubr.msk.bf16.gmra.mrb[76].mxu1 %vm282_vm3, %v4582_v49 }
  0xae   :  { %4057 = vmatprep.mubr.msk.bf16.mxu0 %vm4677_vm0, %v6450_v0  ;;  %4199 = vmatprep.mubr.msk.bf16.mxu1 %vm4677_vm0, %v6450_v0 }
  0xb5   :  { %4058 = vmatmul.mubr.msk.bf16.gmra.mrb[80].mxu0 %vm282_vm3, %v4583_v50  ;;  %4200 = vmatmul.mubr.msk.bf16.gmra.mrb[80].mxu1 %vm282_vm3, %v4584_v51 }
  0xb6   :  { %4061 = vmatprep.mubr.msk.bf16.mxu0 %vm4677_vm0, %v6450_v0  ;;  %4203 = vmatprep.mubr.msk.bf16.mxu1 %vm4677_vm0, %v6450_v0 }
  0xbd   :  { %4062 = vmatmul.mubr.msk.bf16.gmra.mrb[84].mxu0 %vm282_vm3, %v4585_v52  ;;  %4204 = vmatmul.mubr.msk.bf16.gmra.mrb[84].mxu1 %vm282_vm3, %v4586_v53 }
  0xbe   :  { %4065 = vmatprep.mubr.msk.bf16.mxu0 %vm4677_vm0, %v6450_v0  ;;  %4207 = vmatprep.mubr.msk.bf16.mxu1 %vm4677_vm0, %v6450_v0 }
  0xc5   :  { %4066 = vmatmul.mubr.msk.bf16.gmra.mrb[88].mxu0 %vm282_vm3, %v4587_v54  ;;  %4208 = vmatmul.mubr.msk.bf16.gmra.mrb[88].mxu1 %vm282_vm3, %v4588_v55  ;;  %v4605_v54 = vld [vmem:[%s6447_s0 + $0xf8] sm:$0xff]  }
  0xc6   :  { %4069 = vmatprep.mubr.msk.bf16.mxu0 %vm4677_vm0, %v6450_v0  ;;  %4211 = vmatprep.mubr.msk.bf16.mxu1 %vm4677_vm0, %v6450_v0  ;;  %v4606_v55 = vld [vmem:[%s6447_s0 + $0x1fc] sm:$0xff]  }
  0xcd   :  { %4070 = vmatmul.mubr.msk.bf16.gmra.mrb[92].mxu0 %vm282_vm3, %v4589_v56  ;;  %4212 = vmatmul.mubr.msk.bf16.gmra.mrb[92].mxu1 %vm282_vm3, %v4590_v57 }
  0xce   :  { %4073 = vmatprep.mubr.msk.bf16.mxu0 %vm4677_vm0, %v6450_v0  ;;  %4215 = vmatprep.mubr.msk.bf16.mxu1 %vm4677_vm0, %v6450_v0 }
  0xd5   :  { %4074 = vmatmul.mubr.msk.bf16.gmra.mrb[96].mxu0 %vm282_vm3, %v4591_v58  ;;  %4216 = vmatmul.mubr.msk.bf16.gmra.mrb[96].mxu1 %vm282_vm3, %v4592_v59 }
  0xd6   :  { %4077 = vmatprep.mubr.msk.bf16.mxu0 %vm4677_vm0, %v6450_v0  ;;  %4219 = vmatprep.mubr.msk.bf16.mxu1 %vm4677_vm0, %v6450_v0 }
  0xdd   :  { %4078 = vmatmul.mubr.msk.bf16.gmra.mrb[100].mxu0 %vm282_vm3, %v4593_v60  ;;  %4220 = vmatmul.mubr.msk.bf16.gmra.mrb[100].mxu1 %vm282_vm3, %v4594_v61 }
  0xde   :  { %4081 = vmatprep.mubr.msk.bf16.mxu0 %vm4677_vm0, %v6450_v0  ;;  %4223 = vmatprep.mubr.msk.bf16.mxu1 %vm4677_vm0, %v6450_v0 }
  0xe5   :  { %4082 = vmatmul.mubr.msk.bf16.gmra.mrb[104].mxu0 %vm282_vm3, %v4595_v62  ;;  %4224 = vmatmul.mubr.msk.bf16.gmra.mrb[104].mxu1 %vm282_vm3, %v4596_v63 }
  0xe6   :  { %4085 = vmatprep.mubr.msk.bf16.mxu0 %vm4677_vm0, %v6450_v0  ;;  %4227 = vmatprep.mubr.msk.bf16.mxu1 %vm4677_vm0, %v6450_v0 }
  0xe8   :  { %v5062_v1 = vpop.f32.mrb[0].mxu0  ;;  %v5064_v2 = vpop.f32.mrb[0].mxu1 }
  0xe9   :  { %v3979_v3 = vpop.f32.mrb[1].mxu0  ;;  %v4121_v4 = vpop.f32.mrb[1].mxu1 }
  0xea   :  { %v5074_v8 = vpop.f32.mrb[2].mxu0  ;;  %v5076_v9 = vpop.f32.mrb[2].mxu1 }
  0xeb   :  { %v3980_v10 = vpop.f32.mrb[3].mxu0  ;;  %v4122_v11 = vpop.f32.mrb[3].mxu1 }
  0xed   :  { %4086 = vmatmul.mubr.msk.bf16.gmra.mrb[108].mxu0 %vm282_vm3, %v4597_v5  ;;  %4228 = vmatmul.mubr.msk.bf16.gmra.mrb[108].mxu1 %vm282_vm3, %v4598_v6  ;;  %v4607_v5 = vld [vmem:[%s6447_s0 + $0x100] ss:$0 sps:$4 sm:$0xff]   ;;  %v4608_v6 = vld [vmem:[%s6447_s0 + $0x204] ss:$0 sps:$4 sm:$0xff]  }
  0xee   :  { %4089 = vmatprep.mubr.msk.bf16.mxu0 %vm4677_vm0, %v6450_v0  ;;  %4231 = vmatprep.mubr.msk.bf16.mxu1 %vm4677_vm0, %v6450_v0 }
  0xf0   :  { %v5086_v13 = vpop.f32.mrb[4].mxu0  ;;  %v5088_v14 = vpop.f32.mrb[4].mxu1 }
  0xf1   :  { %v3983_v15 = vpop.f32.mrb[5].mxu0  ;;  %v4125_v16 = vpop.f32.mrb[5].mxu1 }
  0xf2   :  { %v5098_v20 = vpop.f32.mrb[6].mxu0  ;;  %v5100_v21 = vpop.f32.mrb[6].mxu1 }
  0xf3   :  { %v3984_v22 = vpop.f32.mrb[7].mxu0  ;;  %v4126_v23 = vpop.f32.mrb[7].mxu1 }
  0xf5   :  { %4090 = vmatmul.mubr.msk.bf16.gmra.mrb[112].mxu0 %vm282_vm3, %v4599_v17  ;;  %4232 = vmatmul.mubr.msk.bf16.gmra.mrb[112].mxu1 %vm282_vm3, %v4600_v18 }
  0xf6   :  { %4093 = vmatprep.mubr.msk.bf16.mxu0 %vm4677_vm0, %v6450_v0  ;;  %4235 = vmatprep.mubr.msk.bf16.mxu1 %vm4677_vm0, %v6450_v0 }
  0xf8   :  { %v5110_v25 = vpop.f32.mrb[8].mxu0  ;;  %v5112_v26 = vpop.f32.mrb[8].mxu1 }
  0xf9   :  { %v3987_v28 = vpop.f32.mrb[9].mxu0  ;;  %v4129_v29 = vpop.f32.mrb[9].mxu1 }
  0xfa   :  { %v5122_v32 = vpop.f32.mrb[10].mxu0  ;;  %v5124_v33 = vpop.f32.mrb[10].mxu1 }
  0xfb   :  { %v3988_v35 = vpop.f32.mrb[11].mxu0  ;;  %v4130_v36 = vpop.f32.mrb[11].mxu1 }
  0xfd   :  { %4094 = vmatmul.mubr.msk.bf16.gmra.mrb[116].mxu0 %vm282_vm3, %v4601_v30  ;;  %4236 = vmatmul.mubr.msk.bf16.gmra.mrb[116].mxu1 %vm282_vm3, %v4602_v31  ;;  %v4609_v30 = vld [vmem:[%s6447_s0 + $0x208] sm:$0xff]  }
  0xfe   :  { %4097 = vmatprep.mubr.msk.bf16.mxu0 %vm4677_vm0, %v6450_v0  ;;  %4239 = vmatprep.mubr.msk.bf16.mxu1 %vm4677_vm0, %v6450_v0  ;;  %v4610_v31 = vld [vmem:[%s6447_s0 + $0x30c] sm:$0xff]  }
 0x100   :  { %v5134_v37 = vpop.f32.mrb[12].mxu0  ;;  %v5136_v38 = vpop.f32.mrb[12].mxu1 }
 0x101   :  { %v3991_v40 = vpop.f32.mrb[13].mxu0  ;;  %v4133_v41 = vpop.f32.mrb[13].mxu1 }
 0x102   :  { %v5146_v44 = vpop.f32.mrb[14].mxu0  ;;  %v5148_v45 = vpop.f32.mrb[14].mxu1 }
 0x103   :  { %v3992_v47 = vpop.f32.mrb[15].mxu0  ;;  %v4134_v48 = vpop.f32.mrb[15].mxu1 }
 0x105   :  { %4098 = vmatmul.mubr.msk.bf16.gmra.mrb[120].mxu0 %vm282_vm3, %v4603_v42  ;;  %4240 = vmatmul.mubr.msk.bf16.gmra.mrb[120].mxu1 %vm282_vm3, %v4604_v43 }
 0x106   :  { %4101 = vmatprep.mubr.msk.bf16.mxu0 %vm4677_vm0, %v6450_v0  ;;  %4243 = vmatprep.mubr.msk.bf16.mxu1 %vm4677_vm0, %v6450_v0 }
 0x108   :  { %v5158_v49 = vpop.f32.mrb[16].mxu0  ;;  %v5160_v50 = vpop.f32.mrb[16].mxu1 }
 0x109   :  { %v3995_v52 = vpop.f32.mrb[17].mxu0  ;;  %v4137_v53 = vpop.f32.mrb[17].mxu1 }
 0x10a   :  { %v5170_v56 = vpop.f32.mrb[18].mxu0  ;;  %v5172_v57 = vpop.f32.mrb[18].mxu1 }
 0x10b   :  { %v3996_v59 = vpop.f32.mrb[19].mxu0  ;;  %v4138_v60 = vpop.f32.mrb[19].mxu1 }
 0x10d   :  { %4102 = vmatmul.mubr.msk.bf16.gmra.mrb[124].mxu0 %vm282_vm3, %v4605_v54  ;;  %4244 = vmatmul.mubr.msk.bf16.gmra.mrb[124].mxu1 %vm282_vm3, %v4606_v55  ;;  %v4611_v54 = vld [vmem:[%s6447_s0 + $0x210] sm:$0xff]  }
 0x10e   :  { %4105 = vmatprep.mubr.msk.bf16.mxu0 %vm4677_vm0, %v6450_v0  ;;  %4247 = vmatprep.mubr.msk.bf16.mxu1 %vm4677_vm0, %v6450_v0  ;;  %v4612_v55 = vld [vmem:[%s6447_s0 + $0x314] sm:$0xff]  }
 0x110   :  { %v5182_v61 = vpop.f32.mrb[20].mxu0  ;;  %v5184_v62 = vpop.f32.mrb[20].mxu1 }
 0x111   :  { %v3999_v3 = vpop.f32.mrb[21].mxu0  ;;  %v4141_v4 = vpop.f32.mrb[21].mxu1 }
 0x112   :  { %v5194_v10 = vpop.f32.mrb[22].mxu0  ;;  %v5196_v11 = vpop.f32.mrb[22].mxu1 }
 0x113   :  { %v4000_v16 = vpop.f32.mrb[23].mxu0  ;;  %v4142_v17 = vpop.f32.mrb[23].mxu1 }
 0x115   :  { %4106 = vmatmul.mubr.msk.bf16.gmra.mrb[128].mxu0 %vm282_vm3, %v4607_v5  ;;  %4248 = vmatmul.mubr.msk.bf16.gmra.mrb[128].mxu1 %vm282_vm3, %v4608_v6 }
 0x116   :  { %4261 = vmatprep.mubr.msk.bf16.mxu0 %vm4677_vm0, %v6450_v0  ;;  %4403 = vmatprep.mubr.msk.bf16.mxu1 %vm4677_vm0, %v6450_v0 }
 0x118   :  { %v5206_v18 = vpop.f32.mrb[24].mxu0  ;;  %v5208_v22 = vpop.f32.mrb[24].mxu1 }
 0x119   :  { %v4003_v28 = vpop.f32.mrb[25].mxu0  ;;  %v4145_v29 = vpop.f32.mrb[25].mxu1 }
 0x11a   :  { %v5218_v35 = vpop.f32.mrb[26].mxu0  ;;  %v5220_v36 = vpop.f32.mrb[26].mxu1 }
 0x11b   :  { %v4004_v41 = vpop.f32.mrb[27].mxu0  ;;  %v4146_v42 = vpop.f32.mrb[27].mxu1 }
 0x11d   :  { %4262 = vmatmul.mubr.msk.bf16.vlgmr.msra.gmra.mrb[132].mxu0 %vm282_vm3, %v4609_v30  ;;  %4404 = vmatmul.mubr.msk.bf16.vlgmr.msra.gmra.mrb[132].mxu1 %vm282_vm3, %v4610_v31  ;;  %v4613_v30 = vld [vmem:[%s6447_s0 + $0x218] sm:$0xff]  }
 0x11e   :  { %4265 = vmatprep.mubr.msk.bf16.mxu0 %vm4677_vm0, %v6450_v0  ;;  %4407 = vmatprep.mubr.msk.bf16.mxu1 %vm4677_vm0, %v6450_v0  ;;  %v4614_v31 = vld [vmem:[%s6447_s0 + $0x31c] sm:$0xff]  }
 0x120   :  { %v5230_v43 = vpop.f32.mrb[28].mxu0  ;;  %v5232_v47 = vpop.f32.mrb[28].mxu1 }
 0x121   :  { %v4007_v52 = vpop.f32.mrb[29].mxu0  ;;  %v4149_v53 = vpop.f32.mrb[29].mxu1 }
 0x122   :  { %v5242_v59 = vpop.f32.mrb[30].mxu0  ;;  %v5244_v60 = vpop.f32.mrb[30].mxu1 }
 0x123   :  { %v4008_v4 = vpop.f32.mrb[31].mxu0  ;;  %v4150_v5 = vpop.f32.mrb[31].mxu1 }
 0x125   :  { %4266 = vmatmul.mubr.msk.bf16.gmra.mrb[136].mxu0 %vm282_vm3, %v4611_v54  ;;  %4408 = vmatmul.mubr.msk.bf16.gmra.mrb[136].mxu1 %vm282_vm3, %v4612_v55 }
 0x126   :  { %4269 = vmatprep.mubr.msk.bf16.mxu0 %vm4677_vm0, %v6450_v0  ;;  %4411 = vmatprep.mubr.msk.bf16.mxu1 %vm4677_vm0, %v6450_v0 }
 0x128   :  { %v5254_v6 = vpop.f32.mrb[32].mxu0  ;;  %v5256_v16 = vpop.f32.mrb[32].mxu1 }
 0x129   :  { %v4011_v28 = vpop.f32.mrb[33].mxu0  ;;  %v4153_v29 = vpop.f32.mrb[33].mxu1 }
 0x12a   :  { %v5266_v41 = vpop.f32.mrb[34].mxu0  ;;  %v5268_v42 = vpop.f32.mrb[34].mxu1 }
 0x12b   :  { %v4012_v53 = vpop.f32.mrb[35].mxu0  ;;  %v4154_v54 = vpop.f32.mrb[35].mxu1 }
 0x12d   :  { %4270 = vmatmul.mubr.msk.bf16.gmra.mrb[140].mxu0 %vm282_vm3, %v4613_v30  ;;  %4412 = vmatmul.mubr.msk.bf16.gmra.mrb[140].mxu1 %vm282_vm3, %v4614_v31  ;;  %v4615_v30 = vld [vmem:[%s6447_s0 + $0x220] sm:$0xff]  }
 0x12e   :  { %4273 = vmatprep.mubr.msk.bf16.mxu0 %vm4677_vm0, %v6450_v0  ;;  %4415 = vmatprep.mubr.msk.bf16.mxu1 %vm4677_vm0, %v6450_v0  ;;  %v4616_v31 = vld [vmem:[%s6447_s0 + $0x324] sm:$0xff]  }
 0x130   :  { %v5278_v55 = vpop.f32.mrb[36].mxu0  ;;  %v5280_v4 = vpop.f32.mrb[36].mxu1 }
 0x131   :  { %v4015_v28 = vpop.f32.mrb[37].mxu0  ;;  %v4157_v29 = vpop.f32.mrb[37].mxu1 }
 0x132   :  { %v5290_v53 = vpop.f32.mrb[38].mxu0  ;;  %v5292_v54 = vpop.f32.mrb[38].mxu1 }
 0x133   :  { %v4016_v17 = vpop.f32.mrb[39].mxu0  ;;  %v4158_v3 = vpop.f32.mrb[39].mxu1 }
 0x134   :  { %v4617_v3 = vld [vmem:[%s6447_s0 + $0x228] sm:$0xff]  }
 0x135   :  { %4274 = vmatmul.mubr.msk.bf16.gmra.mrb[144].mxu0 %vm282_vm3, %v4615_v30  ;;  %4416 = vmatmul.mubr.msk.bf16.gmra.mrb[144].mxu1 %vm282_vm3, %v4616_v31  ;;  %v4618_v30 = vld [vmem:[%s6447_s0 + $0x32c] sm:$0xff]  }
 0x136   :  { %4277 = vmatprep.mubr.msk.bf16.mxu0 %vm4677_vm0, %v6450_v0  ;;  %4419 = vmatprep.mubr.msk.bf16.mxu1 %vm4677_vm0, %v6450_v0 }
 0x138   :  { %v5302_v28 = vpop.f32.mrb[40].mxu0  ;;  %v5304_v29 = vpop.f32.mrb[40].mxu1 }
 0x139   :  { %v4019_v52 = vpop.f32.mrb[41].mxu0  ;;  %v4161_v17 = vpop.f32.mrb[41].mxu1 }
 0x13a   :  { %v5314_v31 = vpop.f32.mrb[42].mxu0  ;;  %v5316_v48 = vpop.f32.mrb[42].mxu1 }
 0x13b   :  { %v4020_v23 = vpop.f32.mrb[43].mxu0  ;;  %v4162_v15 = vpop.f32.mrb[43].mxu1 }
 0x13c   :  { %v4619_v15 = vld [vmem:[%s6447_s0 + $0x230] sm:$0xff]  }
 0x13d   :  { %4278 = vmatmul.mubr.msk.bf16.gmra.mrb[148].mxu0 %vm282_vm3, %v4617_v3  ;;  %4420 = vmatmul.mubr.msk.bf16.gmra.mrb[148].mxu1 %vm282_vm3, %v4618_v30  ;;  %v4620_v3 = vld [vmem:[%s6447_s0 + $0x334] sm:$0xff]  }
 0x13e   :  { %4281 = vmatprep.mubr.msk.bf16.mxu0 %vm4677_vm0, %v6450_v0  ;;  %4423 = vmatprep.mubr.msk.bf16.mxu1 %vm4677_vm0, %v6450_v0 }
 0x140   :  { %v5326_v52 = vpop.f32.mrb[44].mxu0  ;;  %v5328_v17 = vpop.f32.mrb[44].mxu1 }
 0x141   :  { %v4023_v40 = vpop.f32.mrb[45].mxu0  ;;  %v4165_v23 = vpop.f32.mrb[45].mxu1 }
 0x142   :  { %v5338_v30 = vpop.f32.mrb[46].mxu0  ;;  %v5340_v63 = vpop.f32.mrb[46].mxu1 }
 0x143   :  { %v4024_v51 = vpop.f32.mrb[47].mxu0  ;;  %v4166_v46 = vpop.f32.mrb[47].mxu1 }
 0x144   :  { %v4621_v46 = vld [vmem:[%s6447_s0 + $0x238] sm:$0xff]  }
 0x145   :  { %4282 = vmatmul.mubr.msk.bf16.gmra.mrb[152].mxu0 %vm282_vm3, %v4619_v15  ;;  %4424 = vmatmul.mubr.msk.bf16.gmra.mrb[152].mxu1 %vm282_vm3, %v4620_v3  ;;  %v4622_v15 = vld [vmem:[%s6447_s0 + $0x33c] sm:$0xff]  }
 0x146   :  { %4285 = vmatprep.mubr.msk.bf16.mxu0 %vm4677_vm0, %v6450_v0  ;;  %4427 = vmatprep.mubr.msk.bf16.mxu1 %vm4677_vm0, %v6450_v0 }
 0x148   :  { %v5350_v40 = vpop.f32.mrb[48].mxu0  ;;  %v5352_v23 = vpop.f32.mrb[48].mxu1 }
 0x149   :  { %v4027_v58 = vpop.f32.mrb[49].mxu0  ;;  %v4169_v51 = vpop.f32.mrb[49].mxu1 }
 0x14a   :  { %v5362_v3 = vpop.f32.mrb[50].mxu0  ;;  %v5364_v39 = vpop.f32.mrb[50].mxu1 }
 0x14b   :  { %6531 = vst [vmem:[#allocation2_spill] sm:$0xff] %v5364_v39  ;;  %v4028_v27 = vpop.f32.mrb[51].mxu0  ;;  %v4170_v24 = vpop.f32.mrb[51].mxu1 }
 0x14c   :  { %v4623_v24 = vld [vmem:[%s6447_s0 + $0x240] sm:$0xff]  }
 0x14d   :  { %4286 = vmatmul.mubr.msk.bf16.gmra.mrb[156].mxu0 %vm282_vm3, %v4621_v46  ;;  %4428 = vmatmul.mubr.msk.bf16.gmra.mrb[156].mxu1 %vm282_vm3, %v4622_v15  ;;  %v4624_v46 = vld [vmem:[%s6447_s0 + $0x344] sm:$0xff]  }
 0x14e   :  { %4289 = vmatprep.mubr.msk.bf16.mxu0 %vm4677_vm0, %v6450_v0  ;;  %4431 = vmatprep.mubr.msk.bf16.mxu1 %vm4677_vm0, %v6450_v0 }
 0x150   :  { %v5374_v58 = vpop.f32.mrb[52].mxu0  ;;  %v5376_v51 = vpop.f32.mrb[52].mxu1 }
 0x151   :  { %6532 = vst [vmem:[#allocation3_spill] sm:$0xff] %v5374_v58  ;;  %6533 = vst [vmem:[#allocation4_spill] sm:$0xff] %v5376_v51  ;;  %v4031_v34 = vpop.f32.mrb[53].mxu0  ;;  %v4173_v27 = vpop.f32.mrb[53].mxu1  ;;  %v6611_v51 = vmax.f32 %v5062_v1, %v5064_v2  ;;  %v6612_v1 = vmax.f32 %v5074_v8, %v5076_v9 }
 0x152   :  { %v5386_v15 = vpop.f32.mrb[54].mxu0  ;;  %v5388_v19 = vpop.f32.mrb[54].mxu1  ;;  %v6536_v34 = vmov 0.0  }
 0x153   :  { %6534 = vst [vmem:[#allocation5_spill] sm:$0xff] %v5386_v15  ;;  %6535 = vst [vmem:[#allocation6_spill] sm:$0xff] %v5388_v19  ;;  %v4032_v7 = vpop.f32.mrb[55].mxu0  ;;  %v4174_v0 = vpop.f32.mrb[55].mxu1 }
 0x154   :  { %v4625_v0 = vld [vmem:[%s6447_s0 + $0x248] sm:$0xff]  }
 0x155   :  { %4290 = vmatmul.mubr.msk.bf16.gmra.mrb[160].mxu0 %vm282_vm3, %v4623_v24  ;;  %4432 = vmatmul.mubr.msk.bf16.gmra.mrb[160].mxu1 %vm282_vm3, %v4624_v46  ;;  %v4626_v24 = vld [vmem:[%s6447_s0 + $0x34c] sm:$0xff]  }
 0x156   :  { %4293 = vmatprep.mubr.msk.bf16.mxu0 %vm4677_vm0, %v6536_v34  ;;  %4435 = vmatprep.mubr.msk.bf16.mxu1 %vm4677_vm0, %v6536_v34 }
 0x158   :  { %v5398_v27 = vpop.f32.mrb[56].mxu0  ;;  %v5400_v5 = vpop.f32.mrb[56].mxu1 }
 0x159   :  { %6537 = vst [vmem:[#allocation7_spill] sm:$0xff] %v5398_v27  ;;  %6538 = vst [vmem:[#allocation8_spill] sm:$0xff] %v5400_v5  ;;  %v4035_v12 = vpop.f32.mrb[57].mxu0  ;;  %v4177_v7 = vpop.f32.mrb[57].mxu1 }
 0x15a   :  { %v5410_v46 = vpop.f32.mrb[58].mxu0  ;;  %v5412_v19 = vpop.f32.mrb[58].mxu1 }
 0x15b   :  { %6539 = vst [vmem:[#allocation9_spill] sm:$0xff] %v5410_v46  ;;  %6540 = vst [vmem:[#allocation10_spill] sm:$0xff] %v5412_v19  ;;  %v4036_v58 = vpop.f32.mrb[59].mxu0  ;;  %v4178_v39 = vpop.f32.mrb[59].mxu1 }
 0x15c   :  { %v4627_v39 = vld [vmem:[%s6447_s0 + $0x250] sm:$0xff]  }
 0x15d   :  { %4294 = vmatmul.mubr.msk.bf16.gmra.mrb[164].mxu0 %vm282_vm3, %v4625_v0  ;;  %4436 = vmatmul.mubr.msk.bf16.gmra.mrb[164].mxu1 %vm282_vm3, %v4626_v24  ;;  %v4628_v0 = vld [vmem:[%s6447_s0 + $0x354] sm:$0xff]  }
 0x15e   :  { %4297 = vmatprep.mubr.msk.bf16.mxu0 %vm4677_vm0, %v6536_v34  ;;  %4439 = vmatprep.mubr.msk.bf16.mxu1 %vm4677_vm0, %v6536_v34 }
 0x160   :  { %v5422_v12 = vpop.f32.mrb[60].mxu0  ;;  %v5424_v7 = vpop.f32.mrb[60].mxu1 }
 0x161   :  { %6541 = vst [vmem:[#allocation11_spill] sm:$0xff] %v5422_v12  ;;  %6542 = vst [vmem:[#allocation12_spill] sm:$0xff] %v5424_v7  ;;  %v4039_v15 = vpop.f32.mrb[61].mxu0  ;;  %v4181_v58 = vpop.f32.mrb[61].mxu1 }
 0x162   :  { %v5434_v24 = vpop.f32.mrb[62].mxu0  ;;  %v5436_v19 = vpop.f32.mrb[62].mxu1 }
 0x163   :  { %6543 = vst [vmem:[#allocation13_spill] sm:$0xff] %v5434_v24  ;;  %6544 = vst [vmem:[#allocation14_spill] sm:$0xff] %v5436_v19  ;;  %v4040_v5 = vpop.f32.mrb[63].mxu0  ;;  %v4182_v27 = vpop.f32.mrb[63].mxu1 }
 0x164   :  { %v4629_v27 = vld [vmem:[%s6447_s0 + $0x258] sm:$0xff]  }
 0x165   :  { %4298 = vmatmul.mubr.msk.bf16.gmra.mrb[168].mxu0 %vm282_vm3, %v4627_v39  ;;  %4440 = vmatmul.mubr.msk.bf16.gmra.mrb[168].mxu1 %vm282_vm3, %v4628_v0  ;;  %v4630_v39 = vld [vmem:[%s6447_s0 + $0x35c] sm:$0xff]  }
 0x166   :  { %4301 = vmatprep.mubr.msk.bf16.mxu0 %vm4677_vm0, %v6536_v34  ;;  %4443 = vmatprep.mubr.msk.bf16.mxu1 %vm4677_vm0, %v6536_v34 }
 0x168   :  { %v5446_v15 = vpop.f32.mrb[64].mxu0  ;;  %v5448_v58 = vpop.f32.mrb[64].mxu1 }
 0x169   :  { %6545 = vst [vmem:[#allocation15_spill] sm:$0xff] %v5446_v15  ;;  %6546 = vst [vmem:[#allocation16_spill] sm:$0xff] %v5448_v58  ;;  %v4043_v46 = vpop.f32.mrb[65].mxu0  ;;  %v4185_v5 = vpop.f32.mrb[65].mxu1 }
 0x16a   :  { %v5458_v0 = vpop.f32.mrb[66].mxu0  ;;  %v5460_v19 = vpop.f32.mrb[66].mxu1 }
 0x16b   :  { %6547 = vst [vmem:[#allocation17_spill] sm:$0xff] %v5458_v0  ;;  %6548 = vst [vmem:[#allocation18_spill] sm:$0xff] %v5460_v19  ;;  %v4044_v7 = vpop.f32.mrb[67].mxu0  ;;  %v4186_v12 = vpop.f32.mrb[67].mxu1 }
 0x16c   :  { %v4631_v12 = vld [vmem:[%s6447_s0 + $0x260] sm:$0xff]  }
 0x16d   :  { %4302 = vmatmul.mubr.msk.bf16.gmra.mrb[172].mxu0 %vm282_vm3, %v4629_v27  ;;  %4444 = vmatmul.mubr.msk.bf16.gmra.mrb[172].mxu1 %vm282_vm3, %v4630_v39  ;;  %v4632_v27 = vld [vmem:[%s6447_s0 + $0x364] sm:$0xff]  }
 0x16e   :  { %4305 = vmatprep.mubr.msk.bf16.mxu0 %vm4677_vm0, %v6536_v34  ;;  %4447 = vmatprep.mubr.msk.bf16.mxu1 %vm4677_vm0, %v6536_v34 }
 0x170   :  { %v5470_v46 = vpop.f32.mrb[68].mxu0  ;;  %v5472_v5 = vpop.f32.mrb[68].mxu1 }
 0x171   :  { %6549 = vst [vmem:[#allocation19_spill] sm:$0xff] %v5470_v46  ;;  %6550 = vst [vmem:[#allocation20_spill] sm:$0xff] %v5472_v5  ;;  %v4047_v24 = vpop.f32.mrb[69].mxu0  ;;  %v4189_v7 = vpop.f32.mrb[69].mxu1 }
 0x172   :  { %v5482_v39 = vpop.f32.mrb[70].mxu0  ;;  %v5484_v19 = vpop.f32.mrb[70].mxu1 }
 0x173   :  { %6551 = vst [vmem:[#allocation21_spill] sm:$0xff] %v5482_v39  ;;  %6552 = vst [vmem:[#allocation22_spill] sm:$0xff] %v5484_v19  ;;  %v4048_v58 = vpop.f32.mrb[71].mxu0  ;;  %v4190_v15 = vpop.f32.mrb[71].mxu1 }
 0x174   :  { %v4633_v15 = vld [vmem:[%s6447_s0 + $0x268] sm:$0xff]  }
 0x175   :  { %4306 = vmatmul.mubr.msk.bf16.gmra.mrb[176].mxu0 %vm282_vm3, %v4631_v12  ;;  %4448 = vmatmul.mubr.msk.bf16.gmra.mrb[176].mxu1 %vm282_vm3, %v4632_v27  ;;  %v4634_v12 = vld [vmem:[%s6447_s0 + $0x36c] sm:$0xff]  }
 0x176   :  { %4309 = vmatprep.mubr.msk.bf16.mxu0 %vm4677_vm0, %v6536_v34  ;;  %4451 = vmatprep.mubr.msk.bf16.mxu1 %vm4677_vm0, %v6536_v34 }
 0x178   :  { %v5494_v24 = vpop.f32.mrb[72].mxu0  ;;  %v5496_v7 = vpop.f32.mrb[72].mxu1 }
 0x179   :  { %6553 = vst [vmem:[#allocation23_spill] sm:$0xff] %v5494_v24  ;;  %6554 = vst [vmem:[#allocation24_spill] sm:$0xff] %v5496_v7  ;;  %v4051_v0 = vpop.f32.mrb[73].mxu0  ;;  %v4193_v58 = vpop.f32.mrb[73].mxu1 }
 0x17a   :  { %v5506_v27 = vpop.f32.mrb[74].mxu0  ;;  %v5508_v19 = vpop.f32.mrb[74].mxu1 }
 0x17b   :  { %6555 = vst [vmem:[#allocation25_spill] sm:$0xff] %v5506_v27  ;;  %6556 = vst [vmem:[#allocation26_spill] sm:$0xff] %v5508_v19  ;;  %v4052_v5 = vpop.f32.mrb[75].mxu0  ;;  %v4194_v46 = vpop.f32.mrb[75].mxu1 }
 0x17c   :  { %v4635_v46 = vld [vmem:[%s6447_s0 + $0x270] sm:$0xff]  }
 0x17d   :  { %4310 = vmatmul.mubr.msk.bf16.gmra.mrb[180].mxu0 %vm282_vm3, %v4633_v15  ;;  %4452 = vmatmul.mubr.msk.bf16.gmra.mrb[180].mxu1 %vm282_vm3, %v4634_v12  ;;  %v4636_v15 = vld [vmem:[%s6447_s0 + $0x374] sm:$0xff]  }
 0x17e   :  { %4313 = vmatprep.mubr.msk.bf16.mxu0 %vm4677_vm0, %v6536_v34  ;;  %4455 = vmatprep.mubr.msk.bf16.mxu1 %vm4677_vm0, %v6536_v34 }
 0x180   :  { %v5518_v0 = vpop.f32.mrb[76].mxu0  ;;  %v5520_v58 = vpop.f32.mrb[76].mxu1 }
 0x181   :  { %6557 = vst [vmem:[#allocation27_spill] sm:$0xff] %v5518_v0  ;;  %6558 = vst [vmem:[#allocation28_spill] sm:$0xff] %v5520_v58  ;;  %v4055_v39 = vpop.f32.mrb[77].mxu0  ;;  %v4197_v5 = vpop.f32.mrb[77].mxu1 }
 0x182   :  { %v5530_v12 = vpop.f32.mrb[78].mxu0  ;;  %v5532_v19 = vpop.f32.mrb[78].mxu1 }
 0x183   :  { %6559 = vst [vmem:[#allocation29_spill] sm:$0xff] %v5530_v12  ;;  %6560 = vst [vmem:[#allocation30_spill] sm:$0xff] %v5532_v19  ;;  %v4056_v7 = vpop.f32.mrb[79].mxu0  ;;  %v4198_v24 = vpop.f32.mrb[79].mxu1 }
 0x184   :  { %v4637_v24 = vld [vmem:[%s6447_s0 + $0x278] sm:$0xff]  }
 0x185   :  { %4314 = vmatmul.mubr.msk.bf16.gmra.mrb[184].mxu0 %vm282_vm3, %v4635_v46  ;;  %4456 = vmatmul.mubr.msk.bf16.gmra.mrb[184].mxu1 %vm282_vm3, %v4636_v15  ;;  %v4638_v46 = vld [vmem:[%s6447_s0 + $0x37c] sm:$0xff]  }
 0x186   :  { %4317 = vmatprep.mubr.msk.bf16.mxu0 %vm4677_vm0, %v6536_v34  ;;  %4459 = vmatprep.mubr.msk.bf16.mxu1 %vm4677_vm0, %v6536_v34 }
 0x188   :  { %v5542_v39 = vpop.f32.mrb[80].mxu0  ;;  %v5544_v5 = vpop.f32.mrb[80].mxu1 }
 0x189   :  { %6561 = vst [vmem:[#allocation31_spill] sm:$0xff] %v5542_v39  ;;  %6562 = vst [vmem:[#allocation32_spill] sm:$0xff] %v5544_v5  ;;  %v4059_v27 = vpop.f32.mrb[81].mxu0  ;;  %v4201_v7 = vpop.f32.mrb[81].mxu1 }
 0x18a   :  { %v5554_v15 = vpop.f32.mrb[82].mxu0  ;;  %v5556_v19 = vpop.f32.mrb[82].mxu1 }
 0x18b   :  { %6563 = vst [vmem:[#allocation33_spill] sm:$0xff] %v5554_v15  ;;  %6564 = vst [vmem:[#allocation34_spill] sm:$0xff] %v5556_v19  ;;  %v4060_v58 = vpop.f32.mrb[83].mxu0  ;;  %v4202_v0 = vpop.f32.mrb[83].mxu1 }
 0x18c   :  { %v4639_v0 = vld [vmem:[%s6447_s0 + $0x280] sm:$0xff]  }
 0x18d   :  { %4318 = vmatmul.mubr.msk.bf16.gmra.mrb[188].mxu0 %vm282_vm3, %v4637_v24  ;;  %4460 = vmatmul.mubr.msk.bf16.gmra.mrb[188].mxu1 %vm282_vm3, %v4638_v46  ;;  %v4640_v24 = vld [vmem:[%s6447_s0 + $0x384] sm:$0xff]  }
 0x18e   :  { %4321 = vmatprep.mubr.msk.bf16.mxu0 %vm4677_vm0, %v6536_v34  ;;  %4463 = vmatprep.mubr.msk.bf16.mxu1 %vm4677_vm0, %v6536_v34 }
 0x190   :  { %v5566_v27 = vpop.f32.mrb[84].mxu0  ;;  %v5568_v7 = vpop.f32.mrb[84].mxu1 }
 0x191   :  { %6565 = vst [vmem:[#allocation35_spill] sm:$0xff] %v5566_v27  ;;  %6566 = vst [vmem:[#allocation36_spill] sm:$0xff] %v5568_v7  ;;  %v4063_v12 = vpop.f32.mrb[85].mxu0  ;;  %v4205_v58 = vpop.f32.mrb[85].mxu1 }
 0x192   :  { %v5578_v46 = vpop.f32.mrb[86].mxu0  ;;  %v5580_v19 = vpop.f32.mrb[86].mxu1 }
 0x193   :  { %6567 = vst [vmem:[#allocation37_spill] sm:$0xff] %v5578_v46  ;;  %6568 = vst [vmem:[#allocation38_spill] sm:$0xff] %v5580_v19  ;;  %v4064_v5 = vpop.f32.mrb[87].mxu0  ;;  %v4206_v39 = vpop.f32.mrb[87].mxu1 }
 0x194   :  { %v4641_v39 = vld [vmem:[%s6447_s0 + $0x288] sm:$0xff]  }
 0x195   :  { %4322 = vmatmul.mubr.msk.bf16.gmra.mrb[192].mxu0 %vm282_vm3, %v4639_v0  ;;  %4464 = vmatmul.mubr.msk.bf16.gmra.mrb[192].mxu1 %vm282_vm3, %v4640_v24  ;;  %v4642_v0 = vld [vmem:[%s6447_s0 + $0x38c] sm:$0xff]  }
 0x196   :  { %4325 = vmatprep.mubr.msk.bf16.mxu0 %vm4677_vm0, %v6536_v34  ;;  %4467 = vmatprep.mubr.msk.bf16.mxu1 %vm4677_vm0, %v6536_v34 }
 0x198   :  { %v5590_v12 = vpop.f32.mrb[88].mxu0  ;;  %v5592_v58 = vpop.f32.mrb[88].mxu1 }
 0x199   :  { %6569 = vst [vmem:[#allocation39_spill] sm:$0xff] %v5590_v12  ;;  %6570 = vst [vmem:[#allocation40_spill] sm:$0xff] %v5592_v58  ;;  %v4067_v15 = vpop.f32.mrb[89].mxu0  ;;  %v4209_v5 = vpop.f32.mrb[89].mxu1 }
 0x19a   :  { %v5602_v24 = vpop.f32.mrb[90].mxu0  ;;  %v5604_v19 = vpop.f32.mrb[90].mxu1 }
 0x19b   :  { %6571 = vst [vmem:[#allocation41_spill] sm:$0xff] %v5602_v24  ;;  %6572 = vst [vmem:[#allocation42_spill] sm:$0xff] %v5604_v19  ;;  %v4068_v7 = vpop.f32.mrb[91].mxu0  ;;  %v4210_v27 = vpop.f32.mrb[91].mxu1 }
 0x19c   :  { %v4643_v27 = vld [vmem:[%s6447_s0 + $0x290] sm:$0xff]  }
 0x19d   :  { %4326 = vmatmul.mubr.msk.bf16.gmra.mrb[196].mxu0 %vm282_vm3, %v4641_v39  ;;  %4468 = vmatmul.mubr.msk.bf16.gmra.mrb[196].mxu1 %vm282_vm3, %v4642_v0  ;;  %v4644_v39 = vld [vmem:[%s6447_s0 + $0x394] sm:$0xff]  }
 0x19e   :  { %4329 = vmatprep.mubr.msk.bf16.mxu0 %vm4677_vm0, %v6536_v34  ;;  %4471 = vmatprep.mubr.msk.bf16.mxu1 %vm4677_vm0, %v6536_v34 }
 0x1a0   :  { %v5614_v15 = vpop.f32.mrb[92].mxu0  ;;  %v5616_v5 = vpop.f32.mrb[92].mxu1 }
 0x1a1   :  { %6573 = vst [vmem:[#allocation43_spill] sm:$0xff] %v5614_v15  ;;  %6574 = vst [vmem:[#allocation44_spill] sm:$0xff] %v5616_v5  ;;  %v4071_v46 = vpop.f32.mrb[93].mxu0  ;;  %v4213_v7 = vpop.f32.mrb[93].mxu1 }
 0x1a2   :  { %v5626_v0 = vpop.f32.mrb[94].mxu0  ;;  %v5628_v19 = vpop.f32.mrb[94].mxu1 }
 0x1a3   :  { %6575 = vst [vmem:[#allocation45_spill] sm:$0xff] %v5626_v0  ;;  %6576 = vst [vmem:[#allocation46_spill] sm:$0xff] %v5628_v19  ;;  %v4072_v58 = vpop.f32.mrb[95].mxu0  ;;  %v4214_v12 = vpop.f32.mrb[95].mxu1 }
 0x1a4   :  { %v4645_v12 = vld [vmem:[%s6447_s0 + $0x298] sm:$0xff]  }
 0x1a5   :  { %4330 = vmatmul.mubr.msk.bf16.gmra.mrb[200].mxu0 %vm282_vm3, %v4643_v27  ;;  %4472 = vmatmul.mubr.msk.bf16.gmra.mrb[200].mxu1 %vm282_vm3, %v4644_v39  ;;  %v4646_v27 = vld [vmem:[%s6447_s0 + $0x39c] sm:$0xff]  }
 0x1a6   :  { %4333 = vmatprep.mubr.msk.bf16.mxu0 %vm4677_vm0, %v6536_v34  ;;  %4475 = vmatprep.mubr.msk.bf16.mxu1 %vm4677_vm0, %v6536_v34 }
 0x1a8   :  { %v5638_v46 = vpop.f32.mrb[96].mxu0  ;;  %v5640_v7 = vpop.f32.mrb[96].mxu1 }
 0x1a9   :  { %6577 = vst [vmem:[#allocation47_spill] sm:$0xff] %v5638_v46  ;;  %6578 = vst [vmem:[#allocation48_spill] sm:$0xff] %v5640_v7  ;;  %v4075_v24 = vpop.f32.mrb[97].mxu0  ;;  %v4217_v58 = vpop.f32.mrb[97].mxu1 }
 0x1aa   :  { %v5650_v39 = vpop.f32.mrb[98].mxu0  ;;  %v5652_v19 = vpop.f32.mrb[98].mxu1 }
 0x1ab   :  { %6579 = vst [vmem:[#allocation49_spill] sm:$0xff] %v5650_v39  ;;  %6580 = vst [vmem:[#allocation50_spill] sm:$0xff] %v5652_v19  ;;  %v4076_v5 = vpop.f32.mrb[99].mxu0  ;;  %v4218_v15 = vpop.f32.mrb[99].mxu1 }
 0x1ac   :  { %v4647_v15 = vld [vmem:[%s6447_s0 + $0x2a0] sm:$0xff]  }
 0x1ad   :  { %4334 = vmatmul.mubr.msk.bf16.gmra.mrb[204].mxu0 %vm282_vm3, %v4645_v12  ;;  %4476 = vmatmul.mubr.msk.bf16.gmra.mrb[204].mxu1 %vm282_vm3, %v4646_v27  ;;  %v4648_v12 = vld [vmem:[%s6447_s0 + $0x3a4] sm:$0xff]  }
 0x1ae   :  { %4337 = vmatprep.mubr.msk.bf16.mxu0 %vm4677_vm0, %v6536_v34  ;;  %4479 = vmatprep.mubr.msk.bf16.mxu1 %vm4677_vm0, %v6536_v34 }
 0x1b0   :  { %v5662_v24 = vpop.f32.mrb[100].mxu0  ;;  %v5664_v58 = vpop.f32.mrb[100].mxu1 }
 0x1b1   :  { %6581 = vst [vmem:[#allocation51_spill] sm:$0xff] %v5662_v24  ;;  %6582 = vst [vmem:[#allocation52_spill] sm:$0xff] %v5664_v58  ;;  %v4079_v0 = vpop.f32.mrb[101].mxu0  ;;  %v4221_v5 = vpop.f32.mrb[101].mxu1 }
 0x1b2   :  { %v5674_v27 = vpop.f32.mrb[102].mxu0  ;;  %v5676_v19 = vpop.f32.mrb[102].mxu1 }
 0x1b3   :  { %6583 = vst [vmem:[#allocation53_spill] sm:$0xff] %v5674_v27  ;;  %6584 = vst [vmem:[#allocation54_spill] sm:$0xff] %v5676_v19  ;;  %v4080_v7 = vpop.f32.mrb[103].mxu0  ;;  %v4222_v46 = vpop.f32.mrb[103].mxu1 }
 0x1b4   :  { %v4649_v46 = vld [vmem:[%s6447_s0 + $0x2a8] sm:$0xff]  }
 0x1b5   :  { %4338 = vmatmul.mubr.msk.bf16.gmra.mrb[208].mxu0 %vm282_vm3, %v4647_v15  ;;  %4480 = vmatmul.mubr.msk.bf16.gmra.mrb[208].mxu1 %vm282_vm3, %v4648_v12  ;;  %v4650_v15 = vld [vmem:[%s6447_s0 + $0x3ac] sm:$0xff]  }
 0x1b6   :  { %4341 = vmatprep.mubr.msk.bf16.mxu0 %vm4677_vm0, %v6536_v34  ;;  %4483 = vmatprep.mubr.msk.bf16.mxu1 %vm4677_vm0, %v6536_v34 }
 0x1b8   :  { %v5686_v0 = vpop.f32.mrb[104].mxu0  ;;  %v5688_v5 = vpop.f32.mrb[104].mxu1 }
 0x1b9   :  { %6585 = vst [vmem:[#allocation55_spill] sm:$0xff] %v5686_v0  ;;  %6586 = vst [vmem:[#allocation56_spill] sm:$0xff] %v5688_v5  ;;  %v4083_v39 = vpop.f32.mrb[105].mxu0  ;;  %v4225_v7 = vpop.f32.mrb[105].mxu1 }
 0x1ba   :  { %v5698_v12 = vpop.f32.mrb[106].mxu0  ;;  %v5700_v19 = vpop.f32.mrb[106].mxu1 }
 0x1bb   :  { %6587 = vst [vmem:[#allocation57_spill] sm:$0xff] %v5698_v12  ;;  %6588 = vst [vmem:[#allocation58_spill] sm:$0xff] %v5700_v19  ;;  %v4084_v58 = vpop.f32.mrb[107].mxu0  ;;  %v4226_v24 = vpop.f32.mrb[107].mxu1 }
 0x1bc   :  { %v4651_v24 = vld [vmem:[%s6447_s0 + $0x2b0] sm:$0xff]  }
 0x1bd   :  { %4342 = vmatmul.mubr.msk.bf16.gmra.mrb[212].mxu0 %vm282_vm3, %v4649_v46  ;;  %4484 = vmatmul.mubr.msk.bf16.gmra.mrb[212].mxu1 %vm282_vm3, %v4650_v15  ;;  %v4652_v46 = vld [vmem:[%s6447_s0 + $0x3b4] sm:$0xff]  }
 0x1be   :  { %4345 = vmatprep.mubr.msk.bf16.mxu0 %vm4677_vm0, %v6536_v34  ;;  %4487 = vmatprep.mubr.msk.bf16.mxu1 %vm4677_vm0, %v6536_v34 }
 0x1c0   :  { %v5710_v39 = vpop.f32.mrb[108].mxu0  ;;  %v5712_v7 = vpop.f32.mrb[108].mxu1 }
 0x1c1   :  { %6589 = vst [vmem:[#allocation59_spill] sm:$0xff] %v5710_v39  ;;  %6590 = vst [vmem:[#allocation60_spill] sm:$0xff] %v5712_v7  ;;  %v4087_v27 = vpop.f32.mrb[109].mxu0  ;;  %v4229_v58 = vpop.f32.mrb[109].mxu1 }
 0x1c2   :  { %v5722_v15 = vpop.f32.mrb[110].mxu0  ;;  %v5724_v19 = vpop.f32.mrb[110].mxu1 }
 0x1c3   :  { %6591 = vst [vmem:[#allocation61_spill] sm:$0xff] %v5722_v15  ;;  %6592 = vst [vmem:[#allocation62_spill] sm:$0xff] %v5724_v19  ;;  %v4088_v5 = vpop.f32.mrb[111].mxu0  ;;  %v4230_v0 = vpop.f32.mrb[111].mxu1 }
 0x1c4   :  { %v4653_v0 = vld [vmem:[%s6447_s0 + $0x2b8] sm:$0xff]  }
 0x1c5   :  { %4346 = vmatmul.mubr.msk.bf16.gmra.mrb[216].mxu0 %vm282_vm3, %v4651_v24  ;;  %4488 = vmatmul.mubr.msk.bf16.gmra.mrb[216].mxu1 %vm282_vm3, %v4652_v46  ;;  %v4654_v24 = vld [vmem:[%s6447_s0 + $0x3bc] sm:$0xff]  }
 0x1c6   :  { %4349 = vmatprep.mubr.msk.bf16.mxu0 %vm4677_vm0, %v6536_v34  ;;  %4491 = vmatprep.mubr.msk.bf16.mxu1 %vm4677_vm0, %v6536_v34 }
 0x1c8   :  { %v5734_v27 = vpop.f32.mrb[112].mxu0  ;;  %v5736_v58 = vpop.f32.mrb[112].mxu1 }
 0x1c9   :  { %6593 = vst [vmem:[#allocation63_spill] sm:$0xff] %v5734_v27  ;;  %6594 = vst [vmem:[#allocation64_spill] sm:$0xff] %v5736_v58  ;;  %v4091_v12 = vpop.f32.mrb[113].mxu0  ;;  %v4233_v5 = vpop.f32.mrb[113].mxu1 }
 0x1ca   :  { %v5746_v46 = vpop.f32.mrb[114].mxu0  ;;  %v5748_v19 = vpop.f32.mrb[114].mxu1 }
 0x1cb   :  { %6595 = vst [vmem:[#allocation65_spill] sm:$0xff] %v5746_v46  ;;  %6596 = vst [vmem:[#allocation66_spill] sm:$0xff] %v5748_v19  ;;  %v4092_v7 = vpop.f32.mrb[115].mxu0  ;;  %v4234_v39 = vpop.f32.mrb[115].mxu1 }
 0x1cc   :  { %v4655_v39 = vld [vmem:[%s6447_s0 + $0x2c0] sm:$0xff]  }
 0x1cd   :  { %4350 = vmatmul.mubr.msk.bf16.gmra.mrb[220].mxu0 %vm282_vm3, %v4653_v0  ;;  %4492 = vmatmul.mubr.msk.bf16.gmra.mrb[220].mxu1 %vm282_vm3, %v4654_v24  ;;  %v4656_v0 = vld [vmem:[%s6447_s0 + $0x3c4] sm:$0xff]  }
 0x1ce   :  { %4353 = vmatprep.mubr.msk.bf16.mxu0 %vm4677_vm0, %v6536_v34  ;;  %4495 = vmatprep.mubr.msk.bf16.mxu1 %vm4677_vm0, %v6536_v34 }
 0x1d0   :  { %v5758_v12 = vpop.f32.mrb[116].mxu0  ;;  %v5760_v5 = vpop.f32.mrb[116].mxu1 }
 0x1d1   :  { %6597 = vst [vmem:[#allocation67_spill] sm:$0xff] %v5758_v12  ;;  %6598 = vst [vmem:[#allocation68_spill] sm:$0xff] %v5760_v5  ;;  %v4095_v15 = vpop.f32.mrb[117].mxu0  ;;  %v4237_v7 = vpop.f32.mrb[117].mxu1 }
 0x1d2   :  { %v5770_v24 = vpop.f32.mrb[118].mxu0  ;;  %v5772_v19 = vpop.f32.mrb[118].mxu1 }
 0x1d3   :  { %6599 = vst [vmem:[#allocation69_spill] sm:$0xff] %v5770_v24  ;;  %6600 = vst [vmem:[#allocation70_spill] sm:$0xff] %v5772_v19  ;;  %v4096_v58 = vpop.f32.mrb[119].mxu0  ;;  %v4238_v27 = vpop.f32.mrb[119].mxu1 }
 0x1d4   :  { %v4657_v27 = vld [vmem:[%s6447_s0 + $0x2c8] sm:$0xff]  }
 0x1d5   :  { %4354 = vmatmul.mubr.msk.bf16.gmra.mrb[224].mxu0 %vm282_vm3, %v4655_v39  ;;  %4496 = vmatmul.mubr.msk.bf16.gmra.mrb[224].mxu1 %vm282_vm3, %v4656_v0  ;;  %v4658_v39 = vld [vmem:[%s6447_s0 + $0x3cc] sm:$0xff]  }
 0x1d6   :  { %4357 = vmatprep.mubr.msk.bf16.mxu0 %vm4677_vm0, %v6536_v34  ;;  %4499 = vmatprep.mubr.msk.bf16.mxu1 %vm4677_vm0, %v6536_v34 }
 0x1d8   :  { %v5782_v15 = vpop.f32.mrb[120].mxu0  ;;  %v5784_v7 = vpop.f32.mrb[120].mxu1 }
 0x1d9   :  { %6601 = vst [vmem:[#allocation71_spill] sm:$0xff] %v5782_v15  ;;  %6602 = vst [vmem:[#allocation72_spill] sm:$0xff] %v5784_v7  ;;  %v4099_v46 = vpop.f32.mrb[121].mxu0  ;;  %v4241_v58 = vpop.f32.mrb[121].mxu1 }
 0x1da   :  { %v5794_v0 = vpop.f32.mrb[122].mxu0  ;;  %v5796_v19 = vpop.f32.mrb[122].mxu1 }
 0x1db   :  { %6603 = vst [vmem:[#allocation73_spill] sm:$0xff] %v5794_v0  ;;  %6604 = vst [vmem:[#allocation74_spill] sm:$0xff] %v5796_v19  ;;  %v4100_v5 = vpop.f32.mrb[123].mxu0  ;;  %v4242_v12 = vpop.f32.mrb[123].mxu1 }
 0x1dc   :  { %v4659_v12 = vld [vmem:[%s6447_s0 + $0x2d0] sm:$0xff]  }
 0x1dd   :  { %4358 = vmatmul.mubr.msk.bf16.gmra.mrb[228].mxu0 %vm282_vm3, %v4657_v27  ;;  %4500 = vmatmul.mubr.msk.bf16.gmra.mrb[228].mxu1 %vm282_vm3, %v4658_v39  ;;  %v4660_v27 = vld [vmem:[%s6447_s0 + $0x3d4] sm:$0xff]  }
 0x1de   :  { %4361 = vmatprep.mubr.msk.bf16.mxu0 %vm4677_vm0, %v6536_v34  ;;  %4503 = vmatprep.mubr.msk.bf16.mxu1 %vm4677_vm0, %v6536_v34 }
 0x1e0   :  { %v5806_v46 = vpop.f32.mrb[124].mxu0  ;;  %v5808_v58 = vpop.f32.mrb[124].mxu1 }
 0x1e1   :  { %6605 = vst [vmem:[#allocation75_spill] sm:$0xff] %v5806_v46  ;;  %6606 = vst [vmem:[#allocation76_spill] sm:$0xff] %v5808_v58  ;;  %v4103_v24 = vpop.f32.mrb[125].mxu0  ;;  %v4245_v5 = vpop.f32.mrb[125].mxu1 }
 0x1e2   :  { %v5818_v39 = vpop.f32.mrb[126].mxu0  ;;  %v5820_v19 = vpop.f32.mrb[126].mxu1 }
 0x1e3   :  { %6607 = vst [vmem:[#allocation77_spill] sm:$0xff] %v5818_v39  ;;  %6608 = vst [vmem:[#allocation78_spill] sm:$0xff] %v5820_v19  ;;  %v4104_v7 = vpop.f32.mrb[127].mxu0  ;;  %v4246_v15 = vpop.f32.mrb[127].mxu1 }
 0x1e4   :  { %v4661_v15 = vld [vmem:[%s6447_s0 + $0x2d8] sm:$0xff]  }
 0x1e5   :  { %4362 = vmatmul.mubr.msk.bf16.gmra.mrb[232].mxu0 %vm282_vm3, %v4659_v12  ;;  %4504 = vmatmul.mubr.msk.bf16.gmra.mrb[232].mxu1 %vm282_vm3, %v4660_v27  ;;  %v4662_v12 = vld [vmem:[%s6447_s0 + $0x3dc] sm:$0xff]  }
 0x1e6   :  { %4365 = vmatprep.mubr.msk.bf16.mxu0 %vm4677_vm0, %v6536_v34  ;;  %4507 = vmatprep.mubr.msk.bf16.mxu1 %vm4677_vm0, %v6536_v34 }
 0x1e8   :  { %v5830_v24 = vpop.f32.mrb[128].mxu0  ;;  %v5832_v5 = vpop.f32.mrb[128].mxu1 }
 0x1e9   :  { %6609 = vst [vmem:[#allocation79_spill] sm:$0xff] %v5830_v24  ;;  %6610 = vst [vmem:[#allocation80_spill] sm:$0xff] %v5832_v5  ;;  %v4107_v0 = vpop.f32.mrb[129].mxu0  ;;  %v4249_v7 = vpop.f32.mrb[129].mxu1 }
 0x1ea   :  { %v682_v27 = vpop.f32.mrb[130].mxu0  ;;  %v1306_v19 = vpop.f32.mrb[130].mxu1 }
 0x1eb   :  { %v4108_v39 = vpop.f32.mrb[131].mxu0  ;;  %v4250_v58 = vpop.f32.mrb[131].mxu1 }
 0x1ec   :  { %v4663_v58 = vld [vmem:[%s6447_s0 + $0x2e0] sm:$0xff]  }
 0x1ed   :  { %4366 = vmatmul.mubr.msk.bf16.gmra.mrb[236].mxu0 %vm282_vm3, %v4661_v15  ;;  %4508 = vmatmul.mubr.msk.bf16.gmra.mrb[236].mxu1 %vm282_vm3, %v4662_v12  ;;  %v4664_v39 = vld [vmem:[%s6447_s0 + $0x3e4] sm:$0xff]   ;;  %v5860_v15 = vld [vmem:[%s6448_s2] ss:$0 sm:$0xff] }
 0x1ee   :  { %4369 = vmatprep.mubr.msk.bf16.mxu0 %vm4677_vm0, %v6536_v34  ;;  %4511 = vmatprep.mubr.msk.bf16.mxu1 %vm4677_vm0, %v6536_v34 }
 0x1f0   :  { %v1736_v0 = vpop.f32.mrb[132].mxu0  ;;  %v2425_v7 = vpop.f32.mrb[132].mxu1 }
 0x1f1   :  { %v1998_v5 = vmax.f32 %v6611_v51, %v1736_v0  ;;  %v4263_v27 = vpop.f32.mrb[133].mxu0  ;;  %v4405_v19 = vpop.f32.mrb[133].mxu1 }
 0x1f2   :  { %v1739_v12 = vpop.f32.mrb[134].mxu0  ;;  %v2428_v24 = vpop.f32.mrb[134].mxu1 }
 0x1f3   :  { %v2687_v46 = vmax.f32 %v1998_v5, %v2425_v7  ;;  %v1999_v2 = vmax.f32 %v6612_v1, %v1739_v12  ;;  %v4264_v51 = vpop.f32.mrb[135].mxu0  ;;  %v4406_v0 = vpop.f32.mrb[135].mxu1 }
 0x1f4   :  { %v4666_v51 = vld [vmem:[%s6447_s0 + $0x3ec] sm:$0xff]  }
 0x1f5   :  { %v2759_v27 = vadd.f32 %v5860_v15, %v2687_v46  ;;  %v2688_v19 = vmax.f32 %v1999_v2, %v2428_v24  ;;  %4370 = vmatmul.mubr.msk.bf16.gmra.mrb[240].mxu0 %vm282_vm3, %v4663_v58  ;;  %4512 = vmatmul.mubr.msk.bf16.gmra.mrb[240].mxu1 %vm282_vm3, %v4664_v39  ;;  %v6613_v46 = vmax.f32 %v5086_v13, %v5088_v14  ;;  %v4665_v2 = vld [vmem:[%s6447_s0 + $0x2e8] sm:$0xff]  }
 0x1f6   :  { %4373 = vmatprep.mubr.msk.bf16.mxu0 %vm4677_vm0, %v6536_v34  ;;  %4515 = vmatprep.mubr.msk.bf16.mxu1 %vm4677_vm0, %v6536_v34  ;;  %v6614_v14 = vmax.f32 %v5098_v20, %v5100_v21 }
 0x1f7   :  { %v2824_v5 = vmax.f32 %v2759_v27, 0.0  ;;  %v2760_v7 = vadd.f32 %v5860_v15, %v2688_v19 }
 0x1f8   :  { %v1744_v8 = vpop.f32.mrb[136].mxu0  ;;  %v2433_v9 = vpop.f32.mrb[136].mxu1 }
 0x1f9   :  { %v3750_v12 = vpack.c.bf16 %v2824_v5, %v2824_v5  ;;  %v2825_v1 = vmax.f32 %v2760_v7, 0.0  ;;  %v2000_v24 = vmax.f32 %v6613_v46, %v1744_v8  ;;  %v4267_v58 = vpop.f32.mrb[137].mxu0  ;;  %v4409_v39 = vpop.f32.mrb[137].mxu1 }
 0x1fa   :  { %v1747_v0 = vpop.f32.mrb[138].mxu0  ;;  %v2436_v27 = vpop.f32.mrb[138].mxu1  ;;  %v6615_v39 = vmax.f32 %v5110_v25, %v5112_v26  ;;  %v6616_v26 = vmax.f32 %v5122_v32, %v5124_v33 }
 0x1fb   :  { %3151 = vst.msk [vmem:[%s6449_s3] sm:$0xf] %vm3150_vm4, %v3750_v12  ;;  %v3751_v19 = vpack.c.bf16 %v2825_v1, %v2825_v1  ;;  %v2689_v13 = vmax.f32 %v2000_v24, %v2433_v9  ;;  %v2001_v5 = vmax.f32 %v6614_v14, %v1747_v0  ;;  %v4268_v7 = vpop.f32.mrb[139].mxu0  ;;  %v4410_v8 = vpop.f32.mrb[139].mxu1 }
 0x1fd   :  { %3152 = vst.msk [vmem:[%s6449_s3 + $0x4] sm:$0xf] %vm3150_vm4, %v3751_v19  ;;  %v2761_v46 = vadd.f32 %v5860_v15, %v2689_v13  ;;  %v2690_v58 = vmax.f32 %v2001_v5, %v2436_v27  ;;  %4374 = vmatmul.mubr.msk.bf16.gmra.mrb[244].mxu0 %vm282_vm3, %v4665_v2  ;;  %4516 = vmatmul.mubr.msk.bf16.gmra.mrb[244].mxu1 %vm282_vm3, %v4666_v51  ;;  %v4667_v51 = vld [vmem:[%s6447_s0 + $0x2f0] sm:$0xff]  }
 0x1fe   :  { %4377 = vmatprep.mubr.msk.bf16.mxu0 %vm4677_vm0, %v6536_v34  ;;  %4519 = vmatprep.mubr.msk.bf16.mxu1 %vm4677_vm0, %v6536_v34  ;;  %v4668_v19 = vld [vmem:[%s6447_s0 + $0x3f4] sm:$0xff]  }
 0x1ff   :  { %v2826_v20 = vmax.f32 %v2761_v46, 0.0  ;;  %v2762_v21 = vadd.f32 %v5860_v15, %v2690_v58 }
 0x200   :  { %v1752_v9 = vpop.f32.mrb[140].mxu0  ;;  %v2441_v12 = vpop.f32.mrb[140].mxu1 }
 0x201   :  { %v3752_v1 = vpack.c.bf16 %v2826_v20, %v2826_v20  ;;  %v2827_v24 = vmax.f32 %v2762_v21, 0.0  ;;  %v2002_v0 = vmax.f32 %v6615_v39, %v1752_v9  ;;  %v4271_v2 = vpop.f32.mrb[141].mxu0  ;;  %v4413_v27 = vpop.f32.mrb[141].mxu1 }
 0x202   :  { %v1755_v13 = vpop.f32.mrb[142].mxu0  ;;  %v2444_v14 = vpop.f32.mrb[142].mxu1  ;;  %v4669_v27 = vld [vmem:[%s6447_s0 + $0x2f8] sm:$0xff]  }
 0x203   :  { %3153 = vst.msk [vmem:[%s6449_s3 + $0x8] sm:$0xf] %vm3150_vm4, %v3752_v1  ;;  %v3753_v5 = vpack.c.bf16 %v2827_v24, %v2827_v24  ;;  %v2691_v25 = vmax.f32 %v2002_v0, %v2441_v12  ;;  %v2003_v7 = vmax.f32 %v6616_v26, %v1755_v13  ;;  %v4272_v8 = vpop.f32.mrb[143].mxu0  ;;  %v4414_v46 = vpop.f32.mrb[143].mxu1  ;;  %v6617_v24 = vmax.f32 %v5134_v37, %v5136_v38 }
 0x204   :  { %v6618_v38 = vmax.f32 %v5146_v44, %v5148_v45 }
 0x205   :  { %3154 = vst.msk [vmem:[%s6449_s3 + $0xc] sm:$0xf] %vm3150_vm4, %v3753_v5  ;;  %v2763_v58 = vadd.f32 %v5860_v15, %v2691_v25  ;;  %v2692_v20 = vmax.f32 %v2003_v7, %v2444_v14  ;;  %4378 = vmatmul.mubr.msk.bf16.gmra.mrb[248].mxu0 %vm282_vm3, %v4667_v51  ;;  %4520 = vmatmul.mubr.msk.bf16.gmra.mrb[248].mxu1 %vm282_vm3, %v4668_v19  ;;  %v4670_v51 = vld [vmem:[%s6447_s0 + $0x3fc] sm:$0xff]  }
 0x206   :  { %4381 = vmatprep.mubr.msk.bf16.mxu0 %vm4677_vm0, %v6536_v34  ;;  %4523 = vmatprep.mubr.msk.bf16.mxu1 %vm4677_vm0, %v6536_v34 }
 0x207   :  { %v2828_v32 = vmax.f32 %v2763_v58, 0.0  ;;  %v2764_v33 = vadd.f32 %v5860_v15, %v2692_v20 }
 0x208   :  { %v1760_v21 = vpop.f32.mrb[144].mxu0  ;;  %v2449_v9 = vpop.f32.mrb[144].mxu1 }
 0x209   :  { %v3754_v12 = vpack.c.bf16 %v2828_v32, %v2828_v32  ;;  %v2829_v1 = vmax.f32 %v2764_v33, 0.0  ;;  %v2004_v39 = vmax.f32 %v6617_v24, %v1760_v21  ;;  %v4275_v0 = vpop.f32.mrb[145].mxu0  ;;  %v4417_v2 = vpop.f32.mrb[145].mxu1  ;;  %v6619_v33 = vmax.f32 %v5158_v49, %v5160_v50  ;;  %v4672_v24 = vld [vmem:[%s6447_s0 + $0x404] sm:$0xff]  }
 0x20a   :  { %v1763_v19 = vpop.f32.mrb[146].mxu0  ;;  %v2452_v13 = vpop.f32.mrb[146].mxu1  ;;  %v6620_v50 = vmax.f32 %v5170_v56, %v5172_v57 }
 0x20b   :  { %3155 = vst.msk [vmem:[%s6449_s3 + $0x10] sm:$0xf] %vm3150_vm4, %v3754_v12  ;;  %v3755_v14 = vpack.c.bf16 %v2829_v1, %v2829_v1  ;;  %v2693_v37 = vmax.f32 %v2004_v39, %v2449_v9  ;;  %v2005_v5 = vmax.f32 %v6618_v38, %v1763_v19  ;;  %v4276_v25 = vpop.f32.mrb[147].mxu0  ;;  %v4418_v26 = vpop.f32.mrb[147].mxu1  ;;  %v4671_v1 = vld [vmem:[%s6447_s0 + $0x300] sm:$0xff]  }
 0x20d   :  { %3156 = vst.msk [vmem:[%s6449_s3 + $0x14] sm:$0xf] %vm3150_vm4, %v3755_v14  ;;  %v2765_v7 = vadd.f32 %v5860_v15, %v2693_v37  ;;  %v2694_v8 = vmax.f32 %v2005_v5, %v2452_v13  ;;  %4382 = vmatmul.mubr.msk.bf16.gmra.mrb[252].mxu0 %vm282_vm3, %v4669_v27  ;;  %4524 = vmatmul.mubr.msk.bf16.gmra.mrb[252].mxu1 %vm282_vm3, %v4670_v51  ;;  %v4673_v5 = vld [vmem:[%s6447_s0 + $0x308] ss:$0 sps:$4 sm:$0xff]  }
 0x20e   :  { %4385 = vmatprep.mubr.msk.bf16.mxu0 %vm4677_vm0, %v6536_v34  ;;  %4527 = vmatprep.mubr.msk.bf16.mxu1 %vm4677_vm0, %v6536_v34 }
 0x20f   :  { %v2830_v44 = vmax.f32 %v2765_v7, 0.0  ;;  %v2766_v45 = vadd.f32 %v5860_v15, %v2694_v8  ;;  %v6621_v7 = vmax.f32 %v5182_v61, %v5184_v62 }
 0x210   :  { %v1768_v46 = vpop.f32.mrb[148].mxu0  ;;  %v2457_v58 = vpop.f32.mrb[148].mxu1 }
 0x211   :  { %v3756_v20 = vpack.c.bf16 %v2830_v44, %v2830_v44  ;;  %v2831_v32 = vmax.f32 %v2766_v45, 0.0  ;;  %v2006_v21 = vmax.f32 %v6619_v33, %v1768_v46  ;;  %v4279_v9 = vpop.f32.mrb[149].mxu0  ;;  %v4421_v12 = vpop.f32.mrb[149].mxu1  ;;  %v6622_v33 = vmax.f32 %v5194_v10, %v5196_v11 }
 0x212   :  { %v1771_v39 = vpop.f32.mrb[150].mxu0  ;;  %v2460_v0 = vpop.f32.mrb[150].mxu1 }
 0x213   :  { %3157 = vst.msk [vmem:[%s6449_s3 + $0x18] sm:$0xf] %vm3150_vm4, %v3756_v20  ;;  %v3757_v2 = vpack.c.bf16 %v2831_v32, %v2831_v32  ;;  %v2695_v49 = vmax.f32 %v2006_v21, %v2457_v58  ;;  %v2007_v27 = vmax.f32 %v6620_v50, %v1771_v39  ;;  %v4280_v51 = vpop.f32.mrb[151].mxu0  ;;  %v4422_v19 = vpop.f32.mrb[151].mxu1 }
 0x215   :  { %3158 = vst.msk [vmem:[%s6449_s3 + $0x1c] sm:$0xf] %vm3150_vm4, %v3757_v2  ;;  %v2767_v13 = vadd.f32 %v5860_v15, %v2695_v49  ;;  %v2696_v14 = vmax.f32 %v2007_v27, %v2460_v0  ;;  %4386 = vmatmul.mubr.msk.bf16.gmra.mrb[0].mxu0 %vm282_vm3, %v4671_v1  ;;  %4528 = vmatmul.mubr.msk.bf16.gmra.mrb[0].mxu1 %vm282_vm3, %v4672_v24 }
 0x216   :  { %4389 = vmatprep.mubr.msk.bf16.mxu0 %vm4677_vm0, %v6536_v34  ;;  %4531 = vmatprep.mubr.msk.bf16.mxu1 %vm4677_vm0, %v6536_v34  ;;  %v4674_v34 = vld [vmem:[%s6447_s0 + $0x40c] ss:$0 sps:$4 sm:$0xff]   ;;  %v6623_v2 = vmax.f32 %v5206_v18, %v5208_v22 }
 0x217   :  { %v2832_v56 = vmax.f32 %v2767_v13, 0.0  ;;  %v2768_v57 = vadd.f32 %v5860_v15, %v2696_v14 }
 0x218   :  { %v1776_v37 = vpop.f32.mrb[152].mxu0  ;;  %v2465_v38 = vpop.f32.mrb[152].mxu1 }
 0x219   :  { %v3758_v25 = vpack.c.bf16 %v2832_v56, %v2832_v56  ;;  %v2833_v26 = vmax.f32 %v2768_v57, 0.0  ;;  %v2008_v8 = vmax.f32 %v6621_v7, %v1776_v37  ;;  %v4283_v44 = vpop.f32.mrb[153].mxu0  ;;  %v4425_v45 = vpop.f32.mrb[153].mxu1  ;;  %v6624_v56 = vmax.f32 %v5218_v35, %v5220_v36 }
 0x21a   :  { %v1779_v46 = vpop.f32.mrb[154].mxu0  ;;  %v2468_v58 = vpop.f32.mrb[154].mxu1  ;;  %v6625_v35 = vmax.f32 %v5230_v43, %v5232_v47 }
 0x21b   :  { %3159 = vst.msk [vmem:[%s6449_s3 + $0x20] sm:$0xf] %vm3150_vm4, %v3758_v25  ;;  %v3759_v20 = vpack.c.bf16 %v2833_v26, %v2833_v26  ;;  %v2697_v32 = vmax.f32 %v2008_v8, %v2465_v38  ;;  %v2009_v61 = vmax.f32 %v6622_v33, %v1779_v46  ;;  %v4284_v62 = vpop.f32.mrb[155].mxu0  ;;  %v4426_v21 = vpop.f32.mrb[155].mxu1  ;;  %v6626_v33 = vmax.f32 %v5242_v59, %v5244_v60 }
 0x21c   :  { %v6627_v59 = vmax.f32 %v5254_v6, %v5256_v16 }
 0x21d   :  { %3160 = vst.msk [vmem:[%s6449_s3 + $0x24] sm:$0xf] %vm3150_vm4, %v3759_v20  ;;  %v2769_v9 = vadd.f32 %v5860_v15, %v2697_v32  ;;  %v2698_v12 = vmax.f32 %v2009_v61, %v2468_v58  ;;  %4390 = vmatmul.mubr.msk.bf16.gmra.mrb[4].mxu0 %vm282_vm3, %v4673_v5  ;;  %4532 = vmatmul.mubr.msk.bf16.gmra.mrb[4].mxu1 %vm282_vm3, %v4674_v34 }
 0x21f   :  { %v2834_v1 = vmax.f32 %v2769_v9, 0.0  ;;  %v2770_v24 = vadd.f32 %v5860_v15, %v2698_v12 }
 0x220   :  { %v1784_v39 = vpop.f32.mrb[156].mxu0  ;;  %v2473_v10 = vpop.f32.mrb[156].mxu1 }
 0x221   :  { %v3760_v11 = vpack.c.bf16 %v2834_v1, %v2834_v1  ;;  %v2835_v0 = vmax.f32 %v2770_v24, 0.0  ;;  %v2010_v49 = vmax.f32 %v6623_v2, %v1784_v39  ;;  %v4287_v50 = vpop.f32.mrb[157].mxu0  ;;  %v4429_v27 = vpop.f32.mrb[157].mxu1 }
 0x222   :  { %v1787_v51 = vpop.f32.mrb[158].mxu0  ;;  %v2476_v19 = vpop.f32.mrb[158].mxu1 }
 0x223   :  { %3161 = vst.msk [vmem:[%s6449_s3 + $0x28] sm:$0xf] %vm3150_vm4, %v3760_v11  ;;  %v3761_v13 = vpack.c.bf16 %v2835_v0, %v2835_v0  ;;  %v2699_v14 = vmax.f32 %v2010_v49, %v2473_v10  ;;  %v2011_v57 = vmax.f32 %v6624_v56, %v1787_v51  ;;  %v4288_v37 = vpop.f32.mrb[159].mxu0  ;;  %v4430_v38 = vpop.f32.mrb[159].mxu1  ;;  %v6628_v51 = vmax.f32 %v5266_v41, %v5268_v42 }
 0x224   :  { %v6629_v41 = vmax.f32 %v5278_v55, %v5280_v4 }
 0x225   :  { %3162 = vst.msk [vmem:[%s6449_s3 + $0x2c] sm:$0xf] %vm3150_vm4, %v3761_v13  ;;  %v2771_v18 = vadd.f32 %v5860_v15, %v2699_v14  ;;  %v2700_v22 = vmax.f32 %v2011_v57, %v2476_v19 }
 0x227   :  { %v2836_v5 = vmax.f32 %v2771_v18, 0.0  ;;  %v2772_v25 = vadd.f32 %v5860_v15, %v2700_v22 }
 0x228   :  { %v1792_v26 = vpop.f32.mrb[160].mxu0  ;;  %v2481_v7 = vpop.f32.mrb[160].mxu1 }
 0x229   :  { %v3762_v8 = vpack.c.bf16 %v2836_v5, %v2836_v5  ;;  %v2837_v44 = vmax.f32 %v2772_v25, 0.0  ;;  %v2012_v36 = vmax.f32 %v6625_v35, %v1792_v26  ;;  %v4291_v45 = vpop.f32.mrb[161].mxu0  ;;  %v4433_v34 = vpop.f32.mrb[161].mxu1  ;;  %v6630_v35 = vmax.f32 %v5290_v53, %v5292_v54 }
 0x22a   :  { %v1795_v46 = vpop.f32.mrb[162].mxu0  ;;  %v2484_v58 = vpop.f32.mrb[162].mxu1  ;;  %v6631_v53 = vmax.f32 %v5302_v28, %v5304_v29 }
 0x22b   :  { %3163 = vst.msk [vmem:[%s6449_s3 + $0x30] sm:$0xf] %vm3150_vm4, %v3762_v8  ;;  %v3763_v20 = vpack.c.bf16 %v2837_v44, %v2837_v44  ;;  %v2701_v32 = vmax.f32 %v2012_v36, %v2481_v7  ;;  %v2013_v61 = vmax.f32 %v6626_v33, %v1795_v46  ;;  %v4292_v62 = vpop.f32.mrb[163].mxu0  ;;  %v4434_v21 = vpop.f32.mrb[163].mxu1 }
 0x22d   :  { %3164 = vst.msk [vmem:[%s6449_s3 + $0x34] sm:$0xf] %vm3150_vm4, %v3763_v20  ;;  %v2773_v43 = vadd.f32 %v5860_v15, %v2701_v32  ;;  %v2702_v47 = vmax.f32 %v2013_v61, %v2484_v58 }
 0x22f   :  { %v2838_v9 = vmax.f32 %v2773_v43, 0.0  ;;  %v2774_v12 = vadd.f32 %v5860_v15, %v2702_v47 }
 0x230   :  { %v1800_v1 = vpop.f32.mrb[164].mxu0  ;;  %v2489_v24 = vpop.f32.mrb[164].mxu1 }
 0x231   :  { %v3764_v39 = vpack.c.bf16 %v2838_v9, %v2838_v9  ;;  %v2839_v10 = vmax.f32 %v2774_v12, 0.0  ;;  %v2014_v60 = vmax.f32 %v6627_v59, %v1800_v1  ;;  %v4295_v11 = vpop.f32.mrb[165].mxu0  ;;  %v4437_v0 = vpop.f32.mrb[165].mxu1  ;;  %v6632_v1 = vmax.f32 %v5314_v31, %v5316_v48 }
 0x232   :  { %v1803_v2 = vpop.f32.mrb[166].mxu0  ;;  %v2492_v49 = vpop.f32.mrb[166].mxu1  ;;  %v6633_v48 = vmax.f32 %v5326_v52, %v5328_v17 }
 0x233   :  { %3165 = vst.msk [vmem:[%s6449_s3 + $0x38] sm:$0xf] %vm3150_vm4, %v3764_v39  ;;  %v3765_v50 = vpack.c.bf16 %v2839_v10, %v2839_v10  ;;  %v2703_v27 = vmax.f32 %v2014_v60, %v2489_v24  ;;  %v2015_v19 = vmax.f32 %v6628_v51, %v1803_v2  ;;  %v4296_v13 = vpop.f32.mrb[167].mxu0  ;;  %v4438_v14 = vpop.f32.mrb[167].mxu1 }
 0x235   :  { %3166 = vst.msk [vmem:[%s6449_s3 + $0x3c] sm:$0xf] %vm3150_vm4, %v3765_v50  ;;  %v2775_v6 = vadd.f32 %v5860_v15, %v2703_v27  ;;  %v2704_v16 = vmax.f32 %v2015_v19, %v2492_v49 }
 0x237   :  { %v2840_v56 = vmax.f32 %v2775_v6, 0.0  ;;  %v2776_v57 = vadd.f32 %v5860_v15, %v2704_v16  ;;  %v6634_v6 = vmax.f32 %v5338_v30, %v5340_v63  ;;  %v6635_v63 = vmax.f32 %v5350_v40, %v5352_v23 }
 0x238   :  { %v1808_v37 = vpop.f32.mrb[168].mxu0  ;;  %v2497_v38 = vpop.f32.mrb[168].mxu1 }
 0x239   :  { %v3766_v18 = vpack.c.bf16 %v2840_v56, %v2840_v56  ;;  %v2841_v22 = vmax.f32 %v2776_v57, 0.0  ;;  %v2016_v42 = vmax.f32 %v6629_v41, %v1808_v37  ;;  %v4299_v5 = vpop.f32.mrb[169].mxu0  ;;  %v4441_v25 = vpop.f32.mrb[169].mxu1 }
 0x23a   :  { %v1811_v26 = vpop.f32.mrb[170].mxu0  ;;  %v2500_v7 = vpop.f32.mrb[170].mxu1 }
 0x23b   :  { %3167 = vst.msk [vmem:[%s6449_s3 + $0x40] sm:$0xf] %vm3150_vm4, %v3766_v18  ;;  %v3767_v8 = vpack.c.bf16 %v2841_v22, %v2841_v22  ;;  %v2705_v44 = vmax.f32 %v2016_v42, %v2497_v38  ;;  %v2017_v36 = vmax.f32 %v6630_v35, %v1811_v26  ;;  %v4300_v45 = vpop.f32.mrb[171].mxu0  ;;  %v4442_v34 = vpop.f32.mrb[171].mxu1  ;;  %v6636_v35 = vld [vmem:[#allocation2_spill] sm:$0xff] }
 0x23d   :  { %3168 = vst.msk [vmem:[%s6449_s3 + $0x44] sm:$0xf] %vm3150_vm4, %v3767_v8  ;;  %v2777_v55 = vadd.f32 %v5860_v15, %v2705_v44  ;;  %v2706_v4 = vmax.f32 %v2017_v36, %v2500_v7  ;;  %v6637_v36 = vmax.f32 %v5362_v3, %v6636_v35  ;;  %v6639_v3 = vld [vmem:[#allocation4_spill] sm:$0xff] }
 0x23f   :  { %v2842_v46 = vmax.f32 %v2777_v55, 0.0  ;;  %v2778_v58 = vadd.f32 %v5860_v15, %v2706_v4 }
 0x240   :  { %v1816_v20 = vpop.f32.mrb[172].mxu0  ;;  %v2505_v32 = vpop.f32.mrb[172].mxu1 }
 0x241   :  { %v3768_v33 = vpack.c.bf16 %v2842_v46, %v2842_v46  ;;  %v2843_v61 = vmax.f32 %v2778_v58, 0.0  ;;  %v2018_v54 = vmax.f32 %v6631_v53, %v1816_v20  ;;  %v4303_v62 = vpop.f32.mrb[173].mxu0  ;;  %v4445_v21 = vpop.f32.mrb[173].mxu1 }
 0x242   :  { %v1819_v43 = vpop.f32.mrb[174].mxu0  ;;  %v2508_v47 = vpop.f32.mrb[174].mxu1 }
 0x243   :  { %3169 = vst.msk [vmem:[%s6449_s3 + $0x48] sm:$0xf] %vm3150_vm4, %v3768_v33  ;;  %v3769_v9 = vpack.c.bf16 %v2843_v61, %v2843_v61  ;;  %v2707_v12 = vmax.f32 %v2018_v54, %v2505_v32  ;;  %v2019_v24 = vmax.f32 %v6632_v1, %v1819_v43  ;;  %v4304_v39 = vpop.f32.mrb[175].mxu0  ;;  %v4446_v10 = vpop.f32.mrb[175].mxu1  ;;  %v6638_v61 = vld [vmem:[#allocation3_spill] sm:$0xff]  ;;  %v6641_v1 = vld [vmem:[#allocation5_spill] sm:$0xff] }
 0x244   :  { %v6640_v53 = vmax.f32 %v6638_v61, %v6639_v3 }
 0x245   :  { %3170 = vst.msk [vmem:[%s6449_s3 + $0x4c] sm:$0xf] %vm3150_vm4, %v3769_v9  ;;  %v2779_v28 = vadd.f32 %v5860_v15, %v2707_v12  ;;  %v2708_v29 = vmax.f32 %v2019_v24, %v2508_v47  ;;  %v6642_v24 = vld [vmem:[#allocation6_spill] sm:$0xff] }
 0x246   :  { %v6643_v39 = vmax.f32 %v6641_v1, %v6642_v24  ;;  %v6657_v1 = vld [vmem:[#allocation16_spill] sm:$0xff] }
 0x247   :  { %v2844_v59 = vmax.f32 %v2779_v28, 0.0  ;;  %v2780_v60 = vadd.f32 %v5860_v15, %v2708_v29 }
 0x248   :  { %v1824_v11 = vpop.f32.mrb[176].mxu0  ;;  %v2513_v0 = vpop.f32.mrb[176].mxu1 }
 0x249   :  { %v3770_v2 = vpack.c.bf16 %v2844_v59, %v2844_v59  ;;  %v2845_v49 = vmax.f32 %v2780_v60, 0.0  ;;  %v2020_v31 = vmax.f32 %v6633_v48, %v1824_v11  ;;  %v4307_v50 = vpop.f32.mrb[177].mxu0  ;;  %v4449_v27 = vpop.f32.mrb[177].mxu1 }
 0x24a   :  { %v1827_v51 = vpop.f32.mrb[178].mxu0  ;;  %v2516_v19 = vpop.f32.mrb[178].mxu1  ;;  %v6644_v50 = vld [vmem:[#allocation7_spill] sm:$0xff]  ;;  %v6645_v27 = vld [vmem:[#allocation8_spill] sm:$0xff] }
 0x24b   :  { %3171 = vst.msk [vmem:[%s6449_s3 + $0x50] sm:$0xf] %vm3150_vm4, %v3770_v2  ;;  %v3771_v13 = vpack.c.bf16 %v2845_v49, %v2845_v49  ;;  %v2709_v14 = vmax.f32 %v2020_v31, %v2513_v0  ;;  %v2021_v16 = vmax.f32 %v6634_v6, %v1827_v51  ;;  %v4308_v56 = vpop.f32.mrb[179].mxu0  ;;  %v4450_v57 = vpop.f32.mrb[179].mxu1  ;;  %v6646_v51 = vmax.f32 %v6644_v50, %v6645_v27 }
 0x24d   :  { %3172 = vst.msk [vmem:[%s6449_s3 + $0x54] sm:$0xf] %vm3150_vm4, %v3771_v13  ;;  %v2781_v52 = vadd.f32 %v5860_v15, %v2709_v14  ;;  %v2710_v17 = vmax.f32 %v2021_v16, %v2516_v19 }
 0x24f   :  { %v2846_v37 = vmax.f32 %v2781_v52, 0.0  ;;  %v2782_v38 = vadd.f32 %v5860_v15, %v2710_v17  ;;  %v6647_v52 = vld [vmem:[#allocation9_spill] sm:$0xff]  ;;  %v6648_v17 = vld [vmem:[#allocation10_spill] sm:$0xff] }
 0x250   :  { %v1832_v18 = vpop.f32.mrb[180].mxu0  ;;  %v2521_v22 = vpop.f32.mrb[180].mxu1 }
 0x251   :  { %v3772_v41 = vpack.c.bf16 %v2846_v37, %v2846_v37  ;;  %v2847_v42 = vmax.f32 %v2782_v38, 0.0  ;;  %v2022_v30 = vmax.f32 %v6635_v63, %v1832_v18  ;;  %v4311_v5 = vpop.f32.mrb[181].mxu0  ;;  %v4453_v25 = vpop.f32.mrb[181].mxu1  ;;  %v6649_v37 = vmax.f32 %v6647_v52, %v6648_v17  ;;  %v6663_v52 = vld [vmem:[#allocation20_spill] sm:$0xff] }
 0x252   :  { %v1835_v26 = vpop.f32.mrb[182].mxu0  ;;  %v2524_v7 = vpop.f32.mrb[182].mxu1 }
 0x253   :  { %3173 = vst.msk [vmem:[%s6449_s3 + $0x58] sm:$0xf] %vm3150_vm4, %v3772_v41  ;;  %v3773_v8 = vpack.c.bf16 %v2847_v42, %v2847_v42  ;;  %v2711_v44 = vmax.f32 %v2022_v30, %v2521_v22  ;;  %v2023_v45 = vmax.f32 %v6637_v36, %v1835_v26  ;;  %v4312_v34 = vpop.f32.mrb[183].mxu0  ;;  %v4454_v55 = vpop.f32.mrb[183].mxu1 }
 0x255   :  { %3174 = vst.msk [vmem:[%s6449_s3 + $0x5c] sm:$0xf] %vm3150_vm4, %v3773_v8  ;;  %v2783_v40 = vadd.f32 %v5860_v15, %v2711_v44  ;;  %v2712_v23 = vmax.f32 %v2023_v45, %v2524_v7  ;;  %v6650_v8 = vld [vmem:[#allocation11_spill] sm:$0xff]  ;;  %v6651_v44 = vld [vmem:[#allocation12_spill] sm:$0xff] }
 0x256   :  { %v6652_v35 = vmax.f32 %v6650_v8, %v6651_v44 }
 0x257   :  { %v2848_v4 = vmax.f32 %v2783_v40, 0.0  ;;  %v2784_v46 = vadd.f32 %v5860_v15, %v2712_v23 }
 0x258   :  { %v1840_v58 = vpop.f32.mrb[184].mxu0  ;;  %v2529_v20 = vpop.f32.mrb[184].mxu1 }
 0x259   :  { %v3774_v32 = vpack.c.bf16 %v2848_v4, %v2848_v4  ;;  %v2849_v33 = vmax.f32 %v2784_v46, 0.0  ;;  %v2024_v54 = vmax.f32 %v6640_v53, %v1840_v58  ;;  %v4315_v62 = vpop.f32.mrb[185].mxu0  ;;  %v4457_v21 = vpop.f32.mrb[185].mxu1  ;;  %v6653_v46 = vld [vmem:[#allocation13_spill] sm:$0xff]  ;;  %v6654_v58 = vld [vmem:[#allocation14_spill] sm:$0xff] }
 0x25a   :  { %v1843_v43 = vpop.f32.mrb[186].mxu0  ;;  %v2532_v47 = vpop.f32.mrb[186].mxu1 }
 0x25b   :  { %3175 = vst.msk [vmem:[%s6449_s3 + $0x60] sm:$0xf] %vm3150_vm4, %v3774_v32  ;;  %v3775_v9 = vpack.c.bf16 %v2849_v33, %v2849_v33  ;;  %v2713_v12 = vmax.f32 %v2024_v54, %v2529_v20  ;;  %v2025_v10 = vmax.f32 %v6643_v39, %v1843_v43  ;;  %v4316_v28 = vpop.f32.mrb[187].mxu0  ;;  %v4458_v29 = vpop.f32.mrb[187].mxu1  ;;  %v6655_v20 = vmax.f32 %v6653_v46, %v6654_v58  ;;  %v6669_v46 = vld [vmem:[#allocation24_spill] sm:$0xff] }
 0x25d   :  { %3176 = vst.msk [vmem:[%s6449_s3 + $0x64] sm:$0xf] %vm3150_vm4, %v3775_v9  ;;  %v2785_v59 = vadd.f32 %v5860_v15, %v2713_v12  ;;  %v2714_v60 = vmax.f32 %v2025_v10, %v2532_v47  ;;  %v6656_v12 = vld [vmem:[#allocation15_spill] sm:$0xff] }
 0x25e   :  { %v6658_v24 = vmax.f32 %v6656_v12, %v6657_v1 }
 0x25f   :  { %v2850_v11 = vmax.f32 %v2785_v59, 0.0  ;;  %v2786_v0 = vadd.f32 %v5860_v15, %v2714_v60 }
 0x260   :  { %v1848_v2 = vpop.f32.mrb[188].mxu0  ;;  %v2537_v49 = vpop.f32.mrb[188].mxu1 }
 0x261   :  { %v3776_v48 = vpack.c.bf16 %v2850_v11, %v2850_v11  ;;  %v2851_v31 = vmax.f32 %v2786_v0, 0.0  ;;  %v2026_v19 = vmax.f32 %v6646_v51, %v1848_v2  ;;  %v4319_v13 = vpop.f32.mrb[189].mxu0  ;;  %v4461_v14 = vpop.f32.mrb[189].mxu1  ;;  %v6659_v0 = vld [vmem:[#allocation17_spill] sm:$0xff]  ;;  %v6660_v2 = vld [vmem:[#allocation18_spill] sm:$0xff] }
 0x262   :  { %v1851_v6 = vpop.f32.mrb[190].mxu0  ;;  %v2540_v16 = vpop.f32.mrb[190].mxu1 }
 0x263   :  { %3177 = vst.msk [vmem:[%s6449_s3 + $0x68] sm:$0xf] %vm3150_vm4, %v3776_v48  ;;  %v3777_v56 = vpack.c.bf16 %v2851_v31, %v2851_v31  ;;  %v2715_v57 = vmax.f32 %v2026_v19, %v2537_v49  ;;  %v2027_v38 = vmax.f32 %v6649_v37, %v1851_v6  ;;  %v4320_v18 = vpop.f32.mrb[191].mxu0  ;;  %v4462_v22 = vpop.f32.mrb[191].mxu1  ;;  %v6661_v49 = vmax.f32 %v6659_v0, %v6660_v2  ;;  %v6675_v0 = vld [vmem:[#allocation28_spill] sm:$0xff] }
 0x265   :  { %3178 = vst.msk [vmem:[%s6449_s3 + $0x6c] sm:$0xf] %vm3150_vm4, %v3777_v56  ;;  %v2787_v41 = vadd.f32 %v5860_v15, %v2715_v57  ;;  %v2716_v42 = vmax.f32 %v2027_v38, %v2540_v16  ;;  %v6662_v57 = vld [vmem:[#allocation19_spill] sm:$0xff] }
 0x266   :  { %v6664_v17 = vmax.f32 %v6662_v57, %v6663_v52 }
 0x267   :  { %v2852_v63 = vmax.f32 %v2787_v41, 0.0  ;;  %v2788_v30 = vadd.f32 %v5860_v15, %v2716_v42 }
 0x268   :  { %v1856_v5 = vpop.f32.mrb[192].mxu0  ;;  %v2545_v25 = vpop.f32.mrb[192].mxu1 }
 0x269   :  { %v3778_v26 = vpack.c.bf16 %v2852_v63, %v2852_v63  ;;  %v2853_v7 = vmax.f32 %v2788_v30, 0.0  ;;  %v2028_v36 = vmax.f32 %v6652_v35, %v1856_v5  ;;  %v4323_v45 = vpop.f32.mrb[193].mxu0  ;;  %v4465_v34 = vpop.f32.mrb[193].mxu1  ;;  %v6665_v30 = vld [vmem:[#allocation21_spill] sm:$0xff]  ;;  %v6666_v5 = vld [vmem:[#allocation22_spill] sm:$0xff] }
 0x26a   :  { %v1859_v55 = vpop.f32.mrb[194].mxu0  ;;  %v2548_v40 = vpop.f32.mrb[194].mxu1 }
 0x26b   :  { %3179 = vst.msk [vmem:[%s6449_s3 + $0x70] sm:$0xf] %vm3150_vm4, %v3778_v26  ;;  %v3779_v23 = vpack.c.bf16 %v2853_v7, %v2853_v7  ;;  %v2717_v4 = vmax.f32 %v2028_v36, %v2545_v25  ;;  %v2029_v32 = vmax.f32 %v6655_v20, %v1859_v55  ;;  %v4324_v33 = vpop.f32.mrb[195].mxu0  ;;  %v4466_v61 = vpop.f32.mrb[195].mxu1  ;;  %v6667_v25 = vmax.f32 %v6665_v30, %v6666_v5  ;;  %v6681_v30 = vld [vmem:[#allocation32_spill] sm:$0xff] }
 0x26d   :  { %3180 = vst.msk [vmem:[%s6449_s3 + $0x74] sm:$0xf] %vm3150_vm4, %v3779_v23  ;;  %v2789_v3 = vadd.f32 %v5860_v15, %v2717_v4  ;;  %v2718_v53 = vmax.f32 %v2029_v32, %v2548_v40  ;;  %v6668_v4 = vld [vmem:[#allocation23_spill] sm:$0xff] }
 0x26e   :  { %v6670_v58 = vmax.f32 %v6668_v4, %v6669_v46 }
 0x26f   :  { %v2854_v54 = vmax.f32 %v2789_v3, 0.0  ;;  %v2790_v62 = vadd.f32 %v5860_v15, %v2718_v53 }
 0x270   :  { %v1864_v21 = vpop.f32.mrb[196].mxu0  ;;  %v2553_v43 = vpop.f32.mrb[196].mxu1 }
 0x271   :  { %v3780_v47 = vpack.c.bf16 %v2854_v54, %v2854_v54  ;;  %v2855_v9 = vmax.f32 %v2790_v62, 0.0  ;;  %v2030_v39 = vmax.f32 %v6658_v24, %v1864_v21  ;;  %v4327_v10 = vpop.f32.mrb[197].mxu0  ;;  %v4469_v28 = vpop.f32.mrb[197].mxu1  ;;  %v6671_v62 = vld [vmem:[#allocation25_spill] sm:$0xff]  ;;  %v6672_v21 = vld [vmem:[#allocation26_spill] sm:$0xff] }
 0x272   :  { %v1867_v29 = vpop.f32.mrb[198].mxu0  ;;  %v2556_v59 = vpop.f32.mrb[198].mxu1 }
 0x273   :  { %3181 = vst.msk [vmem:[%s6449_s3 + $0x78] sm:$0xf] %vm3150_vm4, %v3780_v47  ;;  %v3781_v60 = vpack.c.bf16 %v2855_v9, %v2855_v9  ;;  %v2719_v11 = vmax.f32 %v2030_v39, %v2553_v43  ;;  %v2031_v48 = vmax.f32 %v6661_v49, %v1867_v29  ;;  %v4328_v31 = vpop.f32.mrb[199].mxu0  ;;  %v4470_v50 = vpop.f32.mrb[199].mxu1  ;;  %v6673_v43 = vmax.f32 %v6671_v62, %v6672_v21  ;;  %v6687_v62 = vld [vmem:[#allocation36_spill] sm:$0xff] }
 0x275   :  { %3182 = vst.msk [vmem:[%s6449_s3 + $0x7c] sm:$0xf] %vm3150_vm4, %v3781_v60  ;;  %v2791_v27 = vadd.f32 %v5860_v15, %v2719_v11  ;;  %v2720_v51 = vmax.f32 %v2031_v48, %v2556_v59  ;;  %v6674_v11 = vld [vmem:[#allocation27_spill] sm:$0xff] }
 0x276   :  { %v6676_v2 = vmax.f32 %v6674_v11, %v6675_v0 }
 0x277   :  { %v2856_v19 = vmax.f32 %v2791_v27, 0.0  ;;  %v2792_v13 = vadd.f32 %v5860_v15, %v2720_v51 }
 0x278   :  { %v1872_v14 = vpop.f32.mrb[200].mxu0  ;;  %v2561_v6 = vpop.f32.mrb[200].mxu1 }
 0x279   :  { %v3782_v16 = vpack.c.bf16 %v2856_v19, %v2856_v19  ;;  %v2857_v56 = vmax.f32 %v2792_v13, 0.0  ;;  %v2032_v37 = vmax.f32 %v6664_v17, %v1872_v14  ;;  %v4331_v38 = vpop.f32.mrb[201].mxu0  ;;  %v4473_v18 = vpop.f32.mrb[201].mxu1  ;;  %v6677_v13 = vld [vmem:[#allocation29_spill] sm:$0xff]  ;;  %v6678_v14 = vld [vmem:[#allocation30_spill] sm:$0xff] }
 0x27a   :  { %v1875_v22 = vpop.f32.mrb[202].mxu0  ;;  %v2564_v41 = vpop.f32.mrb[202].mxu1 }
 0x27b   :  { %3183 = vst.msk [vmem:[%s6449_s3 + $0x80] sm:$0xf] %vm3150_vm4, %v3782_v16  ;;  %v3783_v42 = vpack.c.bf16 %v2857_v56, %v2857_v56  ;;  %v2721_v63 = vmax.f32 %v2032_v37, %v2561_v6  ;;  %v2033_v26 = vmax.f32 %v6667_v25, %v1875_v22  ;;  %v4332_v7 = vpop.f32.mrb[203].mxu0  ;;  %v4474_v8 = vpop.f32.mrb[203].mxu1  ;;  %v6679_v6 = vmax.f32 %v6677_v13, %v6678_v14  ;;  %v6693_v13 = vld [vmem:[#allocation40_spill] sm:$0xff] }
 0x27d   :  { %3184 = vst.msk [vmem:[%s6449_s3 + $0x84] sm:$0xf] %vm3150_vm4, %v3783_v42  ;;  %v2793_v44 = vadd.f32 %v5860_v15, %v2721_v63  ;;  %v2722_v35 = vmax.f32 %v2033_v26, %v2564_v41  ;;  %v6680_v63 = vld [vmem:[#allocation31_spill] sm:$0xff] }
 0x27e   :  { %v6682_v5 = vmax.f32 %v6680_v63, %v6681_v30 }
 0x27f   :  { %v2858_v36 = vmax.f32 %v2793_v44, 0.0  ;;  %v2794_v45 = vadd.f32 %v5860_v15, %v2722_v35 }
 0x280   :  { %v1880_v34 = vpop.f32.mrb[204].mxu0  ;;  %v2569_v55 = vpop.f32.mrb[204].mxu1 }
 0x281   :  { %v3784_v40 = vpack.c.bf16 %v2858_v36, %v2858_v36  ;;  %v2859_v23 = vmax.f32 %v2794_v45, 0.0  ;;  %v2034_v20 = vmax.f32 %v6670_v58, %v1880_v34  ;;  %v4335_v32 = vpop.f32.mrb[205].mxu0  ;;  %v4477_v33 = vpop.f32.mrb[205].mxu1  ;;  %v6683_v45 = vld [vmem:[#allocation33_spill] sm:$0xff]  ;;  %v6684_v34 = vld [vmem:[#allocation34_spill] sm:$0xff] }
 0x282   :  { %v1883_v61 = vpop.f32.mrb[206].mxu0  ;;  %v2572_v3 = vpop.f32.mrb[206].mxu1 }
 0x283   :  { %3185 = vst.msk [vmem:[%s6449_s3 + $0x88] sm:$0xf] %vm3150_vm4, %v3784_v40  ;;  %v3785_v53 = vpack.c.bf16 %v2859_v23, %v2859_v23  ;;  %v2723_v54 = vmax.f32 %v2034_v20, %v2569_v55  ;;  %v2035_v47 = vmax.f32 %v6673_v43, %v1883_v61  ;;  %v4336_v9 = vpop.f32.mrb[207].mxu0  ;;  %v4478_v12 = vpop.f32.mrb[207].mxu1  ;;  %v6685_v55 = vmax.f32 %v6683_v45, %v6684_v34  ;;  %v6699_v45 = vld [vmem:[#allocation44_spill] sm:$0xff] }
 0x285   :  { %3186 = vst.msk [vmem:[%s6449_s3 + $0x8c] sm:$0xf] %vm3150_vm4, %v3785_v53  ;;  %v2795_v1 = vadd.f32 %v5860_v15, %v2723_v54  ;;  %v2724_v24 = vmax.f32 %v2035_v47, %v2572_v3  ;;  %v6686_v54 = vld [vmem:[#allocation35_spill] sm:$0xff] }
 0x286   :  { %v6688_v21 = vmax.f32 %v6686_v54, %v6687_v62 }
 0x287   :  { %v2860_v39 = vmax.f32 %v2795_v1, 0.0  ;;  %v2796_v10 = vadd.f32 %v5860_v15, %v2724_v24 }
 0x288   :  { %v1888_v28 = vpop.f32.mrb[208].mxu0  ;;  %v2577_v29 = vpop.f32.mrb[208].mxu1 }
 0x289   :  { %v3786_v59 = vpack.c.bf16 %v2860_v39, %v2860_v39  ;;  %v2861_v60 = vmax.f32 %v2796_v10, 0.0  ;;  %v2036_v49 = vmax.f32 %v6676_v2, %v1888_v28  ;;  %v4339_v48 = vpop.f32.mrb[209].mxu0  ;;  %v4481_v31 = vpop.f32.mrb[209].mxu1  ;;  %v6689_v10 = vld [vmem:[#allocation37_spill] sm:$0xff]  ;;  %v6690_v28 = vld [vmem:[#allocation38_spill] sm:$0xff] }
 0x28a   :  { %v1891_v50 = vpop.f32.mrb[210].mxu0  ;;  %v2580_v27 = vpop.f32.mrb[210].mxu1 }
 0x28b   :  { %3187 = vst.msk [vmem:[%s6449_s3 + $0x90] sm:$0xf] %vm3150_vm4, %v3786_v59  ;;  %v3787_v51 = vpack.c.bf16 %v2861_v60, %v2861_v60  ;;  %v2725_v19 = vmax.f32 %v2036_v49, %v2577_v29  ;;  %v2037_v16 = vmax.f32 %v6679_v6, %v1891_v50  ;;  %v4340_v56 = vpop.f32.mrb[211].mxu0  ;;  %v4482_v57 = vpop.f32.mrb[211].mxu1  ;;  %v6691_v29 = vmax.f32 %v6689_v10, %v6690_v28  ;;  %v6705_v10 = vld [vmem:[#allocation48_spill] sm:$0xff] }
 0x28d   :  { %3188 = vst.msk [vmem:[%s6449_s3 + $0x94] sm:$0xf] %vm3150_vm4, %v3787_v51  ;;  %v2797_v52 = vadd.f32 %v5860_v15, %v2725_v19  ;;  %v2726_v17 = vmax.f32 %v2037_v16, %v2580_v27  ;;  %v6692_v19 = vld [vmem:[#allocation39_spill] sm:$0xff] }
 0x28e   :  { %v6694_v14 = vmax.f32 %v6692_v19, %v6693_v13  ;;  %v6314_v19 = vld [vmem:[%s6448_s2] ss:$0 sm:$0xff] }
 0x28f   :  { %v2862_v37 = vmax.f32 %v2797_v52, 0.0  ;;  %v2798_v38 = vadd.f32 %v5860_v15, %v2726_v17 }
 0x290   :  { %v1896_v18 = vpop.f32.mrb[212].mxu0  ;;  %v2585_v22 = vpop.f32.mrb[212].mxu1 }
 0x291   :  { %v3788_v41 = vpack.c.bf16 %v2862_v37, %v2862_v37  ;;  %v2863_v42 = vmax.f32 %v2798_v38, 0.0  ;;  %v2038_v25 = vmax.f32 %v6682_v5, %v1896_v18  ;;  %v4343_v26 = vpop.f32.mrb[213].mxu0  ;;  %v4485_v7 = vpop.f32.mrb[213].mxu1  ;;  %v6695_v38 = vld [vmem:[#allocation41_spill] sm:$0xff]  ;;  %v6696_v18 = vld [vmem:[#allocation42_spill] sm:$0xff] }
 0x292   :  { %v1899_v8 = vpop.f32.mrb[214].mxu0  ;;  %v2588_v44 = vpop.f32.mrb[214].mxu1 }
 0x293   :  { %3189 = vst.msk [vmem:[%s6449_s3 + $0x98] sm:$0xf] %vm3150_vm4, %v3788_v41  ;;  %v3789_v35 = vpack.c.bf16 %v2863_v42, %v2863_v42  ;;  %v2727_v36 = vmax.f32 %v2038_v25, %v2585_v22  ;;  %v2039_v40 = vmax.f32 %v6685_v55, %v1899_v8  ;;  %v4344_v23 = vpop.f32.mrb[215].mxu0  ;;  %v4486_v4 = vpop.f32.mrb[215].mxu1  ;;  %v6697_v22 = vmax.f32 %v6695_v38, %v6696_v18  ;;  %v6711_v38 = vld [vmem:[#allocation52_spill] sm:$0xff] }
 0x295   :  { %3190 = vst.msk [vmem:[%s6449_s3 + $0x9c] sm:$0xf] %vm3150_vm4, %v3789_v35  ;;  %v2799_v46 = vadd.f32 %v5860_v15, %v2727_v36  ;;  %v2728_v58 = vmax.f32 %v2039_v40, %v2588_v44  ;;  %v6698_v36 = vld [vmem:[#allocation43_spill] sm:$0xff] }
 0x296   :  { %v6700_v34 = vmax.f32 %v6698_v36, %v6699_v45 }
 0x297   :  { %v2864_v20 = vmax.f32 %v2799_v46, 0.0  ;;  %v2800_v32 = vadd.f32 %v5860_v15, %v2728_v58 }
 0x298   :  { %v1904_v33 = vpop.f32.mrb[216].mxu0  ;;  %v2593_v61 = vpop.f32.mrb[216].mxu1 }
 0x299   :  { %v3790_v3 = vpack.c.bf16 %v2864_v20, %v2864_v20  ;;  %v2865_v53 = vmax.f32 %v2800_v32, 0.0  ;;  %v2040_v43 = vmax.f32 %v6688_v21, %v1904_v33  ;;  %v4347_v47 = vpop.f32.mrb[217].mxu0  ;;  %v4489_v9 = vpop.f32.mrb[217].mxu1  ;;  %v6701_v32 = vld [vmem:[#allocation45_spill] sm:$0xff]  ;;  %v6702_v33 = vld [vmem:[#allocation46_spill] sm:$0xff] }
 0x29a   :  { %v1907_v12 = vpop.f32.mrb[218].mxu0  ;;  %v2596_v1 = vpop.f32.mrb[218].mxu1 }
 0x29b   :  { %3191 = vst.msk [vmem:[%s6449_s3 + $0xa0] sm:$0xf] %vm3150_vm4, %v3790_v3  ;;  %v3791_v24 = vpack.c.bf16 %v2865_v53, %v2865_v53  ;;  %v2729_v39 = vmax.f32 %v2040_v43, %v2593_v61  ;;  %v2041_v59 = vmax.f32 %v6691_v29, %v1907_v12  ;;  %v4348_v60 = vpop.f32.mrb[219].mxu0  ;;  %v4490_v11 = vpop.f32.mrb[219].mxu1  ;;  %v6703_v61 = vmax.f32 %v6701_v32, %v6702_v33  ;;  %v6717_v32 = vld [vmem:[#allocation56_spill] sm:$0xff] }
 0x29d   :  { %3192 = vst.msk [vmem:[%s6449_s3 + $0xa4] sm:$0xf] %vm3150_vm4, %v3791_v24  ;;  %v2801_v0 = vadd.f32 %v5860_v15, %v2729_v39  ;;  %v2730_v2 = vmax.f32 %v2041_v59, %v2596_v1  ;;  %v6704_v39 = vld [vmem:[#allocation47_spill] sm:$0xff] }
 0x29e   :  { %v6706_v28 = vmax.f32 %v6704_v39, %v6705_v10 }
 0x29f   :  { %v2866_v49 = vmax.f32 %v2801_v0, 0.0  ;;  %v2802_v48 = vadd.f32 %v5860_v15, %v2730_v2 }
 0x2a0   :  { %v1912_v31 = vpop.f32.mrb[220].mxu0  ;;  %v2601_v50 = vpop.f32.mrb[220].mxu1 }
 0x2a1   :  { %v3792_v27 = vpack.c.bf16 %v2866_v49, %v2866_v49  ;;  %v2867_v51 = vmax.f32 %v2802_v48, 0.0  ;;  %v2042_v6 = vmax.f32 %v6694_v14, %v1912_v31  ;;  %v4351_v16 = vpop.f32.mrb[221].mxu0  ;;  %v4493_v56 = vpop.f32.mrb[221].mxu1  ;;  %v6708_v48 = vld [vmem:[#allocation50_spill] sm:$0xff] }
 0x2a2   :  { %v1915_v57 = vpop.f32.mrb[222].mxu0  ;;  %v2604_v52 = vpop.f32.mrb[222].mxu1 }
 0x2a3   :  { %3193 = vst.msk [vmem:[%s6449_s3 + $0xa8] sm:$0xf] %vm3150_vm4, %v3792_v27  ;;  %v3793_v17 = vpack.c.bf16 %v2867_v51, %v2867_v51  ;;  %v2731_v37 = vmax.f32 %v2042_v6, %v2601_v50  ;;  %v2043_v41 = vmax.f32 %v6697_v22, %v1915_v57  ;;  %v4352_v42 = vpop.f32.mrb[223].mxu0  ;;  %v4494_v63 = vpop.f32.mrb[223].mxu1 }
 0x2a5   :  { %3194 = vst.msk [vmem:[%s6449_s3 + $0xac] sm:$0xf] %vm3150_vm4, %v3793_v17  ;;  %v2803_v30 = vadd.f32 %v5860_v15, %v2731_v37  ;;  %v2732_v5 = vmax.f32 %v2043_v41, %v2604_v52  ;;  %v6710_v37 = vld [vmem:[#allocation51_spill] sm:$0xff] }
 0x2a6   :  { %v6712_v18 = vmax.f32 %v6710_v37, %v6711_v38 }
 0x2a7   :  { %v2868_v25 = vmax.f32 %v2803_v30, 0.0  ;;  %v2804_v26 = vadd.f32 %v5860_v15, %v2732_v5 }
 0x2a8   :  { %v1920_v7 = vpop.f32.mrb[224].mxu0  ;;  %v2609_v8 = vpop.f32.mrb[224].mxu1 }
 0x2a9   :  { %v3794_v44 = vpack.c.bf16 %v2868_v25, %v2868_v25  ;;  %v2869_v35 = vmax.f32 %v2804_v26, 0.0  ;;  %v2044_v55 = vmax.f32 %v6700_v34, %v1920_v7  ;;  %v4355_v40 = vpop.f32.mrb[225].mxu0  ;;  %v4497_v23 = vpop.f32.mrb[225].mxu1  ;;  %v6713_v26 = vld [vmem:[#allocation53_spill] sm:$0xff]  ;;  %v6714_v7 = vld [vmem:[#allocation54_spill] sm:$0xff] }
 0x2aa   :  { %v1923_v4 = vpop.f32.mrb[226].mxu0  ;;  %v2612_v46 = vpop.f32.mrb[226].mxu1 }
 0x2ab   :  { %3195 = vst.msk [vmem:[%s6449_s3 + $0xb0] sm:$0xf] %vm3150_vm4, %v3794_v44  ;;  %v3795_v58 = vpack.c.bf16 %v2869_v35, %v2869_v35  ;;  %v2733_v20 = vmax.f32 %v2044_v55, %v2609_v8  ;;  %v2045_v3 = vmax.f32 %v6703_v61, %v1923_v4  ;;  %v4356_v53 = vpop.f32.mrb[227].mxu0  ;;  %v4498_v54 = vpop.f32.mrb[227].mxu1  ;;  %v6715_v8 = vmax.f32 %v6713_v26, %v6714_v7  ;;  %v6729_v26 = vld [vmem:[#allocation64_spill] sm:$0xff] }
 0x2ad   :  { %3196 = vst.msk [vmem:[%s6449_s3 + $0xb4] sm:$0xf] %vm3150_vm4, %v3795_v58  ;;  %v2805_v62 = vadd.f32 %v5860_v15, %v2733_v20  ;;  %v2734_v21 = vmax.f32 %v2045_v3, %v2612_v46  ;;  %v6716_v20 = vld [vmem:[#allocation55_spill] sm:$0xff] }
 0x2ae   :  { %v6718_v33 = vmax.f32 %v6716_v20, %v6717_v32 }
 0x2af   :  { %v2870_v43 = vmax.f32 %v2805_v62, 0.0  ;;  %v2806_v47 = vadd.f32 %v5860_v15, %v2734_v21  ;;  %v6707_v15 = vld [vmem:[#allocation49_spill] sm:$0xff] }
 0x2b0   :  { %v1928_v9 = vpop.f32.mrb[228].mxu0  ;;  %v2617_v12 = vpop.f32.mrb[228].mxu1  ;;  %v6709_v31 = vmax.f32 %v6707_v15, %v6708_v48  ;;  %v6723_v15 = vld [vmem:[#allocation60_spill] sm:$0xff] }
 0x2b1   :  { %v3796_v1 = vpack.c.bf16 %v2870_v43, %v2870_v43  ;;  %v2871_v24 = vmax.f32 %v2806_v47, 0.0  ;;  %v2046_v29 = vmax.f32 %v6706_v28, %v1928_v9  ;;  %v4359_v59 = vpop.f32.mrb[229].mxu0  ;;  %v4501_v60 = vpop.f32.mrb[229].mxu1  ;;  %v6719_v47 = vld [vmem:[#allocation57_spill] sm:$0xff]  ;;  %v6720_v9 = vld [vmem:[#allocation58_spill] sm:$0xff] }
 0x2b2   :  { %v1931_v11 = vpop.f32.mrb[230].mxu0  ;;  %v2620_v0 = vpop.f32.mrb[230].mxu1 }
 0x2b3   :  { %3197 = vst.msk [vmem:[%s6449_s3 + $0xb8] sm:$0xf] %vm3150_vm4, %v3796_v1  ;;  %v3797_v2 = vpack.c.bf16 %v2871_v24, %v2871_v24  ;;  %v2735_v49 = vmax.f32 %v2046_v29, %v2617_v12  ;;  %v2047_v50 = vmax.f32 %v6709_v31, %v1931_v11  ;;  %v4360_v27 = vpop.f32.mrb[231].mxu0  ;;  %v4502_v51 = vpop.f32.mrb[231].mxu1  ;;  %v6721_v12 = vmax.f32 %v6719_v47, %v6720_v9  ;;  %v6735_v47 = vld [vmem:[#allocation68_spill] sm:$0xff] }
 0x2b5   :  { %3198 = vst.msk [vmem:[%s6449_s3 + $0xbc] sm:$0xf] %vm3150_vm4, %v3797_v2  ;;  %v2807_v13 = vadd.f32 %v6314_v19, %v2735_v49  ;;  %v2736_v14 = vmax.f32 %v2047_v50, %v2620_v0  ;;  %v6722_v49 = vld [vmem:[#allocation59_spill] sm:$0xff] }
 0x2b6   :  { %v6724_v48 = vmax.f32 %v6722_v49, %v6723_v15 }
 0x2b7   :  { %v2872_v6 = vmax.f32 %v2807_v13, 0.0  ;;  %v2808_v16 = vadd.f32 %v6314_v19, %v2736_v14 }
 0x2b8   :  { %v1936_v56 = vpop.f32.mrb[232].mxu0  ;;  %v2625_v57 = vpop.f32.mrb[232].mxu1 }
 0x2b9   :  { %v3798_v52 = vpack.c.bf16 %v2872_v6, %v2872_v6  ;;  %v2873_v17 = vmax.f32 %v2808_v16, 0.0  ;;  %v2048_v22 = vmax.f32 %v6712_v18, %v1936_v56  ;;  %v4363_v41 = vpop.f32.mrb[233].mxu0  ;;  %v4505_v42 = vpop.f32.mrb[233].mxu1  ;;  %v6725_v16 = vld [vmem:[#allocation61_spill] sm:$0xff]  ;;  %v6726_v56 = vld [vmem:[#allocation62_spill] sm:$0xff] }
 0x2ba   :  { %v1939_v63 = vpop.f32.mrb[234].mxu0  ;;  %v2628_v30 = vpop.f32.mrb[234].mxu1 }
 0x2bb   :  { %3199 = vst.msk [vmem:[%s6449_s3 + $0xc0] sm:$0xf] %vm3150_vm4, %v3798_v52  ;;  %v3799_v5 = vpack.c.bf16 %v2873_v17, %v2873_v17  ;;  %v2737_v25 = vmax.f32 %v2048_v22, %v2625_v57  ;;  %v2049_v44 = vmax.f32 %v6715_v8, %v1939_v63  ;;  %v4364_v35 = vpop.f32.mrb[235].mxu0  ;;  %v4506_v36 = vpop.f32.mrb[235].mxu1  ;;  %v6727_v57 = vmax.f32 %v6725_v16, %v6726_v56  ;;  %v6741_v16 = vld [vmem:[#allocation72_spill] sm:$0xff] }
 0x2bd   :  { %3200 = vst.msk [vmem:[%s6449_s3 + $0xc4] sm:$0xf] %vm3150_vm4, %v3799_v5  ;;  %v2809_v45 = vadd.f32 %v6314_v19, %v2737_v25  ;;  %v2738_v34 = vmax.f32 %v2049_v44, %v2628_v30  ;;  %v6728_v25 = vld [vmem:[#allocation63_spill] sm:$0xff] }
 0x2be   :  { %v6730_v7 = vmax.f32 %v6728_v25, %v6729_v26 }
 0x2bf   :  { %v2874_v55 = vmax.f32 %v2809_v45, 0.0  ;;  %v2810_v40 = vadd.f32 %v6314_v19, %v2738_v34 }
 0x2c0   :  { %v1944_v23 = vpop.f32.mrb[236].mxu0  ;;  %v2633_v4 = vpop.f32.mrb[236].mxu1 }
 0x2c1   :  { %v3800_v46 = vpack.c.bf16 %v2874_v55, %v2874_v55  ;;  %v2875_v58 = vmax.f32 %v2810_v40, 0.0  ;;  %v2050_v61 = vmax.f32 %v6718_v33, %v1944_v23  ;;  %v4367_v3 = vpop.f32.mrb[237].mxu0  ;;  %v4509_v53 = vpop.f32.mrb[237].mxu1  ;;  %v6731_v40 = vld [vmem:[#allocation65_spill] sm:$0xff]  ;;  %v6732_v23 = vld [vmem:[#allocation66_spill] sm:$0xff] }
 0x2c2   :  { %v1947_v54 = vpop.f32.mrb[238].mxu0  ;;  %v2636_v62 = vpop.f32.mrb[238].mxu1 }
 0x2c3   :  { %3201 = vst.msk [vmem:[%s6449_s3 + $0xc8] sm:$0xf] %vm3150_vm4, %v3800_v46  ;;  %v3801_v21 = vpack.c.bf16 %v2875_v58, %v2875_v58  ;;  %v2739_v43 = vmax.f32 %v2050_v61, %v2633_v4  ;;  %v2051_v1 = vmax.f32 %v6721_v12, %v1947_v54  ;;  %v4368_v24 = vpop.f32.mrb[239].mxu0  ;;  %v4510_v39 = vpop.f32.mrb[239].mxu1  ;;  %v6733_v4 = vmax.f32 %v6731_v40, %v6732_v23  ;;  %v6747_v40 = vld [vmem:[#allocation76_spill] sm:$0xff] }
 0x2c5   :  { %3202 = vst.msk [vmem:[%s6449_s3 + $0xcc] sm:$0xf] %vm3150_vm4, %v3801_v21  ;;  %v2811_v10 = vadd.f32 %v6314_v19, %v2739_v43  ;;  %v2740_v28 = vmax.f32 %v2051_v1, %v2636_v62  ;;  %v6734_v43 = vld [vmem:[#allocation67_spill] sm:$0xff] }
 0x2c6   :  { %v6736_v9 = vmax.f32 %v6734_v43, %v6735_v47 }
 0x2c7   :  { %v2876_v29 = vmax.f32 %v2811_v10, 0.0  ;;  %v2812_v59 = vadd.f32 %v6314_v19, %v2740_v28 }
 0x2c8   :  { %v1952_v60 = vpop.f32.mrb[240].mxu0  ;;  %v2641_v11 = vpop.f32.mrb[240].mxu1 }
 0x2c9   :  { %v3802_v0 = vpack.c.bf16 %v2876_v29, %v2876_v29  ;;  %v2877_v2 = vmax.f32 %v2812_v59, 0.0  ;;  %v2052_v31 = vmax.f32 %v6724_v48, %v1952_v60  ;;  %v4371_v50 = vpop.f32.mrb[241].mxu0  ;;  %v4513_v27 = vpop.f32.mrb[241].mxu1  ;;  %v6737_v59 = vld [vmem:[#allocation69_spill] sm:$0xff]  ;;  %v6738_v60 = vld [vmem:[#allocation70_spill] sm:$0xff] }
 0x2ca   :  { %v1955_v51 = vpop.f32.mrb[242].mxu0  ;;  %v2644_v13 = vpop.f32.mrb[242].mxu1 }
 0x2cb   :  { %3203 = vst.msk [vmem:[%s6449_s3 + $0xd0] sm:$0xf] %vm3150_vm4, %v3802_v0  ;;  %v3803_v14 = vpack.c.bf16 %v2877_v2, %v2877_v2  ;;  %v2741_v6 = vmax.f32 %v2052_v31, %v2641_v11  ;;  %v2053_v52 = vmax.f32 %v6727_v57, %v1955_v51  ;;  %v4372_v17 = vpop.f32.mrb[243].mxu0  ;;  %v4514_v37 = vpop.f32.mrb[243].mxu1  ;;  %v6739_v11 = vmax.f32 %v6737_v59, %v6738_v60  ;;  %v6753_v59 = vld [vmem:[#allocation80_spill] sm:$0xff] }
 0x2cd   :  { %3204 = vst.msk [vmem:[%s6449_s3 + $0xd4] sm:$0xf] %vm3150_vm4, %v3803_v14  ;;  %v2813_v38 = vadd.f32 %v6314_v19, %v2741_v6  ;;  %v2742_v18 = vmax.f32 %v2053_v52, %v2644_v13  ;;  %v6740_v6 = vld [vmem:[#allocation71_spill] sm:$0xff] }
 0x2ce   :  { %v6742_v56 = vmax.f32 %v6740_v6, %v6741_v16 }
 0x2cf   :  { %v2878_v22 = vmax.f32 %v2813_v38, 0.0  ;;  %v2814_v41 = vadd.f32 %v6314_v19, %v2742_v18 }
 0x2d0   :  { %v1960_v42 = vpop.f32.mrb[244].mxu0  ;;  %v2649_v63 = vpop.f32.mrb[244].mxu1 }
 0x2d1   :  { %v3804_v30 = vpack.c.bf16 %v2878_v22, %v2878_v22  ;;  %v2879_v5 = vmax.f32 %v2814_v41, 0.0  ;;  %v2054_v8 = vmax.f32 %v6730_v7, %v1960_v42  ;;  %v4375_v44 = vpop.f32.mrb[245].mxu0  ;;  %v4517_v35 = vpop.f32.mrb[245].mxu1  ;;  %v6743_v41 = vld [vmem:[#allocation73_spill] sm:$0xff]  ;;  %v6744_v42 = vld [vmem:[#allocation74_spill] sm:$0xff] }
 0x2d2   :  { %v1963_v36 = vpop.f32.mrb[246].mxu0  ;;  %v2652_v45 = vpop.f32.mrb[246].mxu1 }
 0x2d3   :  { %3205 = vst.msk [vmem:[%s6449_s3 + $0xd8] sm:$0xf] %vm3150_vm4, %v3804_v30  ;;  %v3805_v34 = vpack.c.bf16 %v2879_v5, %v2879_v5  ;;  %v2743_v55 = vmax.f32 %v2054_v8, %v2649_v63  ;;  %v2055_v46 = vmax.f32 %v6733_v4, %v1963_v36  ;;  %v4376_v58 = vpop.f32.mrb[247].mxu0  ;;  %v4518_v20 = vpop.f32.mrb[247].mxu1  ;;  %v6745_v63 = vmax.f32 %v6743_v41, %v6744_v42 }
 0x2d5   :  { %3206 = vst.msk [vmem:[%s6449_s3 + $0xdc] sm:$0xf] %vm3150_vm4, %v3805_v34  ;;  %v2815_v32 = vadd.f32 %v6314_v19, %v2743_v55  ;;  %v2744_v33 = vmax.f32 %v2055_v46, %v2652_v45  ;;  %v6746_v55 = vld [vmem:[#allocation75_spill] sm:$0xff] }
 0x2d6   :  { %v6748_v23 = vmax.f32 %v6746_v55, %v6747_v40 }
 0x2d7   :  { %v2880_v61 = vmax.f32 %v2815_v32, 0.0  ;;  %v2816_v3 = vadd.f32 %v6314_v19, %v2744_v33 }
 0x2d8   :  { %v1968_v53 = vpop.f32.mrb[248].mxu0  ;;  %v2657_v54 = vpop.f32.mrb[248].mxu1 }
 0x2d9   :  { %v3806_v62 = vpack.c.bf16 %v2880_v61, %v2880_v61  ;;  %v2881_v21 = vmax.f32 %v2816_v3, 0.0  ;;  %v2056_v12 = vmax.f32 %v6736_v9, %v1968_v53  ;;  %v4379_v1 = vpop.f32.mrb[249].mxu0  ;;  %v4521_v24 = vpop.f32.mrb[249].mxu1  ;;  %v6749_v3 = vld [vmem:[#allocation77_spill] sm:$0xff]  ;;  %v6750_v53 = vld [vmem:[#allocation78_spill] sm:$0xff] }
 0x2da   :  { %v1971_v39 = vpop.f32.mrb[250].mxu0  ;;  %v2660_v10 = vpop.f32.mrb[250].mxu1 }
 0x2db   :  { %3207 = vst.msk [vmem:[%s6449_s3 + $0xe0] sm:$0xf] %vm3150_vm4, %v3806_v62  ;;  %v3807_v28 = vpack.c.bf16 %v2881_v21, %v2881_v21  ;;  %v2745_v29 = vmax.f32 %v2056_v12, %v2657_v54  ;;  %v2057_v0 = vmax.f32 %v6739_v11, %v1971_v39  ;;  %v4380_v2 = vpop.f32.mrb[251].mxu0  ;;  %v4522_v49 = vpop.f32.mrb[251].mxu1  ;;  %v6751_v54 = vmax.f32 %v6749_v3, %v6750_v53 }
 0x2dd   :  { %3208 = vst.msk [vmem:[%s6449_s3 + $0xe4] sm:$0xf] %vm3150_vm4, %v3807_v28  ;;  %v2817_v15 = vadd.f32 %v6314_v19, %v2745_v29  ;;  %v2746_v48 = vmax.f32 %v2057_v0, %v2660_v10  ;;  %v6752_v29 = vld [vmem:[#allocation79_spill] sm:$0xff] }
 0x2de   :  { %v6754_v60 = vmax.f32 %v6752_v29, %v6753_v59 }
 0x2df   :  { %v2882_v31 = vmax.f32 %v2817_v15, 0.0  ;;  %v2818_v50 = vadd.f32 %v6314_v19, %v2746_v48 }
 0x2e0   :  { %v1976_v27 = vpop.f32.mrb[252].mxu0  ;;  %v2665_v51 = vpop.f32.mrb[252].mxu1 }
 0x2e1   :  { %v3808_v13 = vpack.c.bf16 %v2882_v31, %v2882_v31  ;;  %v2883_v14 = vmax.f32 %v2818_v50, 0.0  ;;  %v2058_v57 = vmax.f32 %v6742_v56, %v1976_v27  ;;  %v4383_v52 = vpop.f32.mrb[253].mxu0  ;;  %v4525_v17 = vpop.f32.mrb[253].mxu1 }
 0x2e2   :  { %v1979_v37 = vpop.f32.mrb[254].mxu0  ;;  %v2668_v38 = vpop.f32.mrb[254].mxu1 }
 0x2e3   :  { %3209 = vst.msk [vmem:[%s6449_s3 + $0xe8] sm:$0xf] %vm3150_vm4, %v3808_v13  ;;  %v3809_v18 = vpack.c.bf16 %v2883_v14, %v2883_v14  ;;  %v2747_v22 = vmax.f32 %v2058_v57, %v2665_v51  ;;  %v2059_v30 = vmax.f32 %v6745_v63, %v1979_v37  ;;  %v4384_v5 = vpop.f32.mrb[255].mxu0  ;;  %v4526_v25 = vpop.f32.mrb[255].mxu1 }
 0x2e5   :  { %3210 = vst.msk [vmem:[%s6449_s3 + $0xec] sm:$0xf] %vm3150_vm4, %v3809_v18  ;;  %v2819_v26 = vadd.f32 %v6314_v19, %v2747_v22  ;;  %v2748_v7 = vmax.f32 %v2059_v30, %v2668_v38 }
 0x2e7   :  { %v2884_v8 = vmax.f32 %v2819_v26, 0.0  ;;  %v2820_v44 = vadd.f32 %v6314_v19, %v2748_v7 }
 0x2e8   :  { %v1984_v35 = vpop.f32.mrb[0].mxu0  ;;  %v2673_v36 = vpop.f32.mrb[0].mxu1 }
 0x2e9   :  { %v3810_v45 = vpack.c.bf16 %v2884_v8, %v2884_v8  ;;  %v2885_v34 = vmax.f32 %v2820_v44, 0.0  ;;  %v2060_v4 = vmax.f32 %v6748_v23, %v1984_v35  ;;  %v4387_v46 = vpop.f32.mrb[1].mxu0  ;;  %v4529_v58 = vpop.f32.mrb[1].mxu1 }
 0x2ea   :  { %v1987_v20 = vpop.f32.mrb[2].mxu0  ;;  %v2676_v32 = vpop.f32.mrb[2].mxu1 }
 0x2eb   :  { %3211 = vst.msk [vmem:[%s6449_s3 + $0xf0] sm:$0xf] %vm3150_vm4, %v3810_v45  ;;  %v3811_v33 = vpack.c.bf16 %v2885_v34, %v2885_v34  ;;  %v2749_v61 = vmax.f32 %v2060_v4, %v2673_v36  ;;  %v2061_v62 = vmax.f32 %v6751_v54, %v1987_v20  ;;  %v4388_v21 = vpop.f32.mrb[3].mxu0  ;;  %v4530_v43 = vpop.f32.mrb[3].mxu1 }
 0x2ed   :  { %3212 = vst.msk [vmem:[%s6449_s3 + $0xf4] sm:$0xf] %vm3150_vm4, %v3811_v33  ;;  %v2821_v47 = vadd.f32 %v6314_v19, %v2749_v61  ;;  %v2750_v9 = vmax.f32 %v2061_v62, %v2676_v32 }
 0x2ef   :  { %v2886_v12 = vmax.f32 %v2821_v47, 0.0  ;;  %v2822_v1 = vadd.f32 %v6314_v19, %v2750_v9 }
 0x2f0   :  { %v1992_v24 = vpop.f32.mrb[4].mxu0  ;;  %v2681_v39 = vpop.f32.mrb[4].mxu1 }
 0x2f1   :  { %v3812_v10 = vpack.c.bf16 %v2886_v12, %v2886_v12  ;;  %v2887_v28 = vmax.f32 %v2822_v1, 0.0  ;;  %v2062_v11 = vmax.f32 %v6754_v60, %v1992_v24  ;;  %v4391_v0 = vpop.f32.mrb[5].mxu0  ;;  %v4533_v2 = vpop.f32.mrb[5].mxu1 }
 0x2f2   :  { %v1995_v49 = vpop.f32.mrb[6].mxu0  ;;  %v2684_v15 = vpop.f32.mrb[6].mxu1 }
 0x2f3   :  { %3213 = vst.msk [vmem:[%s6449_s3 + $0xf8] sm:$0xf] %vm3150_vm4, %v3812_v10  ;;  %v3813_v48 = vpack.c.bf16 %v2887_v28, %v2887_v28  ;;  %v2751_v31 = vmax.f32 %v2062_v11, %v2681_v39  ;;  %v4392_v50 = vpop.f32.mrb[7].mxu0  ;;  %v4534_v27 = vpop.f32.mrb[7].mxu1 }
 0x2f5   :  { %3214 = vst.msk [vmem:[%s6449_s3 + $0xfc] sm:$0xf] %vm3150_vm4, %v3813_v48  ;;  %v2823_v51 = vadd.f32 %v6314_v19, %v2751_v31 }
 0x2f7   :  { %v2888_v13 = vmax.f32 %v2823_v51, 0.0 }
 0x2f9   :  { %v3814_v14 = vpack.c.bf16 %v2888_v13, %v2888_v13 }
 0x2fb   :  { %3215 = vst.msk [vmem:[%s6449_s3 + $0x100] sm:$0xf] %vm3150_vm4, %v3814_v14 }

// kernel: convnn_forward.4
= control target key start
LH: loop header
LB: loop body
LE: loop exit
PB: predicated region body
PF: predicated region fallthrough
CT: control target
= control target key end

     0   :  { %v1107_v0 = vmov 0   ;;  %vm153_vm0 = vcmask 130048   ;;  %vm866_vm1 = vcmask 257024   ;;  %s1571_s1 = inlined_call_operand.vmem [shape: bf16[144,32], index: 1, kind: input, shape index: {}]   ;;  %s1572_s0 = inlined_call_operand.vmem [shape: bf16[4,96,144], index: 0, kind: input, shape index: {}]   ;;  %s1573_s2 = inlined_call_operand.vmem [shape: f32[1,32], index: 2, kind: input, shape index: {}]   ;;  %s1574_s3 = inlined_call_operand.vmem [shape: bf16[96,32], index: 3, kind: output, shape index: {}]  }
   0x1   :  { %172 = vmatprep.subr.bf16.mxu0 %v1107_v0  ;;  %338 = vmatprep.subr.bf16.mxu1 %v1107_v0  ;;  %v1026_v1 = vld [vmem:[%s1571_s1] sm:$0xff]   ;;  %v1027_v2 = vld [vmem:[%s1571_s1 + $0x8] sm:$0xff]   ;;  %v1141_v3 = vld [vmem:[%s1571_s1 + $0x10] sm:$0xff]  }
   0x2   :  { %173 = vmatpush1.bf16.msra.mxu0 %v1026_v1  ;;  %339 = vmatpush1.bf16.msra.mxu1 %v1026_v1  ;;  %v1148_v4 = vld [vmem:[%s1571_s1 + $0x18] sm:$0xff]   ;;  %v1037_v5 = vld [vmem:[%s1572_s0 + $0x4] ss:$8 sps:$4 sm:$0xff]   ;;  %v1185_v9 = vld [vmem:[%s1571_s1 + $0x30] sm:$0xff]  }
   0x3   :  { %174 = vmatprep.subr.bf16.mxu0 %v1107_v0  ;;  %340 = vmatprep.subr.bf16.mxu1 %v1107_v0  ;;  %v1040_v6 = vld [vmem:[%s1572_s0 + $0x64] ss:$8 sps:$4 sm:$0xff]   ;;  %v1194_v10 = vld [vmem:[%s1571_s1 + $0x38] sm:$0xff]   ;;  %v1035_v12 = vld [vmem:[%s1572_s0] ss:$8 sps:$4 sm:$0xff]  }
   0x4   :  { %904 = vmatprep.mubr.msk.bf16.mxu0 %vm153_vm0, %v1037_v5  ;;  %934 = vmatprep.mubr.msk.bf16.mxu1 %vm153_vm0, %v1040_v6  ;;  %v1167_v7 = vld [vmem:[%s1571_s1 + $0x20] sm:$0xff]   ;;  %v1176_v8 = vld [vmem:[%s1571_s1 + $0x28] sm:$0xff]   ;;  %v1041_v14 = vld [vmem:[%s1572_s0 + $0x14] ss:$8 sps:$4 sm:$0xff]  }
   0x5   :  { %v1203_v11 = vld [vmem:[%s1571_s1 + $0x40] sm:$0xff]   ;;  %v1043_v15 = vld [vmem:[%s1572_s0 + $0x74] ss:$8 sps:$4 sm:$0xff]   ;;  %v1045_v16 = vld [vmem:[%s1572_s0 + $0x10] ss:$8 sps:$4 sm:$0xff]  }
   0x6   :  { %175 = vmatpush1.bf16.msra.mxu0 %v1027_v2  ;;  %341 = vmatpush1.bf16.msra.mxu1 %v1027_v2  ;;  %v1038_v13 = vld [vmem:[%s1572_s0 + $0x60] ss:$8 sps:$4 sm:$0xff]   ;;  %v1046_v17 = vld [vmem:[%s1572_s0 + $0x70] ss:$8 sps:$4 sm:$0xff]   ;;  %v1047_v18 = vld [vmem:[%s1572_s0 + $0x24] ss:$8 sps:$4 sm:$0xff]  }
   0x7   :  { %176 = vmatprep.subr.bf16.mxu0 %v1107_v0  ;;  %342 = vmatprep.subr.bf16.mxu1 %v1107_v0  ;;  %v1049_v19 = vld [vmem:[%s1572_s0 + $0x84] ss:$8 sps:$4 sm:$0xff]   ;;  %v1051_v20 = vld [vmem:[%s1572_s0 + $0x20] ss:$8 sps:$4 sm:$0xff]   ;;  %v1053_v22 = vld [vmem:[%s1572_s0 + $0x34] ss:$8 sps:$4 sm:$0xff]  }
   0x8   :  { %v1052_v21 = vld [vmem:[%s1572_s0 + $0x80] ss:$8 sps:$4 sm:$0xff]   ;;  %v1055_v23 = vld [vmem:[%s1572_s0 + $0x94] ss:$8 sps:$4 sm:$0xff]   ;;  %v1057_v24 = vld [vmem:[%s1572_s0 + $0x30] ss:$8 sps:$4 sm:$0xff]  }
   0x9   :  { %v1058_v25 = vld [vmem:[%s1572_s0 + $0x90] ss:$8 sps:$4 sm:$0xff]   ;;  %v1059_v26 = vld [vmem:[%s1572_s0 + $0x44] ss:$8 sps:$4 sm:$0xff]   ;;  %v1063_v28 = vld [vmem:[%s1572_s0 + $0x40] ss:$8 sps:$4 sm:$0xff]  }
   0xa   :  { %177 = vmatpush1.bf16.msra.mxu0 %v1141_v3  ;;  %343 = vmatpush1.bf16.msra.mxu1 %v1141_v3  ;;  %v1061_v27 = vld [vmem:[%s1572_s0 + $0xa4] ss:$8 sps:$4 sm:$0xff]   ;;  %v1064_v29 = vld [vmem:[%s1572_s0 + $0xa0] ss:$8 sps:$4 sm:$0xff]   ;;  %v1065_v30 = vld [vmem:[%s1572_s0 + $0x54] ss:$8 sps:$4 sm:$0xff]  }
   0xb   :  { %178 = vmatprep.subr.bf16.mxu0 %v1107_v0  ;;  %344 = vmatprep.subr.bf16.mxu1 %v1107_v0  ;;  %v1067_v31 = vld [vmem:[%s1572_s0 + $0xb4] ss:$8 sps:$4 sm:$0xff]   ;;  %v1069_v32 = vld [vmem:[%s1572_s0 + $0x50] ss:$8 sps:$4 sm:$0xff]   ;;  %v1073_v34 = vld [vmem:[%s1572_s0 + $0xc4] ss:$8 sps:$4 sm:$0xff]  }
   0xc   :  { %v1070_v33 = vld [vmem:[%s1572_s0 + $0xb0] ss:$8 sps:$4 sm:$0xff]   ;;  %v1076_v35 = vld [vmem:[%s1572_s0 + $0x124] ss:$8 sps:$4 sm:$0xff]   ;;  %v1071_v36 = vld [vmem:[%s1572_s0 + $0xc0] ss:$8 sps:$4 sm:$0xff]  }
   0xd   :  { %v1074_v37 = vld [vmem:[%s1572_s0 + $0x120] ss:$8 sps:$4 sm:$0xff]   ;;  %v1077_v38 = vld [vmem:[%s1572_s0 + $0xd4] ss:$8 sps:$4 sm:$0xff]   ;;  %v1081_v40 = vld [vmem:[%s1572_s0 + $0xd0] ss:$8 sps:$4 sm:$0xff]  }
   0xe   :  { %179 = vmatpush1.bf16.msra.mxu0 %v1148_v4  ;;  %345 = vmatpush1.bf16.msra.mxu1 %v1148_v4  ;;  %v1079_v39 = vld [vmem:[%s1572_s0 + $0x134] ss:$8 sps:$4 sm:$0xff]   ;;  %v1082_v41 = vld [vmem:[%s1572_s0 + $0x130] ss:$8 sps:$4 sm:$0xff]   ;;  %v1083_v42 = vld [vmem:[%s1572_s0 + $0xe4] ss:$8 sps:$4 sm:$0xff]  }
   0xf   :  { %180 = vmatprep.subr.bf16.mxu0 %v1107_v0  ;;  %346 = vmatprep.subr.bf16.mxu1 %v1107_v0  ;;  %v1085_v43 = vld [vmem:[%s1572_s0 + $0x144] ss:$8 sps:$4 sm:$0xff]   ;;  %v1087_v44 = vld [vmem:[%s1572_s0 + $0xe0] ss:$8 sps:$4 sm:$0xff]   ;;  %v1089_v46 = vld [vmem:[%s1572_s0 + $0xf4] ss:$8 sps:$4 sm:$0xff]  }
  0x10   :  { %v1088_v45 = vld [vmem:[%s1572_s0 + $0x140] ss:$8 sps:$4 sm:$0xff]   ;;  %v1091_v47 = vld [vmem:[%s1572_s0 + $0x154] ss:$8 sps:$4 sm:$0xff]   ;;  %v1093_v48 = vld [vmem:[%s1572_s0 + $0xf0] ss:$8 sps:$4 sm:$0xff]  }
  0x11   :  { %v1094_v49 = vld [vmem:[%s1572_s0 + $0x150] ss:$8 sps:$4 sm:$0xff]   ;;  %v1095_v50 = vld [vmem:[%s1572_s0 + $0x104] ss:$8 sps:$4 sm:$0xff]   ;;  %v1099_v52 = vld [vmem:[%s1572_s0 + $0x100] ss:$8 sps:$4 sm:$0xff]  }
  0x12   :  { %181 = vmatpush1.bf16.msra.mxu0 %v1167_v7  ;;  %347 = vmatpush1.bf16.msra.mxu1 %v1167_v7  ;;  %v1097_v51 = vld [vmem:[%s1572_s0 + $0x164] ss:$8 sps:$4 sm:$0xff]   ;;  %v1100_v53 = vld [vmem:[%s1572_s0 + $0x160] ss:$8 sps:$4 sm:$0xff]   ;;  %v1101_v54 = vld [vmem:[%s1572_s0 + $0x114] ss:$8 sps:$4 sm:$0xff]  }
  0x13   :  { %182 = vmatprep.subr.bf16.mxu0 %v1107_v0  ;;  %348 = vmatprep.subr.bf16.mxu1 %v1107_v0  ;;  %v1103_v55 = vld [vmem:[%s1572_s0 + $0x174] ss:$8 sps:$4 sm:$0xff]   ;;  %v1105_v56 = vld [vmem:[%s1572_s0 + $0x110] ss:$8 sps:$4 sm:$0xff]  }
  0x14   :  { %v1106_v57 = vld [vmem:[%s1572_s0 + $0x170] ss:$8 sps:$4 sm:$0xff]  }
  0x16   :  { %183 = vmatpush1.bf16.msra.mxu0 %v1176_v8  ;;  %349 = vmatpush1.bf16.msra.mxu1 %v1176_v8 }
  0x17   :  { %184 = vmatprep.subr.bf16.mxu0 %v1107_v0  ;;  %350 = vmatprep.subr.bf16.mxu1 %v1107_v0 }
  0x1a   :  { %185 = vmatpush1.bf16.msra.mxu0 %v1185_v9  ;;  %351 = vmatpush1.bf16.msra.mxu1 %v1185_v9 }
  0x1b   :  { %186 = vmatprep.subr.bf16.mxu0 %v1107_v0  ;;  %352 = vmatprep.subr.bf16.mxu1 %v1107_v0 }
  0x1e   :  { %187 = vmatpush1.bf16.msra.mxu0 %v1194_v10  ;;  %353 = vmatpush1.bf16.msra.mxu1 %v1194_v10 }
  0x1f   :  { %188 = vmatprep.subr.bf16.mxu0 %v1107_v0  ;;  %354 = vmatprep.subr.bf16.mxu1 %v1107_v0 }
  0x22   :  { %189 = vmatpush1.bf16.msra.mxu0 %v1203_v11  ;;  %355 = vmatpush1.bf16.msra.mxu1 %v1203_v11 }
  0x23   :  { %516 = vmatprep.subr.bf16.mxu0 %v1107_v0  ;;  %694 = vmatprep.subr.bf16.mxu1 %v1107_v0 }
  0x25   :  { %205 = vmatmul.mubr.bf16.vlgmr.msra.gmra.mrb[0].mxu0 %v1035_v12  ;;  %371 = vmatmul.mubr.bf16.vlgmr.msra.gmra.mrb[0].mxu1 %v1038_v13 }
  0x26   :  { %517 = vmatpush1.bf16.msra.mxu0 %v1026_v1  ;;  %695 = vmatpush1.bf16.msra.mxu1 %v1026_v1 }
  0x27   :  { %518 = vmatprep.subr.bf16.mxu0 %v1107_v0  ;;  %905 = vmatprep.mubr.msk.bf16.mxu0 %vm153_vm0, %v1041_v14 }
  0x28   :  { %935 = vmatprep.mubr.msk.bf16.mxu1 %vm153_vm0, %v1043_v15  ;;  %696 = vmatprep.subr.bf16.mxu1 %v1107_v0 }
  0x2a   :  { %519 = vmatpush1.bf16.msra.mxu0 %v1027_v2  ;;  %697 = vmatpush1.bf16.msra.mxu1 %v1027_v2 }
  0x2b   :  { %520 = vmatprep.subr.bf16.mxu0 %v1107_v0  ;;  %698 = vmatprep.subr.bf16.mxu1 %v1107_v0 }
  0x2d   :  { %213 = vmatmul.mubr.bf16.gmra.mrb[4].mxu0 %v1045_v16  ;;  %379 = vmatmul.mubr.bf16.gmra.mrb[4].mxu1 %v1046_v17 }
  0x2e   :  { %521 = vmatpush1.bf16.msra.mxu0 %v1141_v3  ;;  %699 = vmatpush1.bf16.msra.mxu1 %v1141_v3 }
  0x2f   :  { %906 = vmatprep.mubr.msk.bf16.mxu0 %vm153_vm0, %v1047_v18  ;;  %936 = vmatprep.mubr.msk.bf16.mxu1 %vm153_vm0, %v1049_v19 }
  0x30   :  { %522 = vmatprep.subr.bf16.mxu0 %v1107_v0  ;;  %700 = vmatprep.subr.bf16.mxu1 %v1107_v0 }
  0x32   :  { %523 = vmatpush1.bf16.msra.mxu0 %v1148_v4  ;;  %701 = vmatpush1.bf16.msra.mxu1 %v1148_v4 }
  0x33   :  { %524 = vmatprep.subr.bf16.mxu0 %v1107_v0  ;;  %702 = vmatprep.subr.bf16.mxu1 %v1107_v0 }
  0x35   :  { %221 = vmatmul.mubr.bf16.gmra.mrb[8].mxu0 %v1051_v20  ;;  %387 = vmatmul.mubr.bf16.gmra.mrb[8].mxu1 %v1052_v21 }
  0x36   :  { %907 = vmatprep.mubr.msk.bf16.mxu0 %vm153_vm0, %v1053_v22  ;;  %937 = vmatprep.mubr.msk.bf16.mxu1 %vm153_vm0, %v1055_v23 }
  0x37   :  { %525 = vmatpush1.bf16.msra.mxu0 %v1167_v7  ;;  %703 = vmatpush1.bf16.msra.mxu1 %v1167_v7 }
  0x38   :  { %526 = vmatprep.subr.bf16.mxu0 %v1107_v0  ;;  %704 = vmatprep.subr.bf16.mxu1 %v1107_v0 }
  0x3b   :  { %527 = vmatpush1.bf16.msra.mxu0 %v1176_v8  ;;  %705 = vmatpush1.bf16.msra.mxu1 %v1176_v8 }
  0x3c   :  { %528 = vmatprep.subr.bf16.mxu0 %v1107_v0  ;;  %706 = vmatprep.subr.bf16.mxu1 %v1107_v0 }
  0x3d   :  { %229 = vmatmul.mubr.bf16.gmra.mrb[12].mxu0 %v1057_v24  ;;  %395 = vmatmul.mubr.bf16.gmra.mrb[12].mxu1 %v1058_v25 }
  0x3e   :  { %908 = vmatprep.mubr.msk.bf16.mxu0 %vm153_vm0, %v1059_v26  ;;  %938 = vmatprep.mubr.msk.bf16.mxu1 %vm153_vm0, %v1061_v27 }
  0x3f   :  { %529 = vmatpush1.bf16.msra.mxu0 %v1185_v9  ;;  %707 = vmatpush1.bf16.msra.mxu1 %v1185_v9 }
  0x40   :  { %530 = vmatprep.subr.bf16.mxu0 %v1107_v0  ;;  %708 = vmatprep.subr.bf16.mxu1 %v1107_v0 }
  0x43   :  { %531 = vmatpush1.bf16.msra.mxu0 %v1194_v10  ;;  %709 = vmatpush1.bf16.msra.mxu1 %v1194_v10 }
  0x44   :  { %532 = vmatprep.subr.bf16.mxu0 %v1107_v0  ;;  %710 = vmatprep.subr.bf16.mxu1 %v1107_v0 }
  0x45   :  { %237 = vmatmul.mubr.bf16.gmra.mrb[16].mxu0 %v1063_v28  ;;  %403 = vmatmul.mubr.bf16.gmra.mrb[16].mxu1 %v1064_v29 }
  0x46   :  { %909 = vmatprep.mubr.msk.bf16.mxu0 %vm153_vm0, %v1065_v30  ;;  %939 = vmatprep.mubr.msk.bf16.mxu1 %vm153_vm0, %v1067_v31 }
  0x47   :  { %533 = vmatpush1.bf16.msra.mxu0 %v1203_v11  ;;  %711 = vmatpush1.bf16.msra.mxu1 %v1203_v11 }
  0x4d   :  { %245 = vmatmul.mubr.bf16.gmra.mrb[20].mxu0 %v1069_v32  ;;  %411 = vmatmul.mubr.bf16.gmra.mrb[20].mxu1 %v1070_v33 }
  0x4e   :  { %964 = vmatprep.mubr.msk.bf16.mxu0 %vm153_vm0, %v1073_v34  ;;  %994 = vmatprep.mubr.msk.bf16.mxu1 %vm153_vm0, %v1076_v35 }
  0x55   :  { %549 = vmatmul.mubr.bf16.vlgmr.msra.gmra.mrb[24].mxu0 %v1071_v36  ;;  %727 = vmatmul.mubr.bf16.vlgmr.msra.gmra.mrb[24].mxu1 %v1074_v37 }
  0x56   :  { %965 = vmatprep.mubr.msk.bf16.mxu0 %vm153_vm0, %v1077_v38  ;;  %995 = vmatprep.mubr.msk.bf16.mxu1 %vm153_vm0, %v1079_v39 }
  0x5d   :  { %557 = vmatmul.mubr.bf16.gmra.mrb[28].mxu0 %v1081_v40  ;;  %735 = vmatmul.mubr.bf16.gmra.mrb[28].mxu1 %v1082_v41 }
  0x5e   :  { %966 = vmatprep.mubr.msk.bf16.mxu0 %vm153_vm0, %v1083_v42  ;;  %996 = vmatprep.mubr.msk.bf16.mxu1 %vm153_vm0, %v1085_v43 }
  0x65   :  { %565 = vmatmul.mubr.bf16.gmra.mrb[32].mxu0 %v1087_v44  ;;  %743 = vmatmul.mubr.bf16.gmra.mrb[32].mxu1 %v1088_v45 }
  0x66   :  { %967 = vmatprep.mubr.msk.bf16.mxu0 %vm153_vm0, %v1089_v46  ;;  %997 = vmatprep.mubr.msk.bf16.mxu1 %vm153_vm0, %v1091_v47 }
  0x6d   :  { %573 = vmatmul.mubr.bf16.gmra.mrb[36].mxu0 %v1093_v48  ;;  %751 = vmatmul.mubr.bf16.gmra.mrb[36].mxu1 %v1094_v49 }
  0x6e   :  { %968 = vmatprep.mubr.msk.bf16.mxu0 %vm153_vm0, %v1095_v50  ;;  %998 = vmatprep.mubr.msk.bf16.mxu1 %vm153_vm0, %v1097_v51 }
  0x75   :  { %581 = vmatmul.mubr.bf16.gmra.mrb[40].mxu0 %v1099_v52  ;;  %759 = vmatmul.mubr.bf16.gmra.mrb[40].mxu1 %v1100_v53 }
  0x76   :  { %969 = vmatprep.mubr.msk.bf16.mxu0 %vm153_vm0, %v1101_v54  ;;  %999 = vmatprep.mubr.msk.bf16.mxu1 %vm153_vm0, %v1103_v55 }
  0x7d   :  { %589 = vmatmul.mubr.bf16.gmra.mrb[44].mxu0 %v1105_v56  ;;  %767 = vmatmul.mubr.bf16.gmra.mrb[44].mxu1 %v1106_v57 }
  0xf8   :  { %v1401_v58 = vpop.f32.mrb[0].mxu0  ;;  %v1403_v59 = vpop.f32.mrb[0].mxu1 }
  0xf9   :  { %v419_v60 = vmax.f32 %v1401_v58, %v1403_v59  ;;  %v208_v61 = vpop.f32.mrb[1].mxu0  ;;  %v374_v62 = vpop.f32.mrb[1].mxu1  ;;  %v1476_v59 = vld [vmem:[%s1573_s2] ss:$0 sm:$0xff] }
  0xfa   :  { %v1407_v63 = vpop.f32.mrb[2].mxu0  ;;  %v1409_v0 = vpop.f32.mrb[2].mxu1 }
  0xfb   :  { %v420_v1 = vmax.f32 %v1407_v63, %v1409_v0  ;;  %v211_v2 = vpop.f32.mrb[3].mxu0  ;;  %v377_v3 = vpop.f32.mrb[3].mxu1 }
 0x100   :  { %v1413_v4 = vpop.f32.mrb[4].mxu0  ;;  %v1415_v5 = vpop.f32.mrb[4].mxu1 }
 0x101   :  { %v421_v6 = vmax.f32 %v1413_v4, %v1415_v5  ;;  %v216_v7 = vpop.f32.mrb[5].mxu0  ;;  %v382_v8 = vpop.f32.mrb[5].mxu1 }
 0x102   :  { %v1419_v9 = vpop.f32.mrb[6].mxu0  ;;  %v1421_v10 = vpop.f32.mrb[6].mxu1 }
 0x103   :  { %v422_v11 = vmax.f32 %v1419_v9, %v1421_v10  ;;  %v219_v12 = vpop.f32.mrb[7].mxu0  ;;  %v385_v13 = vpop.f32.mrb[7].mxu1 }
 0x108   :  { %v1425_v14 = vpop.f32.mrb[8].mxu0  ;;  %v1427_v15 = vpop.f32.mrb[8].mxu1 }
 0x109   :  { %v423_v16 = vmax.f32 %v1425_v14, %v1427_v15  ;;  %v224_v17 = vpop.f32.mrb[9].mxu0  ;;  %v390_v18 = vpop.f32.mrb[9].mxu1 }
 0x10a   :  { %v1431_v19 = vpop.f32.mrb[10].mxu0  ;;  %v1433_v20 = vpop.f32.mrb[10].mxu1 }
 0x10b   :  { %v424_v21 = vmax.f32 %v1431_v19, %v1433_v20  ;;  %v227_v22 = vpop.f32.mrb[11].mxu0  ;;  %v393_v23 = vpop.f32.mrb[11].mxu1 }
 0x110   :  { %v1437_v24 = vpop.f32.mrb[12].mxu0  ;;  %v1439_v25 = vpop.f32.mrb[12].mxu1 }
 0x111   :  { %v425_v26 = vmax.f32 %v1437_v24, %v1439_v25  ;;  %v232_v27 = vpop.f32.mrb[13].mxu0  ;;  %v398_v28 = vpop.f32.mrb[13].mxu1 }
 0x112   :  { %v1443_v29 = vpop.f32.mrb[14].mxu0  ;;  %v1445_v30 = vpop.f32.mrb[14].mxu1 }
 0x113   :  { %v426_v31 = vmax.f32 %v1443_v29, %v1445_v30  ;;  %v235_v32 = vpop.f32.mrb[15].mxu0  ;;  %v401_v33 = vpop.f32.mrb[15].mxu1 }
 0x118   :  { %v1449_v34 = vpop.f32.mrb[16].mxu0  ;;  %v1451_v35 = vpop.f32.mrb[16].mxu1 }
 0x119   :  { %v427_v36 = vmax.f32 %v1449_v34, %v1451_v35  ;;  %v240_v37 = vpop.f32.mrb[17].mxu0  ;;  %v406_v38 = vpop.f32.mrb[17].mxu1 }
 0x11a   :  { %v1455_v39 = vpop.f32.mrb[18].mxu0  ;;  %v1457_v40 = vpop.f32.mrb[18].mxu1 }
 0x11b   :  { %v428_v41 = vmax.f32 %v1455_v39, %v1457_v40  ;;  %v243_v42 = vpop.f32.mrb[19].mxu0  ;;  %v409_v43 = vpop.f32.mrb[19].mxu1 }
 0x120   :  { %v1461_v44 = vpop.f32.mrb[20].mxu0  ;;  %v1463_v45 = vpop.f32.mrb[20].mxu1 }
 0x121   :  { %v429_v46 = vmax.f32 %v1461_v44, %v1463_v45  ;;  %v248_v47 = vpop.f32.mrb[21].mxu0  ;;  %v414_v48 = vpop.f32.mrb[21].mxu1 }
 0x122   :  { %v1467_v49 = vpop.f32.mrb[22].mxu0  ;;  %v1469_v50 = vpop.f32.mrb[22].mxu1 }
 0x123   :  { %v430_v51 = vmax.f32 %v1467_v49, %v1469_v50  ;;  %v251_v52 = vpop.f32.mrb[23].mxu0  ;;  %v417_v53 = vpop.f32.mrb[23].mxu1 }
 0x128   :  { %v550_v54 = vpop.f32.mrb[24].mxu0  ;;  %v728_v55 = vpop.f32.mrb[24].mxu1 }
 0x129   :  { %v597_v56 = vmax.f32 %v419_v60, %v550_v54  ;;  %v552_v57 = vpop.f32.mrb[25].mxu0  ;;  %v730_v58 = vpop.f32.mrb[25].mxu1 }
 0x12a   :  { %v553_v61 = vpop.f32.mrb[26].mxu0  ;;  %v731_v62 = vpop.f32.mrb[26].mxu1 }
 0x12b   :  { %v775_v2 = vmax.f32 %v597_v56, %v728_v55  ;;  %v598_v3 = vmax.f32 %v420_v1, %v553_v61  ;;  %v555_v7 = vpop.f32.mrb[27].mxu0  ;;  %v733_v8 = vpop.f32.mrb[27].mxu1 }
 0x12d   :  { %v794_v12 = vadd.f32 %v1476_v59, %v775_v2  ;;  %v776_v13 = vmax.f32 %v598_v3, %v731_v62 }
 0x12f   :  { %v806_v60 = vmax.f32 %v794_v12, 0.0  ;;  %v795_v17 = vadd.f32 %v1476_v59, %v776_v13 }
 0x130   :  { %v558_v18 = vpop.f32.mrb[28].mxu0  ;;  %v736_v22 = vpop.f32.mrb[28].mxu1 }
 0x131   :  { %v1013_v23 = vpack.c.bf16 %v806_v60, %v806_v60  ;;  %v807_v27 = vmax.f32 %v795_v17, 0.0  ;;  %v599_v28 = vmax.f32 %v421_v6, %v558_v18  ;;  %v560_v32 = vpop.f32.mrb[29].mxu0  ;;  %v738_v63 = vpop.f32.mrb[29].mxu1 }
 0x132   :  { %v561_v0 = vpop.f32.mrb[30].mxu0  ;;  %v739_v1 = vpop.f32.mrb[30].mxu1 }
 0x133   :  { %867 = vst.msk [vmem:[%s1574_s3] sm:$0xf] %vm866_vm1, %v1013_v23  ;;  %v1014_v33 = vpack.c.bf16 %v807_v27, %v807_v27  ;;  %v777_v37 = vmax.f32 %v599_v28, %v736_v22  ;;  %v600_v38 = vmax.f32 %v422_v11, %v561_v0  ;;  %v563_v42 = vpop.f32.mrb[31].mxu0  ;;  %v741_v43 = vpop.f32.mrb[31].mxu1 }
 0x135   :  { %868 = vst.msk [vmem:[%s1574_s3 + $0x4] sm:$0xf] %vm866_vm1, %v1014_v33  ;;  %v796_v4 = vadd.f32 %v1476_v59, %v777_v37  ;;  %v778_v5 = vmax.f32 %v600_v38, %v739_v1 }
 0x137   :  { %v808_v6 = vmax.f32 %v796_v4, 0.0  ;;  %v797_v47 = vadd.f32 %v1476_v59, %v778_v5 }
 0x138   :  { %v566_v48 = vpop.f32.mrb[32].mxu0  ;;  %v744_v52 = vpop.f32.mrb[32].mxu1 }
 0x139   :  { %v1015_v53 = vpack.c.bf16 %v808_v6, %v808_v6  ;;  %v809_v54 = vmax.f32 %v797_v47, 0.0  ;;  %v601_v9 = vmax.f32 %v423_v16, %v566_v48  ;;  %v568_v10 = vpop.f32.mrb[33].mxu0  ;;  %v746_v11 = vpop.f32.mrb[33].mxu1 }
 0x13a   :  { %v569_v55 = vpop.f32.mrb[34].mxu0  ;;  %v747_v56 = vpop.f32.mrb[34].mxu1 }
 0x13b   :  { %869 = vst.msk [vmem:[%s1574_s3 + $0x8] sm:$0xf] %vm866_vm1, %v1015_v53  ;;  %v1016_v57 = vpack.c.bf16 %v809_v54, %v809_v54  ;;  %v779_v58 = vmax.f32 %v601_v9, %v744_v52  ;;  %v602_v61 = vmax.f32 %v424_v21, %v569_v55  ;;  %v571_v62 = vpop.f32.mrb[35].mxu0  ;;  %v749_v2 = vpop.f32.mrb[35].mxu1 }
 0x13d   :  { %870 = vst.msk [vmem:[%s1574_s3 + $0xc] sm:$0xf] %vm866_vm1, %v1016_v57  ;;  %v798_v14 = vadd.f32 %v1476_v59, %v779_v58  ;;  %v780_v15 = vmax.f32 %v602_v61, %v747_v56 }
 0x13f   :  { %v810_v16 = vmax.f32 %v798_v14, 0.0  ;;  %v799_v3 = vadd.f32 %v1476_v59, %v780_v15 }
 0x140   :  { %v574_v7 = vpop.f32.mrb[36].mxu0  ;;  %v752_v8 = vpop.f32.mrb[36].mxu1 }
 0x141   :  { %v1017_v12 = vpack.c.bf16 %v810_v16, %v810_v16  ;;  %v811_v13 = vmax.f32 %v799_v3, 0.0  ;;  %v603_v19 = vmax.f32 %v425_v26, %v574_v7  ;;  %v576_v20 = vpop.f32.mrb[37].mxu0  ;;  %v754_v21 = vpop.f32.mrb[37].mxu1 }
 0x142   :  { %v577_v60 = vpop.f32.mrb[38].mxu0  ;;  %v755_v17 = vpop.f32.mrb[38].mxu1 }
 0x143   :  { %871 = vst.msk [vmem:[%s1574_s3 + $0x10] sm:$0xf] %vm866_vm1, %v1017_v12  ;;  %v1018_v18 = vpack.c.bf16 %v811_v13, %v811_v13  ;;  %v781_v22 = vmax.f32 %v603_v19, %v752_v8  ;;  %v604_v23 = vmax.f32 %v426_v31, %v577_v60  ;;  %v579_v27 = vpop.f32.mrb[39].mxu0  ;;  %v757_v28 = vpop.f32.mrb[39].mxu1 }
 0x145   :  { %872 = vst.msk [vmem:[%s1574_s3 + $0x14] sm:$0xf] %vm866_vm1, %v1018_v18  ;;  %v800_v24 = vadd.f32 %v1476_v59, %v781_v22  ;;  %v782_v25 = vmax.f32 %v604_v23, %v755_v17 }
 0x147   :  { %v812_v26 = vmax.f32 %v800_v24, 0.0  ;;  %v801_v32 = vadd.f32 %v1476_v59, %v782_v25 }
 0x148   :  { %v582_v63 = vpop.f32.mrb[40].mxu0  ;;  %v760_v0 = vpop.f32.mrb[40].mxu1 }
 0x149   :  { %v1019_v1 = vpack.c.bf16 %v812_v26, %v812_v26  ;;  %v813_v33 = vmax.f32 %v801_v32, 0.0  ;;  %v605_v29 = vmax.f32 %v427_v36, %v582_v63  ;;  %v584_v30 = vpop.f32.mrb[41].mxu0  ;;  %v762_v31 = vpop.f32.mrb[41].mxu1 }
 0x14a   :  { %v585_v37 = vpop.f32.mrb[42].mxu0  ;;  %v763_v38 = vpop.f32.mrb[42].mxu1 }
 0x14b   :  { %873 = vst.msk [vmem:[%s1574_s3 + $0x18] sm:$0xf] %vm866_vm1, %v1019_v1  ;;  %v1020_v42 = vpack.c.bf16 %v813_v33, %v813_v33  ;;  %v783_v43 = vmax.f32 %v605_v29, %v760_v0  ;;  %v606_v4 = vmax.f32 %v428_v41, %v585_v37  ;;  %v587_v5 = vpop.f32.mrb[43].mxu0  ;;  %v765_v6 = vpop.f32.mrb[43].mxu1 }
 0x14d   :  { %874 = vst.msk [vmem:[%s1574_s3 + $0x1c] sm:$0xf] %vm866_vm1, %v1020_v42  ;;  %v802_v34 = vadd.f32 %v1476_v59, %v783_v43  ;;  %v784_v35 = vmax.f32 %v606_v4, %v763_v38 }
 0x14f   :  { %v814_v36 = vmax.f32 %v802_v34, 0.0  ;;  %v803_v47 = vadd.f32 %v1476_v59, %v784_v35 }
 0x150   :  { %v590_v48 = vpop.f32.mrb[44].mxu0  ;;  %v768_v52 = vpop.f32.mrb[44].mxu1 }
 0x151   :  { %v1021_v53 = vpack.c.bf16 %v814_v36, %v814_v36  ;;  %v815_v54 = vmax.f32 %v803_v47, 0.0  ;;  %v607_v39 = vmax.f32 %v429_v46, %v590_v48  ;;  %v592_v40 = vpop.f32.mrb[45].mxu0  ;;  %v770_v41 = vpop.f32.mrb[45].mxu1 }
 0x152   :  { %v593_v9 = vpop.f32.mrb[46].mxu0  ;;  %v771_v10 = vpop.f32.mrb[46].mxu1 }
 0x153   :  { %875 = vst.msk [vmem:[%s1574_s3 + $0x20] sm:$0xf] %vm866_vm1, %v1021_v53  ;;  %v1022_v11 = vpack.c.bf16 %v815_v54, %v815_v54  ;;  %v785_v55 = vmax.f32 %v607_v39, %v768_v52  ;;  %v608_v56 = vmax.f32 %v430_v51, %v593_v9  ;;  %v595_v57 = vpop.f32.mrb[47].mxu0  ;;  %v773_v58 = vpop.f32.mrb[47].mxu1 }
 0x155   :  { %876 = vst.msk [vmem:[%s1574_s3 + $0x24] sm:$0xf] %vm866_vm1, %v1022_v11  ;;  %v804_v44 = vadd.f32 %v1476_v59, %v785_v55  ;;  %v786_v45 = vmax.f32 %v608_v56, %v771_v10 }
 0x157   :  { %v816_v46 = vmax.f32 %v804_v44, 0.0  ;;  %v805_v61 = vadd.f32 %v1476_v59, %v786_v45 }
 0x159   :  { %v1023_v62 = vpack.c.bf16 %v816_v46, %v816_v46  ;;  %v817_v2 = vmax.f32 %v805_v61, 0.0 }
 0x15b   :  { %877 = vst.msk [vmem:[%s1574_s3 + $0x28] sm:$0xf] %vm866_vm1, %v1023_v62  ;;  %v1024_v49 = vpack.c.bf16 %v817_v2, %v817_v2 }
 0x15d   :  { %878 = vst.msk [vmem:[%s1574_s3 + $0x2c] sm:$0xf] %vm866_vm1, %v1024_v49 }

// kernel: convnn_forward.5
= control target key start
LH: loop header
LB: loop body
LE: loop exit
PB: predicated region body
PF: predicated region fallthrough
CT: control target
= control target key end

     0   :  { %v77_v9 = vlaneseq  ;;  %v3998_v13 = vmov 1966171168   ;;  %v3999_v32 = vmov 0.0   ;;  %vm4000_vm0 = vmmov 0   ;;  %s5083_s0 = inlined_call_operand.vmem [shape: bf16[20,2,288], index: 0, kind: input, shape index: {}]   ;;  %s5084_s1 = inlined_call_operand.vmem [shape: bf16[288,64], index: 1, kind: input, shape index: {}]   ;;  %s5085_s2 = inlined_call_operand.vmem [shape: f32[1,64], index: 2, kind: input, shape index: {}]   ;;  %s5086_s3 = inlined_call_operand.vmem [shape: bf16[5,64,128], index: 3, kind: input, shape index: {}]   ;;  %s5087_s4 = inlined_call_operand.vmem [shape: f32[1,128], index: 4, kind: input, shape index: {}]   ;;  %s5088_s5 = inlined_call_operand.vmem [shape: f32[128,2], index: 5, kind: input, shape index: {}]   ;;  %s5089_s6 = inlined_call_operand.vmem [shape: f32[1,2], index: 6, kind: input, shape index: {}]   ;;  %s5090_s7 = inlined_call_operand.hbm [shape: f32[2,2], index: 7, kind: output, shape index: {}]  }
   0x1   :  { %v4046_v0 = vld [vmem:[%s5084_s1 + $0x40] sm:$0xff]   ;;  %v4057_v2 = vld [vmem:[%s5084_s1 + $0x48] sm:$0xff]   ;;  %v4071_v4 = vld [vmem:[%s5084_s1 + $0x50] sm:$0xff]   ;;  %v75_v14 = vunpack.c.l.s4 %v3998_v13 }
   0x2   :  { %v4051_v1 = vld [vmem:[%s5084_s1] sm:$0xff]   ;;  %3083 = vmatprep.subr.bf16.mxu0 %v4046_v0  ;;  %3108 = vmatprep.subr.bf16.mxu1 %v4046_v0  ;;  %v4064_v3 = vld [vmem:[%s5084_s1 + $0x8] sm:$0xff]   ;;  %v4078_v5 = vld [vmem:[%s5084_s1 + $0x10] sm:$0xff]   ;;  %v78_v15 = vshrl.u32 %v77_v9, 7 }
   0x3   :  { %3084 = vmatpush3.bf16.msra.mxu0 %v4051_v1  ;;  %3109 = vmatpush3.bf16.msra.mxu1 %v4051_v1  ;;  %v4085_v6 = vld [vmem:[%s5084_s1 + $0x58] sm:$0xff]   ;;  %v4099_v8 = vld [vmem:[%s5084_s1 + $0x60] sm:$0xff]   ;;  %v4111_v11 = vld [vmem:[%s5084_s1 + $0x68] sm:$0xff]   ;;  %v76_v18 = vunpack.c.0.s8 %v75_v14 }
   0x4   :  { %3085 = vmatprep.subr.bf16.mxu0 %v4057_v2  ;;  %3110 = vmatprep.subr.bf16.mxu1 %v4057_v2  ;;  %v4092_v7 = vld [vmem:[%s5084_s1 + $0x18] sm:$0xff]   ;;  %v4105_v10 = vld [vmem:[%s5084_s1 + $0x20] sm:$0xff]   ;;  %v4122_v16 = vld [vmem:[%s5084_s1 + $0x28] sm:$0xff]  }
   0x5   :  { %v2946_v12 = vld.sshfl [vmem:[%s5083_s0] sm:$0x13 pattern:$0x75316420]  ;;  %v4133_v20 = vld [vmem:[%s5084_s1 + $0x70] sm:$0xff]   ;;  %v4136_v22 = vsub.s32 %v76_v18, %v78_v15  ;;  %v4151_v26 = vld [vmem:[%s5084_s1 + $0x78] sm:$0xff]  }
   0x6   :  { %v73_v17 = vcombine.high %v2946_v12, %v2946_v12  ;;  %v2967_v19 = vld.sshfl [vmem:[%s5083_s0 + $0xf] sm:$0x13 pattern:$0x75316420]  ;;  %v4157_v27 = vld [vmem:[%s5084_s1 + $0x38] sm:$0xff]   ;;  %v4167_v29 = vld [vmem:[%s5084_s1 + $0x80] sm:$0xff]  }
   0x7   :  { %3086 = vmatpush3.bf16.msra.mxu0 %v4064_v3  ;;  %3111 = vmatpush3.bf16.msra.mxu1 %v4064_v3  ;;  %v293_v21 = vcombine.high %v2967_v19, %v2967_v19  ;;  %v4142_v23 = vld [vmem:[%s5084_s1 + $0x30] sm:$0xff]   ;;  %v80_v28 = vrot.slane %v2946_v12, %v4136_v22  ;;  %v300_v30 = vrot.slane %v2967_v19, %v4136_v22  ;;  %v2970_v31 = vld.sshfl [vmem:[%s5083_s0 + $0x1e] sm:$0x13 pattern:$0x75316420]  ;;  %v4183_v34 = vld [vmem:[%s5084_s1 + $0x88] sm:$0xff]  }
   0x8   :  { %3087 = vmatprep.subr.bf16.mxu0 %v4071_v4  ;;  %3112 = vmatprep.subr.bf16.mxu1 %v4071_v4  ;;  %v87_v24 = vrot.slane %v73_v17, %v4136_v22  ;;  %v2973_v33 = vld.sshfl [vmem:[%s5083_s0 + $0x2d] sm:$0x13 pattern:$0x75316420]  ;;  %v4191_v35 = vrot.slane %v2970_v31, %v4136_v22 }
   0x9   :  { %v307_v25 = vrot.slane %v293_v21, %v4136_v22  ;;  %v517_v36 = vcombine.high %v2973_v33, %v2973_v33 }
   0xa   :  { %235 = vmatprep.mubr.bf16.mxu0 %v87_v24 }
   0xb   :  { %3088 = vmatpush3.bf16.msra.mxu0 %v4078_v5  ;;  %3113 = vmatpush3.bf16.msra.mxu1 %v4078_v5 }
   0xc   :  { %3089 = vmatprep.subr.bf16.mxu0 %v4085_v6  ;;  %3114 = vmatprep.subr.bf16.mxu1 %v4085_v6 }
   0xd   :  { %346 = vmatprep.mubr.bf16.mxu1 %v307_v25 }
   0xf   :  { %3090 = vmatpush3.bf16.msra.mxu0 %v4092_v7  ;;  %3115 = vmatpush3.bf16.msra.mxu1 %v4092_v7 }
  0x10   :  { %3091 = vmatprep.subr.bf16.mxu0 %v4099_v8  ;;  %3116 = vmatprep.subr.bf16.mxu1 %v4099_v8 }
  0x13   :  { %3092 = vmatpush3.bf16.msra.mxu0 %v4105_v10  ;;  %3117 = vmatpush3.bf16.msra.mxu1 %v4105_v10 }
  0x14   :  { %3093 = vmatprep.subr.bf16.mxu0 %v4111_v11  ;;  %3118 = vmatprep.subr.bf16.mxu1 %v4111_v11 }
  0x17   :  { %3094 = vmatpush3.bf16.msra.mxu0 %v4122_v16  ;;  %3119 = vmatpush3.bf16.msra.mxu1 %v4122_v16 }
  0x18   :  { %3095 = vmatprep.subr.bf16.mxu0 %v4133_v20  ;;  %3120 = vmatprep.subr.bf16.mxu1 %v4133_v20 }
  0x1b   :  { %3096 = vmatpush3.bf16.msra.mxu0 %v4142_v23  ;;  %3121 = vmatpush3.bf16.msra.mxu1 %v4142_v23 }
  0x1c   :  { %3097 = vmatprep.subr.bf16.mxu0 %v4151_v26  ;;  %3122 = vmatprep.subr.bf16.mxu1 %v4151_v26 }
  0x1f   :  { %3098 = vmatpush3.bf16.msra.mxu0 %v4157_v27  ;;  %3123 = vmatpush3.bf16.msra.mxu1 %v4157_v27 }
  0x20   :  { %3625 = vmatprep.subr.bf16.mxu0 %v3999_v32  ;;  %3641 = vmatprep.subr.bf16.mxu1 %v3999_v32 }
  0x22   :  { %236 = vmatmul.mubr.bf16.vlgmr.msra.gmra.mrb[0].mxu0 %v80_v28  ;;  %347 = vmatmul.mubr.bf16.vlgmr.msra.gmra.mrb[0].mxu1 %v300_v30 }
  0x23   :  { %3626 = vmatpush3.bf16.msra.mxu0 %v4167_v29  ;;  %3629 = vmatprep.mubr.msk.bf16.mxu0 %vm4000_vm0, %v3999_v32 }
  0x24   :  { %3627 = vmatprep.subr.bf16.mxu0 %v3999_v32  ;;  %3642 = vmatpush3.bf16.msra.mxu1 %v4167_v29 }
  0x25   :  { %3643 = vmatprep.subr.bf16.mxu1 %v3999_v32  ;;  %3645 = vmatprep.mubr.msk.bf16.mxu1 %vm4000_vm0, %v3999_v32 }
  0x26   :  { %12 = vsyncpa [#allocation3], 0  ;;  %v88_v37 = vcombine.high %v80_v28, %v80_v28  ;;  %vm199_vm1 = vcmask 261120   ;;  %v420_v38 = vcombine.high %v4191_v35, %v4191_v35  ;;  %v531_v39 = vrot.slane %v517_v36, %v4136_v22  ;;  %v3927_v12 = vld [vmem:[%s5086_s3] sm:$0xff]   ;;  %v3928_v13 = vld [vmem:[%s5086_s3 + $0x8] sm:$0xff]  }
  0x27   :  { %3628 = vmatpush3.bf16.msra.mxu0 %v4183_v34  ;;  %v405_v40 = vcombine.high %v2970_v31, %v2970_v31  ;;  %v308_v41 = vcombine.high %v300_v30, %v300_v30  ;;  %v524_v43 = vrot.slane %v2973_v33, %v4136_v22  ;;  %v2977_v44 = vld.sshfl [vmem:[%s5083_s0 + $0x3] sm:$0x13 pattern:$0x75316420]  ;;  %v3929_v14 = vld [vmem:[%s5086_s3 + $0x10] sm:$0xff]   ;;  %v3930_v15 = vld [vmem:[%s5086_s3 + $0x18] sm:$0xff]  }
  0x28   :  { %3633 = vmatprep.subr.bf16.mxu0 %v3999_v32  ;;  %3644 = vmatpush3.bf16.msra.mxu1 %v4183_v34  ;;  %v2980_v45 = vld.sshfl [vmem:[%s5083_s0 + $0x12] sm:$0x13 pattern:$0x75316420]  ;;  %v4251_v46 = vrot.slane %v2977_v44, %v4136_v22  ;;  %v647_v50 = vcombine.high %v2977_v44, %v2977_v44  ;;  %v3931_v24 = vld [vmem:[%s5086_s3 + $0x20] sm:$0xff]   ;;  %v3932_v36 = vld [vmem:[%s5086_s3 + $0x28] sm:$0xff]  }
  0x29   :  { %3158 = vmatprep.subr.bf16.mxu1 %v4046_v0  ;;  %v419_v42 = vrot.slane %v405_v40, %v4136_v22  ;;  %v758_v47 = vcombine.high %v2980_v45, %v2980_v45  ;;  %v532_v51 = vcombine.high %v524_v43, %v524_v43  ;;  %v765_v53 = vrot.slane %v2980_v45, %v4136_v22  ;;  %v2983_v54 = vld.sshfl [vmem:[%s5083_s0 + $0x21] sm:$0x13 pattern:$0x75316420]  ;;  %v3933_v40 = vld [vmem:[%s5086_s3 + $0x30] sm:$0xff]  }
  0x2a   :  { %3630 = vmatmul.mubr.msk.bf16.vlgmr.msra.gmra.mrb[4].mxu0 %vm199_vm1, %v88_v37  ;;  %v662_v48 = vcombine.high %v4251_v46, %v4251_v46  ;;  %v661_v52 = vrot.slane %v647_v50, %v4136_v22  ;;  %v2986_v55 = vld.sshfl [vmem:[%s5083_s0 + $0x30] sm:$0x13 pattern:$0x75316420]  ;;  %v877_v56 = vrot.slane %v2983_v54, %v4136_v22  ;;  %v870_v60 = vcombine.high %v2983_v54, %v2983_v54 }
  0x2b   :  { %3634 = vmatpush3.bf16.msra.mxu0 %v4167_v29  ;;  %3637 = vmatprep.mubr.msk.bf16.mxu0 %vm4000_vm0, %v3999_v32  ;;  %v772_v49 = vrot.slane %v758_v47, %v4136_v22  ;;  %v982_v57 = vcombine.high %v2986_v55, %v2986_v55  ;;  %v773_v61 = vcombine.high %v765_v53, %v765_v53  ;;  %v3934_v47 = vld [vmem:[%s5086_s3 + $0x38] sm:$0xff]   ;;  %vm1120_vm2 = vcmask 523264  }
  0x2c   :  { %3635 = vmatprep.subr.bf16.mxu0 %v3999_v32  ;;  %3646 = vmatmul.mubr.msk.bf16.vlgmr.msra.gmra.mrb[4].mxu1 %vm199_vm1, %v420_v38  ;;  %v885_v58 = vcombine.high %v877_v56, %v877_v56  ;;  %v884_v62 = vrot.slane %v870_v60, %v4136_v22  ;;  %v989_v63 = vrot.slane %v2986_v55, %v4136_v22  ;;  %vm2919_vm3 = vcmask 9216  }
  0x2d   :  { %3159 = vmatpush3.bf16.msra.mxu1 %v4051_v1  ;;  %570 = vmatprep.mubr.bf16.mxu1 %v531_v39  ;;  %v996_v59 = vrot.slane %v982_v57, %v4136_v22 }
  0x2e   :  { %3160 = vmatprep.subr.bf16.mxu1 %v4057_v2  ;;  %v997_v9 = vcombine.high %v989_v63, %v989_v63 }
  0x2f   :  { %3636 = vmatpush3.bf16.msra.mxu0 %v4183_v34 }
  0x30   :  { %3133 = vmatprep.subr.bf16.mxu0 %v4046_v0 }
  0x31   :  { %3161 = vmatpush3.bf16.msra.mxu1 %v4064_v3 }
  0x32   :  { %3638 = vmatmul.mubr.msk.bf16.vlgmr.msra.gmra.mrb[8].mxu0 %vm199_vm1, %v308_v41  ;;  %3162 = vmatprep.subr.bf16.mxu1 %v4071_v4 }
  0x33   :  { %3134 = vmatpush3.bf16.msra.mxu0 %v4051_v1  ;;  %458 = vmatprep.mubr.bf16.mxu0 %v419_v42 }
  0x34   :  { %3135 = vmatprep.subr.bf16.mxu0 %v4057_v2 }
  0x35   :  { %3163 = vmatpush3.bf16.msra.mxu1 %v4078_v5 }
  0x36   :  { %3164 = vmatprep.subr.bf16.mxu1 %v4085_v6 }
  0x37   :  { %3136 = vmatpush3.bf16.msra.mxu0 %v4064_v3 }
  0x38   :  { %3137 = vmatprep.subr.bf16.mxu0 %v4071_v4 }
  0x39   :  { %3165 = vmatpush3.bf16.msra.mxu1 %v4092_v7 }
  0x3a   :  { %3166 = vmatprep.subr.bf16.mxu1 %v4099_v8 }
  0x3b   :  { %3138 = vmatpush3.bf16.msra.mxu0 %v4078_v5 }
  0x3c   :  { %3139 = vmatprep.subr.bf16.mxu0 %v4085_v6 }
  0x3d   :  { %3167 = vmatpush3.bf16.msra.mxu1 %v4105_v10 }
  0x3e   :  { %3168 = vmatprep.subr.bf16.mxu1 %v4111_v11 }
  0x3f   :  { %3140 = vmatpush3.bf16.msra.mxu0 %v4092_v7 }
  0x40   :  { %3141 = vmatprep.subr.bf16.mxu0 %v4099_v8 }
  0x41   :  { %3169 = vmatpush3.bf16.msra.mxu1 %v4122_v16 }
  0x42   :  { %3170 = vmatprep.subr.bf16.mxu1 %v4133_v20 }
  0x43   :  { %3142 = vmatpush3.bf16.msra.mxu0 %v4105_v10 }
  0x44   :  { %3143 = vmatprep.subr.bf16.mxu0 %v4111_v11 }
  0x45   :  { %3171 = vmatpush3.bf16.msra.mxu1 %v4142_v23 }
  0x46   :  { %3172 = vmatprep.subr.bf16.mxu1 %v4151_v26 }
  0x47   :  { %3144 = vmatpush3.bf16.msra.mxu0 %v4122_v16 }
  0x48   :  { %3145 = vmatprep.subr.bf16.mxu0 %v4133_v20 }
  0x49   :  { %3173 = vmatpush3.bf16.msra.mxu1 %v4157_v27 }
  0x4a   :  { %3657 = vmatprep.subr.bf16.mxu1 %v3999_v32 }
  0x4b   :  { %3146 = vmatpush3.bf16.msra.mxu0 %v4142_v23 }
  0x4c   :  { %3147 = vmatprep.subr.bf16.mxu0 %v4151_v26  ;;  %571 = vmatmul.mubr.bf16.vlgmr.msra.gmra.mrb[8].mxu1 %v524_v43 }
  0x4d   :  { %3658 = vmatpush3.bf16.msra.mxu1 %v4167_v29  ;;  %3661 = vmatprep.mubr.msk.bf16.mxu1 %vm4000_vm0, %v3999_v32 }
  0x4e   :  { %3659 = vmatprep.subr.bf16.mxu1 %v3999_v32 }
  0x4f   :  { %3148 = vmatpush3.bf16.msra.mxu0 %v4157_v27 }
  0x50   :  { %3649 = vmatprep.subr.bf16.mxu0 %v3999_v32 }
  0x51   :  { %3660 = vmatpush3.bf16.msra.mxu1 %v4183_v34 }
  0x52   :  { %459 = vmatmul.mubr.bf16.vlgmr.msra.gmra.mrb[12].mxu0 %v4191_v35  ;;  %3208 = vmatprep.subr.bf16.mxu1 %v4046_v0 }
  0x53   :  { %3650 = vmatpush3.bf16.msra.mxu0 %v4167_v29  ;;  %3653 = vmatprep.mubr.msk.bf16.mxu0 %vm4000_vm0, %v3999_v32 }
  0x54   :  { %3651 = vmatprep.subr.bf16.mxu0 %v3999_v32  ;;  %3662 = vmatmul.mubr.msk.bf16.vlgmr.msra.gmra.mrb[12].mxu1 %vm199_vm1, %v662_v48 }
  0x55   :  { %3209 = vmatpush3.bf16.msra.mxu1 %v4051_v1  ;;  %811 = vmatprep.mubr.bf16.mxu1 %v772_v49 }
  0x56   :  { %3210 = vmatprep.subr.bf16.mxu1 %v4057_v2 }
  0x57   :  { %3652 = vmatpush3.bf16.msra.mxu0 %v4183_v34 }
  0x58   :  { %3183 = vmatprep.subr.bf16.mxu0 %v4046_v0 }
  0x59   :  { %3211 = vmatpush3.bf16.msra.mxu1 %v4064_v3 }
  0x5a   :  { %3654 = vmatmul.mubr.msk.bf16.vlgmr.msra.gmra.mrb[16].mxu0 %vm199_vm1, %v532_v51  ;;  %3212 = vmatprep.subr.bf16.mxu1 %v4071_v4 }
  0x5b   :  { %3184 = vmatpush3.bf16.msra.mxu0 %v4051_v1  ;;  %700 = vmatprep.mubr.bf16.mxu0 %v661_v52 }
  0x5c   :  { %3185 = vmatprep.subr.bf16.mxu0 %v4057_v2 }
  0x5d   :  { %3213 = vmatpush3.bf16.msra.mxu1 %v4078_v5 }
  0x5e   :  { %3214 = vmatprep.subr.bf16.mxu1 %v4085_v6 }
  0x5f   :  { %3186 = vmatpush3.bf16.msra.mxu0 %v4064_v3 }
  0x60   :  { %3187 = vmatprep.subr.bf16.mxu0 %v4071_v4 }
  0x61   :  { %3215 = vmatpush3.bf16.msra.mxu1 %v4092_v7 }
  0x62   :  { %3216 = vmatprep.subr.bf16.mxu1 %v4099_v8 }
  0x63   :  { %3188 = vmatpush3.bf16.msra.mxu0 %v4078_v5 }
  0x64   :  { %3189 = vmatprep.subr.bf16.mxu0 %v4085_v6 }
  0x65   :  { %3217 = vmatpush3.bf16.msra.mxu1 %v4105_v10 }
  0x66   :  { %3218 = vmatprep.subr.bf16.mxu1 %v4111_v11 }
  0x67   :  { %3190 = vmatpush3.bf16.msra.mxu0 %v4092_v7 }
  0x68   :  { %3191 = vmatprep.subr.bf16.mxu0 %v4099_v8 }
  0x69   :  { %3219 = vmatpush3.bf16.msra.mxu1 %v4122_v16 }
  0x6a   :  { %3220 = vmatprep.subr.bf16.mxu1 %v4133_v20 }
  0x6b   :  { %3192 = vmatpush3.bf16.msra.mxu0 %v4105_v10 }
  0x6c   :  { %3193 = vmatprep.subr.bf16.mxu0 %v4111_v11 }
  0x6d   :  { %3221 = vmatpush3.bf16.msra.mxu1 %v4142_v23 }
  0x6e   :  { %3222 = vmatprep.subr.bf16.mxu1 %v4151_v26 }
  0x6f   :  { %3194 = vmatpush3.bf16.msra.mxu0 %v4122_v16 }
  0x70   :  { %3195 = vmatprep.subr.bf16.mxu0 %v4133_v20 }
  0x71   :  { %3223 = vmatpush3.bf16.msra.mxu1 %v4157_v27 }
  0x72   :  { %3673 = vmatprep.subr.bf16.mxu1 %v3999_v32 }
  0x73   :  { %3196 = vmatpush3.bf16.msra.mxu0 %v4142_v23 }
  0x74   :  { %3197 = vmatprep.subr.bf16.mxu0 %v4151_v26  ;;  %812 = vmatmul.mubr.bf16.vlgmr.msra.gmra.mrb[16].mxu1 %v765_v53 }
  0x75   :  { %3674 = vmatpush3.bf16.msra.mxu1 %v4167_v29  ;;  %3677 = vmatprep.mubr.msk.bf16.mxu1 %vm4000_vm0, %v3999_v32 }
  0x76   :  { %3675 = vmatprep.subr.bf16.mxu1 %v3999_v32 }
  0x77   :  { %3198 = vmatpush3.bf16.msra.mxu0 %v4157_v27 }
  0x78   :  { %3665 = vmatprep.subr.bf16.mxu0 %v3999_v32 }
  0x79   :  { %3676 = vmatpush3.bf16.msra.mxu1 %v4183_v34 }
  0x7a   :  { %701 = vmatmul.mubr.bf16.vlgmr.msra.gmra.mrb[20].mxu0 %v4251_v46  ;;  %3258 = vmatprep.subr.bf16.mxu1 %v4046_v0 }
  0x7b   :  { %3666 = vmatpush3.bf16.msra.mxu0 %v4167_v29  ;;  %3669 = vmatprep.mubr.msk.bf16.mxu0 %vm4000_vm0, %v3999_v32 }
  0x7c   :  { %3667 = vmatprep.subr.bf16.mxu0 %v3999_v32  ;;  %3678 = vmatmul.mubr.msk.bf16.vlgmr.msra.gmra.mrb[20].mxu1 %vm199_vm1, %v885_v58 }
  0x7d   :  { %3259 = vmatpush3.bf16.msra.mxu1 %v4051_v1  ;;  %1035 = vmatprep.mubr.bf16.mxu1 %v996_v59 }
  0x7e   :  { %3260 = vmatprep.subr.bf16.mxu1 %v4057_v2 }
  0x7f   :  { %3668 = vmatpush3.bf16.msra.mxu0 %v4183_v34 }
  0x80   :  { %3233 = vmatprep.subr.bf16.mxu0 %v4046_v0 }
  0x81   :  { %3261 = vmatpush3.bf16.msra.mxu1 %v4064_v3 }
  0x82   :  { %3670 = vmatmul.mubr.msk.bf16.vlgmr.msra.gmra.mrb[24].mxu0 %vm199_vm1, %v773_v61  ;;  %3262 = vmatprep.subr.bf16.mxu1 %v4071_v4 }
  0x83   :  { %3234 = vmatpush3.bf16.msra.mxu0 %v4051_v1  ;;  %923 = vmatprep.mubr.bf16.mxu0 %v884_v62 }
  0x84   :  { %3235 = vmatprep.subr.bf16.mxu0 %v4057_v2 }
  0x85   :  { %3263 = vmatpush3.bf16.msra.mxu1 %v4078_v5 }
  0x86   :  { %3264 = vmatprep.subr.bf16.mxu1 %v4085_v6 }
  0x87   :  { %3236 = vmatpush3.bf16.msra.mxu0 %v4064_v3 }
  0x88   :  { %3237 = vmatprep.subr.bf16.mxu0 %v4071_v4 }
  0x89   :  { %3265 = vmatpush3.bf16.msra.mxu1 %v4092_v7 }
  0x8a   :  { %3266 = vmatprep.subr.bf16.mxu1 %v4099_v8 }
  0x8b   :  { %3238 = vmatpush3.bf16.msra.mxu0 %v4078_v5 }
  0x8c   :  { %3239 = vmatprep.subr.bf16.mxu0 %v4085_v6 }
  0x8d   :  { %3267 = vmatpush3.bf16.msra.mxu1 %v4105_v10 }
  0x8e   :  { %3268 = vmatprep.subr.bf16.mxu1 %v4111_v11 }
  0x8f   :  { %3240 = vmatpush3.bf16.msra.mxu0 %v4092_v7 }
  0x90   :  { %3241 = vmatprep.subr.bf16.mxu0 %v4099_v8 }
  0x91   :  { %3269 = vmatpush3.bf16.msra.mxu1 %v4122_v16 }
  0x92   :  { %3270 = vmatprep.subr.bf16.mxu1 %v4133_v20 }
  0x93   :  { %3242 = vmatpush3.bf16.msra.mxu0 %v4105_v10 }
  0x94   :  { %3243 = vmatprep.subr.bf16.mxu0 %v4111_v11 }
  0x95   :  { %3271 = vmatpush3.bf16.msra.mxu1 %v4142_v23 }
  0x96   :  { %3272 = vmatprep.subr.bf16.mxu1 %v4151_v26 }
  0x97   :  { %3244 = vmatpush3.bf16.msra.mxu0 %v4122_v16 }
  0x98   :  { %3245 = vmatprep.subr.bf16.mxu0 %v4133_v20 }
  0x99   :  { %3273 = vmatpush3.bf16.msra.mxu1 %v4157_v27 }
  0x9a   :  { %3701 = vmatprep.subr.bf16.mxu1 %v3999_v32 }
  0x9b   :  { %3246 = vmatpush3.bf16.msra.mxu0 %v4142_v23 }
  0x9c   :  { %3247 = vmatprep.subr.bf16.mxu0 %v4151_v26  ;;  %1036 = vmatmul.mubr.bf16.vlgmr.msra.gmra.mrb[24].mxu1 %v989_v63 }
  0x9d   :  { %3709 = vmatprep.mubr.msk.bf16.mxu1 %vm4000_vm0, %v3999_v32  ;;  %3702 = vmatpush3.bf16.msra.mxu1 %v3927_v12 }
  0x9e   :  { %3703 = vmatprep.subr.bf16.mxu1 %v3999_v32 }
  0x9f   :  { %3248 = vmatpush3.bf16.msra.mxu0 %v4157_v27 }
  0xa0   :  { %3681 = vmatprep.subr.bf16.mxu0 %v3999_v32 }
  0xa1   :  { %3704 = vmatpush3.bf16.msra.mxu1 %v3928_v13 }
  0xa2   :  { %924 = vmatmul.mubr.bf16.vlgmr.msra.gmra.mrb[28].mxu0 %v877_v56  ;;  %3705 = vmatprep.subr.bf16.mxu1 %v3999_v32 }
  0xa3   :  { %3682 = vmatpush3.bf16.msra.mxu0 %v4167_v29  ;;  %3685 = vmatprep.mubr.msk.bf16.mxu0 %vm4000_vm0, %v3999_v32 }
  0xa4   :  { %3683 = vmatprep.subr.bf16.mxu0 %v3999_v32 }
  0xa5   :  { %3706 = vmatpush3.bf16.msra.mxu1 %v3929_v14 }
  0xa6   :  { %3707 = vmatprep.subr.bf16.mxu1 %v3999_v32 }
  0xa7   :  { %3684 = vmatpush3.bf16.msra.mxu0 %v4183_v34 }
  0xa8   :  { %3689 = vmatprep.subr.bf16.mxu0 %v3999_v32 }
  0xa9   :  { %3708 = vmatpush3.bf16.msra.mxu1 %v3930_v15 }
  0xaa   :  { %3686 = vmatmul.mubr.msk.bf16.vlgmr.msra.gmra.mrb[32].mxu0 %vm199_vm1, %v997_v9  ;;  %3713 = vmatprep.subr.bf16.mxu1 %v3999_v32 }
  0xab   :  { %3697 = vmatprep.mubr.msk.bf16.mxu0 %vm4000_vm0, %v3999_v32  ;;  %3690 = vmatpush3.bf16.msra.mxu0 %v3931_v24  ;;  %v4410_v24 = vld [vmem:[%s5085_s2] ss:$0 sm:$0xff] }
  0xac   :  { %3691 = vmatprep.subr.bf16.mxu0 %v3999_v32 }
  0xaf   :  { %3692 = vmatpush3.bf16.msra.mxu0 %v3932_v36 }
  0xb0   :  { %3693 = vmatprep.subr.bf16.mxu0 %v3999_v32 }
  0xb3   :  { %3694 = vmatpush3.bf16.msra.mxu0 %v3933_v40 }
  0xb4   :  { %3695 = vmatprep.subr.bf16.mxu0 %v3999_v32 }
  0xb7   :  { %3696 = vmatpush3.bf16.msra.mxu0 %v3934_v47 }
  0xb8   :  { %3293 = vmatprep.subr.bf16.mxu0 %v4046_v0 }
  0xf5   :  { %v3099_v17 = vpop.f32.mrb[0].mxu0  ;;  %v3124_v18 = vpop.f32.mrb[0].mxu1 }
  0xf6   :  { %v3100_v19 = vpop.f32.mrb[1].mxu0  ;;  %v3125_v21 = vpop.f32.mrb[1].mxu1 }
  0xf7   :  { %v3101_v25 = vadd.f32 %v3100_v19, %v3099_v17  ;;  %v3102_v28 = vpop.f32.mrb[2].mxu0  ;;  %v3126_v30 = vadd.f32 %v3125_v21, %v3124_v18  ;;  %v3127_v31 = vpop.f32.mrb[2].mxu1 }
  0xf8   :  { %v3103_v33 = vpop.f32.mrb[3].mxu0  ;;  %v3128_v35 = vpop.f32.mrb[3].mxu1 }
  0xf9   :  { %v4416_v35 = vld.sshfl [vmem:[%s5083_s0 + $0x6] sm:$0x13 pattern:$0x75316420] }
  0xfd   :  { %v277_v37 = vpop.f32.mrb[4].mxu0 }
  0xfe   :  { %v278_v38 = vadd.f32 %v3101_v25, %v277_v37  ;;  %v3631_v39 = vpop.f32.mrb[5].mxu0  ;;  %v3010_v37 = vld.sshfl [vmem:[%s5083_s0 + $0x15] sm:$0x13 pattern:$0x75316420] }
  0xff   :  { %v280_v41 = vpop.f32.mrb[6].mxu0  ;;  %v500_v42 = vpop.f32.mrb[4].mxu1  ;;  %v1352_v39 = vcombine.high %v3010_v37, %v3010_v37 }
 0x100   :  { %v3632_v43 = vpop.f32.mrb[7].mxu0  ;;  %v3647_v44 = vpop.f32.mrb[5].mxu1 }
 0x101   :  { %v503_v45 = vpop.f32.mrb[6].mxu1  ;;  %v1366_v41 = vrot.slane %v1352_v39, %v4136_v22 }
 0x102   :  { %v3648_v46 = vpop.f32.mrb[7].mxu1 }
 0x105   :  { %v388_v48 = vpop.f32.mrb[8].mxu0 }
 0x106   :  { %v389_v49 = vadd.f32 %v3126_v30, %v388_v48  ;;  %v3639_v50 = vpop.f32.mrb[9].mxu0 }
 0x107   :  { %v391_v51 = vpop.f32.mrb[10].mxu0 }
 0x108   :  { %v394_v52 = vmax.f32 %v278_v38, %v389_v49  ;;  %v3640_v53 = vpop.f32.mrb[11].mxu0  ;;  %v4424_v38 = vrot.slane %v4416_v35, %v4136_v22 }
 0x10a   :  { %v1256_v40 = vcombine.high %v4424_v38, %v4424_v38 }
 0x11f   :  { %v3174_v54 = vpop.f32.mrb[8].mxu1 }
 0x120   :  { %v3175_v55 = vpop.f32.mrb[9].mxu1 }
 0x121   :  { %v3176_v56 = vadd.f32 %v3175_v55, %v3174_v54  ;;  %v3177_v57 = vpop.f32.mrb[10].mxu1 }
 0x122   :  { %v3178_v58 = vpop.f32.mrb[11].mxu1 }
 0x125   :  { %v3149_v59 = vpop.f32.mrb[12].mxu0 }
 0x126   :  { %v3150_v60 = vpop.f32.mrb[13].mxu0 }
 0x127   :  { %v3151_v61 = vadd.f32 %v3150_v60, %v3149_v59  ;;  %v3152_v62 = vpop.f32.mrb[14].mxu0  ;;  %v742_v63 = vpop.f32.mrb[12].mxu1 }
 0x128   :  { %v3153_v9 = vpop.f32.mrb[15].mxu0  ;;  %v3663_v12 = vpop.f32.mrb[13].mxu1 }
 0x129   :  { %v501_v13 = vadd.f32 %v3151_v61, %v500_v42  ;;  %v745_v14 = vpop.f32.mrb[14].mxu1  ;;  %v4457_v9 = vld.sshfl [vmem:[%s5083_s0 + $0x24] sm:$0x13 pattern:$0x75316420] }
 0x12a   :  { %v3664_v15 = vpop.f32.mrb[15].mxu1  ;;  %v3016_v12 = vld.sshfl [vmem:[%s5083_s0 + $0x33] sm:$0x13 pattern:$0x75316420] }
 0x12b   :  { %v506_v17 = vmax.f32 %v394_v52, %v501_v13  ;;  %v4466_v13 = vrot.slane %v4457_v9, %v4136_v22  ;;  %v1576_v14 = vcombine.high %v3016_v12, %v3016_v12 }
 0x12d   :  { %v612_v18 = vpop.f32.mrb[16].mxu0  ;;  %v1479_v15 = vcombine.high %v4466_v13, %v4466_v13 }
 0x12e   :  { %v613_v19 = vadd.f32 %v3176_v56, %v612_v18  ;;  %v3655_v21 = vpop.f32.mrb[17].mxu0 }
 0x12f   :  { %v615_v25 = vpop.f32.mrb[18].mxu0 }
 0x130   :  { %v618_v28 = vmax.f32 %v506_v17, %v613_v19  ;;  %v3656_v30 = vpop.f32.mrb[19].mxu0  ;;  %v1590_v17 = vrot.slane %v1576_v14, %v4136_v22  ;;  %v3032_v14 = vld.sshfl [vmem:[%s5083_s0 + $0x9] sm:$0x13 pattern:$0x75316420] }
 0x132   :  { %v626_v31 = vadd.f32 %v4410_v24, %v618_v28 }
 0x134   :  { %v627_v33 = vmax.f32 %v626_v31, 0.0 }
 0x136   :  { %v628_v36 = vpack.c.bf16 %v627_v33, %v627_v33 }
 0x138   :  { %3710 = vmatmul.mubr.msk.bf16.vlgmr.msra.gmra.mrb[28].mxu1 %vm1120_vm2, %v628_v36 }
 0x139   :  { %3714 = vmatpush3.bf16.msra.mxu1 %v4167_v29  ;;  %3717 = vmatprep.mubr.msk.bf16.mxu1 %vm4000_vm0, %v3999_v32 }
 0x13a   :  { %3715 = vmatprep.subr.bf16.mxu1 %v3999_v32 }
 0x13d   :  { %3716 = vmatpush3.bf16.msra.mxu1 %v4183_v34 }
 0x13e   :  { %3318 = vmatprep.subr.bf16.mxu1 %v4046_v0 }
 0x140   :  { %3718 = vmatmul.mubr.msk.bf16.vlgmr.msra.gmra.mrb[32].mxu1 %vm199_vm1, %v1256_v40 }
 0x141   :  { %3319 = vmatpush3.bf16.msra.mxu1 %v4051_v1  ;;  %1405 = vmatprep.mubr.bf16.mxu1 %v1366_v41 }
 0x142   :  { %3320 = vmatprep.subr.bf16.mxu1 %v4057_v2 }
 0x145   :  { %3321 = vmatpush3.bf16.msra.mxu1 %v4064_v3 }
 0x146   :  { %3322 = vmatprep.subr.bf16.mxu1 %v4071_v4 }
 0x147   :  { %v3224_v42 = vpop.f32.mrb[16].mxu1 }
 0x148   :  { %v3225_v43 = vpop.f32.mrb[17].mxu1 }
 0x149   :  { %v3226_v44 = vadd.f32 %v3225_v43, %v3224_v42  ;;  %v3227_v45 = vpop.f32.mrb[18].mxu1  ;;  %3323 = vmatpush3.bf16.msra.mxu1 %v4078_v5  ;;  %v1241_v43 = vcombine.high %v4416_v35, %v4416_v35  ;;  %v4511_v35 = vld [vmem:[%s5084_s1] sm:$0xff]  }
 0x14a   :  { %v3228_v46 = vpop.f32.mrb[19].mxu1  ;;  %3324 = vmatprep.subr.bf16.mxu1 %v4085_v6 }
 0x14b   :  { %v4496_v46 = vrot.slane %v3016_v12, %v4136_v22 }
 0x14d   :  { %v3199_v47 = vpop.f32.mrb[20].mxu0  ;;  %3325 = vmatpush3.bf16.msra.mxu1 %v4092_v7 }
 0x14e   :  { %v3200_v48 = vpop.f32.mrb[21].mxu0  ;;  %3326 = vmatprep.subr.bf16.mxu1 %v4099_v8 }
 0x14f   :  { %v3201_v49 = vadd.f32 %v3200_v48, %v3199_v47  ;;  %v3202_v50 = vpop.f32.mrb[22].mxu0  ;;  %v965_v51 = vpop.f32.mrb[20].mxu1  ;;  %v1255_v47 = vrot.slane %v1241_v43, %v4136_v22 }
 0x150   :  { %v3203_v52 = vpop.f32.mrb[23].mxu0  ;;  %v3679_v53 = vpop.f32.mrb[21].mxu1  ;;  %v4517_v50 = vld [vmem:[%s5084_s1 + $0x48] sm:$0xff]  }
 0x151   :  { %v743_v54 = vadd.f32 %v3201_v49, %v742_v63  ;;  %v968_v55 = vpop.f32.mrb[22].mxu1  ;;  %3327 = vmatpush3.bf16.msra.mxu1 %v4105_v10  ;;  %v4451_v63 = vrot.slane %v3010_v37, %v4136_v22  ;;  %v4503_v49 = vld [vmem:[%s5084_s1 + $0x40] sm:$0xff]   ;;  %v4533_v52 = vld [vmem:[%s5084_s1 + $0x50] sm:$0xff]   ;;  %v4610_v53 = vld [vmem:[%s5084_s1 + $0x68] sm:$0xff]  }
 0x152   :  { %v3680_v56 = vpop.f32.mrb[23].mxu1  ;;  %3328 = vmatprep.subr.bf16.mxu1 %v4111_v11 }
 0x155   :  { %v853_v57 = vpop.f32.mrb[24].mxu0  ;;  %3329 = vmatpush3.bf16.msra.mxu1 %v4122_v16 }
 0x156   :  { %v854_v58 = vadd.f32 %v3226_v44, %v853_v57  ;;  %v3671_v59 = vpop.f32.mrb[25].mxu0  ;;  %3330 = vmatprep.subr.bf16.mxu1 %v4133_v20 }
 0x157   :  { %v856_v60 = vpop.f32.mrb[26].mxu0  ;;  %v3936_v59 = vld [vmem:[%s5086_s3 + $0x48] sm:$0xff]  }
 0x158   :  { %v859_v61 = vmax.f32 %v743_v54, %v854_v58  ;;  %v3672_v62 = vpop.f32.mrb[27].mxu0  ;;  %v3935_v58 = vld [vmem:[%s5086_s3 + $0x40] sm:$0xff]   ;;  %v3937_v60 = vld [vmem:[%s5086_s3 + $0x50] sm:$0xff]  }
 0x159   :  { %3331 = vmatpush3.bf16.msra.mxu1 %v4142_v23 }
 0x15a   :  { %3332 = vmatprep.subr.bf16.mxu1 %v4151_v26 }
 0x15d   :  { %3333 = vmatpush3.bf16.msra.mxu1 %v4157_v27 }
 0x15e   :  { %3729 = vmatprep.subr.bf16.mxu1 %v3999_v32 }
 0x160   :  { %1406 = vmatmul.mubr.bf16.vlgmr.msra.gmra.mrb[36].mxu1 %v4451_v63 }
 0x161   :  { %3730 = vmatpush3.bf16.msra.mxu1 %v4167_v29  ;;  %3733 = vmatprep.mubr.msk.bf16.mxu1 %vm4000_vm0, %v3999_v32 }
 0x162   :  { %3731 = vmatprep.subr.bf16.mxu1 %v3999_v32 }
 0x165   :  { %3732 = vmatpush3.bf16.msra.mxu1 %v4183_v34 }
 0x166   :  { %3368 = vmatprep.subr.bf16.mxu1 %v4046_v0 }
 0x168   :  { %3734 = vmatmul.mubr.msk.bf16.vlgmr.msra.gmra.mrb[40].mxu1 %vm199_vm1, %v1479_v15  ;;  %v1768_v15 = vcombine.high %v3032_v14, %v3032_v14 }
 0x169   :  { %3369 = vmatpush3.bf16.msra.mxu1 %v4051_v1  ;;  %1629 = vmatprep.mubr.bf16.mxu1 %v1590_v17 }
 0x16a   :  { %3370 = vmatprep.subr.bf16.mxu1 %v4057_v2  ;;  %v1782_v17 = vrot.slane %v1768_v15, %v4136_v22 }
 0x16d   :  { %3371 = vmatpush3.bf16.msra.mxu1 %v4064_v3 }
 0x16e   :  { %3372 = vmatprep.subr.bf16.mxu1 %v4071_v4 }
 0x16f   :  { %v3274_v18 = vpop.f32.mrb[24].mxu1 }
 0x170   :  { %v3275_v19 = vpop.f32.mrb[25].mxu1 }
 0x171   :  { %v3276_v21 = vadd.f32 %v3275_v19, %v3274_v18  ;;  %v3277_v25 = vpop.f32.mrb[26].mxu1  ;;  %3373 = vmatpush3.bf16.msra.mxu1 %v4078_v5  ;;  %v4656_v18 = vrot.slane %v3032_v14, %v4136_v22 }
 0x172   :  { %v3278_v28 = vpop.f32.mrb[27].mxu1  ;;  %3374 = vmatprep.subr.bf16.mxu1 %v4085_v6 }
 0x175   :  { %v3249_v0 = vpop.f32.mrb[28].mxu0  ;;  %3375 = vmatpush3.bf16.msra.mxu1 %v4092_v7 }
 0x176   :  { %v3250_v1 = vpop.f32.mrb[29].mxu0  ;;  %3376 = vmatprep.subr.bf16.mxu1 %v4099_v8 }
 0x177   :  { %v3251_v2 = vadd.f32 %v3250_v1, %v3249_v0  ;;  %v3252_v30 = vpop.f32.mrb[30].mxu0  ;;  %v4668_v0 = vld.sshfl [vmem:[%s5083_s0 + $0x18] sm:$0x13 pattern:$0x75316420] }
 0x178   :  { %v3253_v3 = vpop.f32.mrb[31].mxu0  ;;  %v4672_v1 = vrot.slane %v4668_v0, %v4136_v22 }
 0x179   :  { %v966_v31 = vadd.f32 %v3251_v2, %v965_v51  ;;  %3377 = vmatpush3.bf16.msra.mxu1 %v4105_v10  ;;  %v4525_v51 = vld [vmem:[%s5084_s1 + $0x8] sm:$0xff]   ;;  %v4698_v2 = vld [vmem:[%s5084_s1 + $0x70] sm:$0xff]  }
 0x17a   :  { %3378 = vmatprep.subr.bf16.mxu1 %v4111_v11 }
 0x17b   :  { %v971_v33 = vmax.f32 %v859_v61, %v966_v31  ;;  %v3938_v61 = vld [vmem:[%s5086_s3 + $0x58] sm:$0xff]  }
 0x17d   :  { %v1077_v36 = vpop.f32.mrb[32].mxu0  ;;  %3379 = vmatpush3.bf16.msra.mxu1 %v4122_v16 }
 0x17e   :  { %v1078_v37 = vadd.f32 %v3276_v21, %v1077_v36  ;;  %v3687_v39 = vpop.f32.mrb[33].mxu0  ;;  %3380 = vmatprep.subr.bf16.mxu1 %v4133_v20 }
 0x17f   :  { %v1080_v40 = vpop.f32.mrb[34].mxu0 }
 0x180   :  { %v1083_v41 = vmax.f32 %v971_v33, %v1078_v37  ;;  %v3688_v42 = vpop.f32.mrb[35].mxu0 }
 0x181   :  { %3381 = vmatpush3.bf16.msra.mxu1 %v4142_v23  ;;  %v3038_v42 = vld.sshfl [vmem:[%s5083_s0 + $0x27] sm:$0x13 pattern:$0x75316420] }
 0x182   :  { %v1084_v44 = vadd.f32 %v4410_v24, %v1083_v41  ;;  %3382 = vmatprep.subr.bf16.mxu1 %v4151_v26  ;;  %v4706_v41 = vld [vmem:[%s5084_s1 + $0x30] sm:$0xff]  }
 0x184   :  { %v1085_v45 = vmax.f32 %v1084_v44, 0.0 }
 0x185   :  { %3383 = vmatpush3.bf16.msra.mxu1 %v4157_v27 }
 0x186   :  { %v1086_v48 = vpack.c.bf16 %v1085_v45, %v1085_v45  ;;  %3398 = vmatprep.subr.bf16.mxu1 %v4503_v49  ;;  %v4715_v45 = vld [vmem:[%s5084_s1 + $0x78] sm:$0xff]  }
 0x188   :  { %3698 = vmatmul.mubr.msk.bf16.vlgmr.msra.gmra.mrb[36].mxu0 %vm1120_vm2, %v1086_v48  ;;  %1630 = vmatmul.mubr.bf16.vlgmr.msra.gmra.mrb[44].mxu1 %v4496_v46  ;;  %v4720_v48 = vrot.slane %v3038_v42, %v4136_v22 }
 0x189   :  { %3294 = vmatpush3.bf16.msra.mxu0 %v4511_v35  ;;  %1294 = vmatprep.mubr.bf16.mxu0 %v1255_v47 }
 0x18a   :  { %3295 = vmatprep.subr.bf16.mxu0 %v4517_v50  ;;  %3399 = vmatpush3.bf16.msra.mxu1 %v4511_v35 }
 0x18b   :  { %3400 = vmatprep.subr.bf16.mxu1 %v4517_v50  ;;  %1821 = vmatprep.mubr.bf16.mxu1 %v1782_v17 }
 0x18d   :  { %3296 = vmatpush3.bf16.msra.mxu0 %v4525_v51 }
 0x18e   :  { %3297 = vmatprep.subr.bf16.mxu0 %v4071_v4  ;;  %3401 = vmatpush3.bf16.msra.mxu1 %v4525_v51  ;;  %v1464_v4 = vcombine.high %v4457_v9, %v4457_v9 }
 0x18f   :  { %3402 = vmatprep.subr.bf16.mxu1 %v4533_v52 }
 0x191   :  { %3298 = vmatpush3.bf16.msra.mxu0 %v4078_v5 }
 0x192   :  { %3299 = vmatprep.subr.bf16.mxu0 %v4085_v6  ;;  %3403 = vmatpush3.bf16.msra.mxu1 %v4078_v5  ;;  %v1367_v5 = vcombine.high %v4451_v63, %v4451_v63 }
 0x193   :  { %3404 = vmatprep.subr.bf16.mxu1 %v4085_v6  ;;  %v1478_v6 = vrot.slane %v1464_v4, %v4136_v22  ;;  %v4725_v4 = vld [vmem:[%s5084_s1 + $0x38] sm:$0xff]  }
 0x195   :  { %3300 = vmatpush3.bf16.msra.mxu0 %v4092_v7 }
 0x196   :  { %3301 = vmatprep.subr.bf16.mxu0 %v4099_v8  ;;  %3405 = vmatpush3.bf16.msra.mxu1 %v4092_v7  ;;  %v4580_v7 = vld [vmem:[%s5084_s1 + $0x10] sm:$0xff]  }
 0x197   :  { %3406 = vmatprep.subr.bf16.mxu1 %v4099_v8  ;;  %v4586_v8 = vld [vmem:[%s5084_s1 + $0x58] sm:$0xff]  }
 0x199   :  { %3302 = vmatpush3.bf16.msra.mxu0 %v4105_v10 }
 0x19a   :  { %3303 = vmatprep.subr.bf16.mxu0 %v4111_v11  ;;  %3407 = vmatpush3.bf16.msra.mxu1 %v4105_v10  ;;  %v4592_v10 = vld [vmem:[%s5084_s1 + $0x18] sm:$0xff]  }
 0x19b   :  { %3408 = vmatprep.subr.bf16.mxu1 %v4111_v11  ;;  %v4598_v11 = vld [vmem:[%s5084_s1 + $0x60] sm:$0xff]  }
 0x19d   :  { %3304 = vmatpush3.bf16.msra.mxu0 %v4122_v16 }
 0x19e   :  { %3305 = vmatprep.subr.bf16.mxu0 %v4133_v20  ;;  %3409 = vmatpush3.bf16.msra.mxu1 %v4122_v16 }
 0x19f   :  { %3410 = vmatprep.subr.bf16.mxu1 %v4133_v20 }
 0x1a1   :  { %3306 = vmatpush3.bf16.msra.mxu0 %v4142_v23 }
 0x1a2   :  { %3307 = vmatprep.subr.bf16.mxu0 %v4151_v26  ;;  %3411 = vmatpush3.bf16.msra.mxu1 %v4142_v23 }
 0x1a3   :  { %3412 = vmatprep.subr.bf16.mxu1 %v4151_v26 }
 0x1a5   :  { %3308 = vmatpush3.bf16.msra.mxu0 %v4157_v27 }
 0x1a6   :  { %3721 = vmatprep.subr.bf16.mxu0 %v3999_v32  ;;  %3413 = vmatpush3.bf16.msra.mxu1 %v4157_v27 }
 0x1a7   :  { %3765 = vmatprep.subr.bf16.mxu1 %v3999_v32 }
 0x1a8   :  { %1295 = vmatmul.mubr.bf16.vlgmr.msra.gmra.mrb[40].mxu0 %v4424_v38  ;;  %v4604_v38 = vld [vmem:[%s5084_s1 + $0x20] sm:$0xff]  }
 0x1a9   :  { %3722 = vmatpush3.bf16.msra.mxu0 %v4167_v29  ;;  %3725 = vmatprep.mubr.msk.bf16.mxu0 %vm4000_vm0, %v3999_v32 }
 0x1aa   :  { %3723 = vmatprep.subr.bf16.mxu0 %v3999_v32  ;;  %1822 = vmatmul.mubr.bf16.vlgmr.msra.gmra.mrb[48].mxu1 %v4656_v18 }
 0x1ab   :  { %3766 = vmatpush3.bf16.msra.mxu1 %v4167_v29  ;;  %3769 = vmatprep.mubr.msk.bf16.mxu1 %vm4000_vm0, %v3999_v32 }
 0x1ac   :  { %3767 = vmatprep.subr.bf16.mxu1 %v3999_v32 }
 0x1ad   :  { %3724 = vmatpush3.bf16.msra.mxu0 %v4183_v34 }
 0x1ae   :  { %3343 = vmatprep.subr.bf16.mxu0 %v4503_v49 }
 0x1af   :  { %3768 = vmatpush3.bf16.msra.mxu1 %v4183_v34 }
 0x1b0   :  { %3726 = vmatmul.mubr.msk.bf16.vlgmr.msra.gmra.mrb[44].mxu0 %vm199_vm1, %v1367_v5  ;;  %3448 = vmatprep.subr.bf16.mxu1 %v4503_v49  ;;  %v4733_v5 = vld [vmem:[%s5084_s1 + $0x80] sm:$0xff]  }
 0x1b1   :  { %3344 = vmatpush3.bf16.msra.mxu0 %v4511_v35  ;;  %1517 = vmatprep.mubr.bf16.mxu0 %v1478_v6  ;;  %v4742_v6 = vld [vmem:[%s5084_s1 + $0x88] sm:$0xff]  }
 0x1b2   :  { %3345 = vmatprep.subr.bf16.mxu0 %v4517_v50 }
 0x1b5   :  { %3346 = vmatpush3.bf16.msra.mxu0 %v4525_v51 }
 0x1b6   :  { %3347 = vmatprep.subr.bf16.mxu0 %v4533_v52 }
 0x1b9   :  { %3348 = vmatpush3.bf16.msra.mxu0 %v4580_v7 }
 0x1ba   :  { %3349 = vmatprep.subr.bf16.mxu0 %v4586_v8 }
 0x1bd   :  { %3350 = vmatpush3.bf16.msra.mxu0 %v4592_v10 }
 0x1be   :  { %3351 = vmatprep.subr.bf16.mxu0 %v4598_v11 }
 0x1c1   :  { %3352 = vmatpush3.bf16.msra.mxu0 %v4604_v38 }
 0x1c2   :  { %3353 = vmatprep.subr.bf16.mxu0 %v4610_v53 }
 0x1c5   :  { %3354 = vmatpush3.bf16.msra.mxu0 %v4122_v16  ;;  %v1591_v16 = vcombine.high %v4496_v46, %v4496_v46  ;;  %v1991_v46 = vcombine.high %v3038_v42, %v3038_v42 }
 0x1c6   :  { %3355 = vmatprep.subr.bf16.mxu0 %v4133_v20 }
 0x1c7   :  { %v2005_v47 = vrot.slane %v1991_v46, %v4136_v22 }
 0x1c9   :  { %3356 = vmatpush3.bf16.msra.mxu0 %v4142_v23 }
 0x1ca   :  { %3357 = vmatprep.subr.bf16.mxu0 %v4151_v26 }
 0x1cd   :  { %3358 = vmatpush3.bf16.msra.mxu0 %v4157_v27 }
 0x1ce   :  { %3737 = vmatprep.subr.bf16.mxu0 %v3999_v32 }
 0x1d0   :  { %1518 = vmatmul.mubr.bf16.vlgmr.msra.gmra.mrb[48].mxu0 %v4466_v13 }
 0x1d1   :  { %3738 = vmatpush3.bf16.msra.mxu0 %v4167_v29  ;;  %3741 = vmatprep.mubr.msk.bf16.mxu0 %vm4000_vm0, %v3999_v32  ;;  %v1894_v29 = vcombine.high %v4672_v1, %v4672_v1 }
 0x1d2   :  { %3739 = vmatprep.subr.bf16.mxu0 %v3999_v32 }
 0x1d3   :  { %3770 = vmatmul.mubr.msk.bf16.vlgmr.msra.gmra.mrb[52].mxu1 %vm199_vm1, %v1894_v29 }
 0x1d4   :  { %3449 = vmatpush3.bf16.msra.mxu1 %v4511_v35  ;;  %2044 = vmatprep.mubr.bf16.mxu1 %v2005_v47 }
 0x1d5   :  { %3740 = vmatpush3.bf16.msra.mxu0 %v4183_v34  ;;  %3450 = vmatprep.subr.bf16.mxu1 %v4517_v50  ;;  %v4692_v34 = vld [vmem:[%s5084_s1 + $0x28] sm:$0xff]  }
 0x1d6   :  { %3745 = vmatprep.subr.bf16.mxu0 %v3999_v32 }
 0x1d8   :  { %3742 = vmatmul.mubr.msk.bf16.vlgmr.msra.gmra.mrb[52].mxu0 %vm199_vm1, %v1591_v16  ;;  %3451 = vmatpush3.bf16.msra.mxu1 %v4525_v51 }
 0x1d9   :  { %3753 = vmatprep.mubr.msk.bf16.mxu0 %vm4000_vm0, %v3999_v32  ;;  %3746 = vmatpush3.bf16.msra.mxu0 %v3935_v58 }
 0x1da   :  { %3747 = vmatprep.subr.bf16.mxu0 %v3999_v32  ;;  %3452 = vmatprep.subr.bf16.mxu1 %v4533_v52 }
 0x1dc   :  { %3453 = vmatpush3.bf16.msra.mxu1 %v4580_v7 }
 0x1dd   :  { %3748 = vmatpush3.bf16.msra.mxu0 %v3936_v59  ;;  %3454 = vmatprep.subr.bf16.mxu1 %v4586_v8 }
 0x1de   :  { %3749 = vmatprep.subr.bf16.mxu0 %v3999_v32 }
 0x1e0   :  { %3455 = vmatpush3.bf16.msra.mxu1 %v4592_v10 }
 0x1e1   :  { %3750 = vmatpush3.bf16.msra.mxu0 %v3937_v60  ;;  %3456 = vmatprep.subr.bf16.mxu1 %v4598_v11 }
 0x1e2   :  { %3751 = vmatprep.subr.bf16.mxu0 %v3999_v32 }
 0x1e4   :  { %3457 = vmatpush3.bf16.msra.mxu1 %v4604_v38 }
 0x1e5   :  { %3752 = vmatpush3.bf16.msra.mxu0 %v3938_v61  ;;  %3458 = vmatprep.subr.bf16.mxu1 %v4610_v53 }
 0x1e6   :  { %3757 = vmatprep.subr.bf16.mxu0 %v3999_v32 }
 0x1e8   :  { %3459 = vmatpush3.bf16.msra.mxu1 %v4692_v34 }
 0x1e9   :  { %3460 = vmatprep.subr.bf16.mxu1 %v4698_v2 }
 0x1ec   :  { %3461 = vmatpush3.bf16.msra.mxu1 %v4706_v41 }
 0x1ed   :  { %3462 = vmatprep.subr.bf16.mxu1 %v4715_v45 }
 0x1f0   :  { %3463 = vmatpush3.bf16.msra.mxu1 %v4725_v4 }
 0x1f1   :  { %3781 = vmatprep.subr.bf16.mxu1 %v3999_v32 }
 0x1f3   :  { %2045 = vmatmul.mubr.bf16.vlgmr.msra.gmra.mrb[56].mxu1 %v4720_v48 }
 0x1f4   :  { %3782 = vmatpush3.bf16.msra.mxu1 %v4733_v5  ;;  %3785 = vmatprep.mubr.msk.bf16.mxu1 %vm4000_vm0, %v3999_v32 }
 0x1f5   :  { %3783 = vmatprep.subr.bf16.mxu1 %v3999_v32 }
 0x1f8   :  { %3784 = vmatpush3.bf16.msra.mxu1 %v4742_v6 }
 0x1f9   :  { %3789 = vmatprep.subr.bf16.mxu1 %v3999_v32 }
 0x20b   :  { %v1225_v20 = vpop.f32.mrb[28].mxu1 }
 0x20c   :  { %v3711_v23 = vpop.f32.mrb[29].mxu1 }
 0x20d   :  { %v1228_v26 = vpop.f32.mrb[30].mxu1 }
 0x20e   :  { %v3712_v27 = vpop.f32.mrb[31].mxu1 }
 0x213   :  { %v4631_v54 = vpop.f32.mrb[32].mxu1 }
 0x214   :  { %v3719_v55 = vpop.f32.mrb[33].mxu1 }
 0x215   :  { %v1339_v56 = vpop.f32.mrb[34].mxu1 }
 0x216   :  { %v3720_v57 = vpop.f32.mrb[35].mxu1  ;;  %v3041_v56 = vld.sshfl [vmem:[%s5083_s0 + $0x36] sm:$0x13 pattern:$0x75316420] }
 0x217   :  { %v4751_v57 = vrot.slane %v3041_v56, %v4136_v22 }
 0x219   :  { %v2118_v61 = vcombine.high %v4751_v57, %v4751_v57 }
 0x21b   :  { %3786 = vmatmul.mubr.msk.bf16.vlgmr.msra.gmra.mrb[60].mxu1 %vm199_vm1, %v2118_v61  ;;  %v3940_v61 = vld [vmem:[%s5086_s3 + $0x68] sm:$0xff]  }
 0x21c   :  { %3797 = vmatprep.mubr.msk.bf16.mxu1 %vm4000_vm0, %v3999_v32 }
 0x233   :  { %v3334_v62 = vpop.f32.mrb[36].mxu1 }
 0x234   :  { %v3335_v63 = vpop.f32.mrb[37].mxu1 }
 0x235   :  { %v4649_v9 = vadd.f32 %v3335_v63, %v3334_v62  ;;  %v3337_v12 = vpop.f32.mrb[38].mxu1 }
 0x236   :  { %v3338_v13 = vpop.f32.mrb[39].mxu1 }
 0x23b   :  { %v4658_v19 = vpop.f32.mrb[40].mxu1 }
 0x23c   :  { %v3735_v21 = vpop.f32.mrb[41].mxu1 }
 0x23d   :  { %v1562_v25 = vpop.f32.mrb[42].mxu1 }
 0x23e   :  { %v3736_v28 = vpop.f32.mrb[43].mxu1 }
 0x25b   :  { %v1158_v30 = vpop.f32.mrb[36].mxu0  ;;  %v3384_v3 = vpop.f32.mrb[44].mxu1 }
 0x25c   :  { %v4701_v31 = vadd.f32 %v1225_v20, %v1158_v30  ;;  %v3699_v33 = vpop.f32.mrb[37].mxu0  ;;  %v3385_v36 = vpop.f32.mrb[45].mxu1 }
 0x25d   :  { %v1161_v37 = vpop.f32.mrb[38].mxu0  ;;  %v3386_v39 = vadd.f32 %v3385_v36, %v3384_v3  ;;  %v3387_v40 = vpop.f32.mrb[46].mxu1 }
 0x25e   :  { %v3700_v43 = vpop.f32.mrb[39].mxu0  ;;  %v3388_v44 = vpop.f32.mrb[47].mxu1 }
 0x27b   :  { %v3309_v16 = vpop.f32.mrb[40].mxu0 }
 0x27c   :  { %v3310_v20 = vpop.f32.mrb[41].mxu0 }
 0x27d   :  { %v3311_v23 = vadd.f32 %v3310_v20, %v3309_v16  ;;  %v3312_v26 = vpop.f32.mrb[42].mxu0 }
 0x27e   :  { %v3313_v27 = vpop.f32.mrb[43].mxu0 }
 0x27f   :  { %v1337_v55 = vadd.f32 %v3311_v23, %v4631_v54 }
 0x283   :  { %v1447_v58 = vpop.f32.mrb[44].mxu0 }
 0x284   :  { %v1448_v59 = vadd.f32 %v4649_v9, %v1447_v58  ;;  %v3727_v60 = vpop.f32.mrb[45].mxu0 }
 0x285   :  { %v1450_v62 = vpop.f32.mrb[46].mxu0 }
 0x286   :  { %v1453_v63 = vmax.f32 %v1337_v55, %v1448_v59  ;;  %v3728_v12 = vpop.f32.mrb[47].mxu0  ;;  %v3939_v59 = vld [vmem:[%s5086_s3 + $0x60] sm:$0xff]  }
 0x287   :  { %3790 = vmatpush3.bf16.msra.mxu1 %v3939_v59 }
 0x288   :  { %3791 = vmatprep.subr.bf16.mxu1 %v3999_v32 }
 0x28b   :  { %3792 = vmatpush3.bf16.msra.mxu1 %v3940_v61 }
 0x28c   :  { %3793 = vmatprep.subr.bf16.mxu1 %v3999_v32 }
 0x2a3   :  { %v3359_v54 = vpop.f32.mrb[48].mxu0 }
 0x2a4   :  { %v3360_v13 = vpop.f32.mrb[49].mxu0 }
 0x2a5   :  { %v3361_v14 = vadd.f32 %v3360_v13, %v3359_v54  ;;  %v3362_v15 = vpop.f32.mrb[50].mxu0  ;;  %v3941_v54 = vld [vmem:[%s5086_s3 + $0x70] sm:$0xff]   ;;  %v3942_v13 = vld [vmem:[%s5086_s3 + $0x78] sm:$0xff]  }
 0x2a6   :  { %v3363_v17 = vpop.f32.mrb[51].mxu0  ;;  %3794 = vmatpush3.bf16.msra.mxu1 %v3941_v54 }
 0x2a7   :  { %v1560_v21 = vadd.f32 %v3361_v14, %v4658_v19  ;;  %v1879_v19 = vcombine.high %v4668_v0, %v4668_v0  ;;  %v2006_v0 = vcombine.high %v4720_v48, %v4720_v48  ;;  %3795 = vmatprep.subr.bf16.mxu1 %v3999_v32  ;;  %v3057_v14 = vld.sshfl [vmem:[%s5083_s0 + $0xc] sm:$0x13 pattern:$0x75316420] }
 0x2a8   :  { %v2295_v15 = vcombine.high %v3057_v14, %v3057_v14 }
 0x2a9   :  { %v1565_v9 = vmax.f32 %v1453_v63, %v1560_v21  ;;  %v1893_v42 = vrot.slane %v1879_v19, %v4136_v22  ;;  %v4863_v21 = vrot.slane %v3057_v14, %v4136_v22 }
 0x2aa   :  { %3796 = vmatpush3.bf16.msra.mxu1 %v3942_v13  ;;  %v2309_v17 = vrot.slane %v2295_v15, %v4136_v22 }
 0x2ab   :  { %v1671_v25 = vpop.f32.mrb[52].mxu0  ;;  %3801 = vmatprep.subr.bf16.mxu1 %v3999_v32 }
 0x2ac   :  { %v1672_v28 = vadd.f32 %v3386_v39, %v1671_v25  ;;  %v3743_v29 = vpop.f32.mrb[53].mxu0  ;;  %v1783_v39 = vcombine.high %v4656_v18, %v4656_v18  ;;  %v2103_v18 = vcombine.high %v3041_v56, %v3041_v56 }
 0x2ad   :  { %v1674_v30 = vpop.f32.mrb[54].mxu0 }
 0x2ae   :  { %v1677_v3 = vmax.f32 %v1565_v9, %v1672_v28  ;;  %v3744_v33 = vpop.f32.mrb[55].mxu0  ;;  %v2117_v43 = vrot.slane %v2103_v18, %v4136_v22  ;;  %v4873_v9 = vld.sshfl [vmem:[%s5083_s0 + $0x1b] sm:$0x13 pattern:$0x75316420] }
 0x2af   :  { %v4877_v25 = vrot.slane %v4873_v9, %v4136_v22 }
 0x2b0   :  { %v1678_v36 = vadd.f32 %v4410_v24, %v1677_v3 }
 0x2b1   :  { %v2421_v28 = vcombine.high %v4877_v25, %v4877_v25 }
 0x2b2   :  { %v1679_v37 = vmax.f32 %v1678_v36, 0.0 }
 0x2b4   :  { %v1680_v40 = vpack.c.bf16 %v1679_v37, %v1679_v37  ;;  %v3063_v37 = vld.sshfl [vmem:[%s5083_s0 + $0x2a] sm:$0x13 pattern:$0x75316420] }
 0x2b6   :  { %3754 = vmatmul.mubr.msk.bf16.vlgmr.msra.gmra.mrb[56].mxu0 %vm1120_vm2, %v1680_v40  ;;  %v2518_v40 = vcombine.high %v3063_v37, %v3063_v37 }
 0x2b7   :  { %3758 = vmatpush3.bf16.msra.mxu0 %v4733_v5  ;;  %3761 = vmatprep.mubr.msk.bf16.mxu0 %vm4000_vm0, %v3999_v32 }
 0x2b8   :  { %3759 = vmatprep.subr.bf16.mxu0 %v3999_v32 }
 0x2bb   :  { %3760 = vmatpush3.bf16.msra.mxu0 %v4742_v6 }
 0x2bc   :  { %3423 = vmatprep.subr.bf16.mxu0 %v4503_v49 }
 0x2be   :  { %3762 = vmatmul.mubr.msk.bf16.vlgmr.msra.gmra.mrb[60].mxu0 %vm199_vm1, %v1783_v39  ;;  %v4906_v39 = vrot.slane %v3063_v37, %v4136_v22  ;;  %v3946_v37 = vld [vmem:[%s5086_s3 + $0x98] sm:$0xff]  }
 0x2bf   :  { %3424 = vmatpush3.bf16.msra.mxu0 %v4511_v35  ;;  %1932 = vmatprep.mubr.bf16.mxu0 %v1893_v42 }
 0x2c0   :  { %3425 = vmatprep.subr.bf16.mxu0 %v4517_v50 }
 0x2c3   :  { %3426 = vmatpush3.bf16.msra.mxu0 %v4525_v51 }
 0x2c4   :  { %3427 = vmatprep.subr.bf16.mxu0 %v4533_v52 }
 0x2c7   :  { %3428 = vmatpush3.bf16.msra.mxu0 %v4580_v7 }
 0x2c8   :  { %3429 = vmatprep.subr.bf16.mxu0 %v4586_v8 }
 0x2cb   :  { %3430 = vmatpush3.bf16.msra.mxu0 %v4592_v10 }
 0x2cc   :  { %3431 = vmatprep.subr.bf16.mxu0 %v4598_v11 }
 0x2cf   :  { %3432 = vmatpush3.bf16.msra.mxu0 %v4604_v38 }
 0x2d0   :  { %3433 = vmatprep.subr.bf16.mxu0 %v4610_v53 }
 0x2d3   :  { %3434 = vmatpush3.bf16.msra.mxu0 %v4692_v34 }
 0x2d4   :  { %3435 = vmatprep.subr.bf16.mxu0 %v4698_v2 }
 0x2d7   :  { %3436 = vmatpush3.bf16.msra.mxu0 %v4706_v41 }
 0x2d8   :  { %3437 = vmatprep.subr.bf16.mxu0 %v4715_v45 }
 0x2db   :  { %3438 = vmatpush3.bf16.msra.mxu0 %v4725_v4 }
 0x2dc   :  { %3773 = vmatprep.subr.bf16.mxu0 %v3999_v32 }
 0x2de   :  { %1933 = vmatmul.mubr.bf16.vlgmr.msra.gmra.mrb[64].mxu0 %v4672_v1  ;;  %v3414_v1 = vpop.f32.mrb[48].mxu1 }
 0x2df   :  { %3774 = vmatpush3.bf16.msra.mxu0 %v4733_v5  ;;  %3777 = vmatprep.mubr.msk.bf16.mxu0 %vm4000_vm0, %v3999_v32  ;;  %v3415_v44 = vpop.f32.mrb[49].mxu1 }
 0x2e0   :  { %3775 = vmatprep.subr.bf16.mxu0 %v3999_v32  ;;  %v4824_v46 = vadd.f32 %v3415_v44, %v3414_v1  ;;  %v3417_v47 = vpop.f32.mrb[50].mxu1  ;;  %v3066_v44 = vld.sshfl [vmem:[%s5083_s0 + $0x39] sm:$0x13 pattern:$0x75316420] }
 0x2e1   :  { %v3418_v48 = vpop.f32.mrb[51].mxu1 }
 0x2e2   :  { %v4836_v16 = vpop.f32.mrb[52].mxu1 }
 0x2e3   :  { %3776 = vmatpush3.bf16.msra.mxu0 %v4742_v6  ;;  %v3771_v20 = vpop.f32.mrb[53].mxu1 }
 0x2e4   :  { %3473 = vmatprep.subr.bf16.mxu0 %v4503_v49  ;;  %v1977_v23 = vpop.f32.mrb[54].mxu1  ;;  %v4922_v20 = vrot.slane %v3066_v44, %v4136_v22 }
 0x2e5   :  { %v3772_v26 = vpop.f32.mrb[55].mxu1 }
 0x2e6   :  { %3778 = vmatmul.mubr.msk.bf16.vlgmr.msra.gmra.mrb[68].mxu0 %vm199_vm1, %v2006_v0  ;;  %v3464_v27 = vpop.f32.mrb[56].mxu1 }
 0x2e7   :  { %3474 = vmatpush3.bf16.msra.mxu0 %v4511_v35  ;;  %2156 = vmatprep.mubr.bf16.mxu0 %v2117_v43  ;;  %v3465_v55 = vpop.f32.mrb[57].mxu1 }
 0x2e8   :  { %3475 = vmatprep.subr.bf16.mxu0 %v4517_v50  ;;  %v4838_v56 = vadd.f32 %v3465_v55, %v3464_v27  ;;  %v2645_v27 = vcombine.high %v4922_v20, %v4922_v20 }
 0x2eb   :  { %3476 = vmatpush3.bf16.msra.mxu0 %v4525_v51 }
 0x2ec   :  { %3477 = vmatprep.subr.bf16.mxu0 %v4533_v52 }
 0x2ef   :  { %3478 = vmatpush3.bf16.msra.mxu0 %v4580_v7 }
 0x2f0   :  { %3479 = vmatprep.subr.bf16.mxu0 %v4586_v8 }
 0x2f3   :  { %3480 = vmatpush3.bf16.msra.mxu0 %v4592_v10 }
 0x2f4   :  { %3481 = vmatprep.subr.bf16.mxu0 %v4598_v11 }
 0x2f7   :  { %3482 = vmatpush3.bf16.msra.mxu0 %v4604_v38 }
 0x2f8   :  { %3483 = vmatprep.subr.bf16.mxu0 %v4610_v53 }
 0x2fb   :  { %3484 = vmatpush3.bf16.msra.mxu0 %v4692_v34 }
 0x2fc   :  { %3485 = vmatprep.subr.bf16.mxu0 %v4698_v2 }
 0x2ff   :  { %3486 = vmatpush3.bf16.msra.mxu0 %v4706_v41 }
 0x300   :  { %3487 = vmatprep.subr.bf16.mxu0 %v4715_v45 }
 0x303   :  { %3488 = vmatpush3.bf16.msra.mxu0 %v4725_v4 }
 0x304   :  { %3503 = vmatprep.subr.bf16.mxu0 %v4503_v49 }
 0x306   :  { %2157 = vmatmul.mubr.bf16.vlgmr.msra.gmra.mrb[72].mxu0 %v4751_v57  ;;  %v3467_v57 = vpop.f32.mrb[58].mxu1 }
 0x307   :  { %3504 = vmatpush3.bf16.msra.mxu0 %v4511_v35  ;;  %v3468_v58 = vpop.f32.mrb[59].mxu1  ;;  %2348 = vmatprep.mubr.bf16.mxu0 %v2309_v17 }
 0x308   :  { %3505 = vmatprep.subr.bf16.mxu0 %v4517_v50  ;;  %v4844_v60 = vpop.f32.mrb[60].mxu1 }
 0x309   :  { %v3787_v62 = vpop.f32.mrb[61].mxu1 }
 0x30a   :  { %v2201_v63 = vpop.f32.mrb[62].mxu1 }
 0x30b   :  { %3506 = vmatpush3.bf16.msra.mxu0 %v4525_v51  ;;  %v3788_v12 = vpop.f32.mrb[63].mxu1 }
 0x30c   :  { %3507 = vmatprep.subr.bf16.mxu0 %v4533_v52 }
 0x30f   :  { %3508 = vmatpush3.bf16.msra.mxu0 %v4580_v7 }
 0x310   :  { %3509 = vmatprep.subr.bf16.mxu0 %v4586_v8 }
 0x313   :  { %3510 = vmatpush3.bf16.msra.mxu0 %v4592_v10 }
 0x314   :  { %3511 = vmatprep.subr.bf16.mxu0 %v4598_v11 }
 0x317   :  { %3512 = vmatpush3.bf16.msra.mxu0 %v4604_v38 }
 0x318   :  { %3513 = vmatprep.subr.bf16.mxu0 %v4610_v53 }
 0x31b   :  { %3514 = vmatpush3.bf16.msra.mxu0 %v4692_v34 }
 0x31c   :  { %3515 = vmatprep.subr.bf16.mxu0 %v4698_v2 }
 0x31f   :  { %3516 = vmatpush3.bf16.msra.mxu0 %v4706_v41 }
 0x320   :  { %3517 = vmatprep.subr.bf16.mxu0 %v4715_v45 }
 0x323   :  { %3518 = vmatpush3.bf16.msra.mxu0 %v4725_v4 }
 0x324   :  { %3809 = vmatprep.subr.bf16.mxu0 %v3999_v32 }
 0x326   :  { %2349 = vmatmul.mubr.bf16.vlgmr.msra.gmra.mrb[76].mxu0 %v4863_v21 }
 0x327   :  { %3810 = vmatpush3.bf16.msra.mxu0 %v4733_v5  ;;  %3813 = vmatprep.mubr.msk.bf16.mxu0 %vm4000_vm0, %v3999_v32 }
 0x328   :  { %3811 = vmatprep.subr.bf16.mxu0 %v3999_v32 }
 0x32b   :  { %3812 = vmatpush3.bf16.msra.mxu0 %v4742_v6 }
 0x32c   :  { %3553 = vmatprep.subr.bf16.mxu0 %v4503_v49 }
 0x32e   :  { %3814 = vmatmul.mubr.msk.bf16.vlgmr.msra.gmra.mrb[80].mxu0 %vm199_vm1, %v2421_v28 }
 0x32f   :  { %3554 = vmatpush3.bf16.msra.mxu0 %v4511_v35 }
 0x330   :  { %3555 = vmatprep.subr.bf16.mxu0 %v4517_v50 }
 0x333   :  { %3556 = vmatpush3.bf16.msra.mxu0 %v4525_v51 }
 0x334   :  { %3557 = vmatprep.subr.bf16.mxu0 %v4533_v52 }
 0x337   :  { %3558 = vmatpush3.bf16.msra.mxu0 %v4580_v7 }
 0x338   :  { %3559 = vmatprep.subr.bf16.mxu0 %v4586_v8 }
 0x33b   :  { %3560 = vmatpush3.bf16.msra.mxu0 %v4592_v10 }
 0x33c   :  { %3561 = vmatprep.subr.bf16.mxu0 %v4598_v11 }
 0x33f   :  { %3562 = vmatpush3.bf16.msra.mxu0 %v4604_v38 }
 0x340   :  { %3563 = vmatprep.subr.bf16.mxu0 %v4610_v53 }
 0x343   :  { %3564 = vmatpush3.bf16.msra.mxu0 %v4692_v34 }
 0x344   :  { %3565 = vmatprep.subr.bf16.mxu0 %v4698_v2 }
 0x347   :  { %3566 = vmatpush3.bf16.msra.mxu0 %v4706_v41 }
 0x348   :  { %3567 = vmatprep.subr.bf16.mxu0 %v4715_v45 }
 0x34b   :  { %3568 = vmatpush3.bf16.msra.mxu0 %v4725_v4 }
 0x34c   :  { %3825 = vmatprep.subr.bf16.mxu0 %v3999_v32 }
 0x389   :  { %v1751_v29 = vpop.f32.mrb[56].mxu0 }
 0x38a   :  { %v4895_v30 = vadd.f32 %v1751_v29, %v4701_v31  ;;  %v3755_v3 = vpop.f32.mrb[57].mxu0  ;;  %v2532_v31 = vrot.slane %v2518_v40, %v4136_v22 }
 0x38b   :  { %v1754_v33 = vpop.f32.mrb[58].mxu0 }
 0x38c   :  { %v3756_v36 = vpop.f32.mrb[59].mxu0  ;;  %2571 = vmatprep.mubr.bf16.mxu0 %v2532_v31 }
 0x38d   :  { %2572 = vmatmul.mubr.bf16.vlgmr.msra.gmra.mrb[84].mxu0 %v4906_v39  ;;  %v3945_v36 = vld [vmem:[%s5086_s3 + $0x90] sm:$0xff]  }
 0x38e   :  { %3826 = vmatpush3.bf16.msra.mxu0 %v4733_v5  ;;  %3829 = vmatprep.mubr.msk.bf16.mxu0 %vm4000_vm0, %v3999_v32 }
 0x38f   :  { %3827 = vmatprep.subr.bf16.mxu0 %v3999_v32 }
 0x391   :  { %v1863_v19 = vpop.f32.mrb[60].mxu0 }
 0x392   :  { %v1864_v42 = vadd.f32 %v4824_v46, %v1863_v19  ;;  %v3763_v18 = vpop.f32.mrb[61].mxu0  ;;  %3828 = vmatpush3.bf16.msra.mxu0 %v4742_v6 }
 0x393   :  { %v1866_v0 = vpop.f32.mrb[62].mxu0  ;;  %3833 = vmatprep.subr.bf16.mxu0 %v3999_v32 }
 0x394   :  { %v3764_v43 = vpop.f32.mrb[63].mxu0 }
 0x395   :  { %3830 = vmatmul.mubr.msk.bf16.vlgmr.msra.gmra.mrb[88].mxu0 %vm199_vm1, %v2645_v27 }
 0x396   :  { %3841 = vmatprep.mubr.msk.bf16.mxu0 %vm4000_vm0, %v3999_v32 }
 0x3b1   :  { %v3439_v1 = vpop.f32.mrb[64].mxu0 }
 0x3b2   :  { %v3440_v46 = vpop.f32.mrb[65].mxu0 }
 0x3b3   :  { %v3441_v47 = vadd.f32 %v3440_v46, %v3439_v1  ;;  %v3442_v48 = vpop.f32.mrb[66].mxu0 }
 0x3b4   :  { %v3443_v23 = vpop.f32.mrb[67].mxu0 }
 0x3b5   :  { %v1975_v26 = vadd.f32 %v3441_v47, %v4836_v16 }
 0x3b7   :  { %v1980_v55 = vmax.f32 %v1864_v42, %v1975_v26 }
 0x3b9   :  { %v2086_v57 = vpop.f32.mrb[68].mxu0 }
 0x3ba   :  { %v2087_v58 = vadd.f32 %v4838_v56, %v2086_v57  ;;  %v3779_v59 = vpop.f32.mrb[69].mxu0  ;;  %v2406_v56 = vcombine.high %v4873_v9, %v4873_v9  ;;  %v2533_v9 = vcombine.high %v4906_v39, %v4906_v39 }
 0x3bb   :  { %v2089_v61 = vpop.f32.mrb[70].mxu0 }
 0x3bc   :  { %v2092_v62 = vmax.f32 %v1980_v55, %v2087_v58  ;;  %v3780_v63 = vpop.f32.mrb[71].mxu0 }
 0x3d9   :  { %v3489_v12 = vpop.f32.mrb[72].mxu0 }
 0x3da   :  { %v3490_v54 = vpop.f32.mrb[73].mxu0 }
 0x3db   :  { %v3491_v13 = vadd.f32 %v3490_v54, %v3489_v12  ;;  %v3492_v16 = vpop.f32.mrb[74].mxu0 }
 0x3dc   :  { %v3493_v14 = vpop.f32.mrb[75].mxu0 }
 0x3dd   :  { %v2199_v15 = vadd.f32 %v3491_v13, %v4844_v60  ;;  %v2310_v60 = vcombine.high %v4863_v21, %v4863_v21  ;;  %v2630_v21 = vcombine.high %v3066_v44, %v3066_v44  ;;  %v3973_v14 = vld [vmem:[%s5085_s2] ss:$0 sm:$0xff] }
 0x3df   :  { %v2204_v17 = vmax.f32 %v2092_v62, %v2199_v15  ;;  %v2644_v33 = vrot.slane %v2630_v21, %v4136_v22  ;;  %v2829_v21 = vld [vmem:[%s5088_s5 + $0x18] sm:$0xff] }
 0x3e1   :  { %v2205_v28 = vadd.f32 %v4410_v24, %v2204_v17  ;;  %v2420_v24 = vrot.slane %v2406_v56, %v4136_v22 }
 0x3e3   :  { %v2206_v29 = vmax.f32 %v2205_v28, 0.0 }
 0x3e5   :  { %v2207_v3 = vpack.c.bf16 %v2206_v29, %v2206_v29  ;;  %v2826_v29 = vld [vmem:[%s5088_s5] sm:$0xff] }
 0x3e7   :  { %3798 = vmatmul.mubr.msk.bf16.vlgmr.msra.gmra.mrb[64].mxu1 %vm1120_vm2, %v2207_v3  ;;  %v2827_v3 = vld [vmem:[%s5088_s5 + $0x8] sm:$0xff] }
 0x3e8   :  { %3802 = vmatpush3.bf16.msra.mxu1 %v4733_v5  ;;  %3805 = vmatprep.mubr.msk.bf16.mxu1 %vm4000_vm0, %v3999_v32  ;;  %v3881_v56 = vpack.c.bf16 %v2827_v3, %v2826_v29 }
 0x3e9   :  { %3803 = vmatprep.subr.bf16.mxu1 %v3999_v32 }
 0x3ec   :  { %3804 = vmatpush3.bf16.msra.mxu1 %v4742_v6 }
 0x3ed   :  { %3528 = vmatprep.subr.bf16.mxu1 %v4503_v49 }
 0x3ef   :  { %3806 = vmatmul.mubr.msk.bf16.vlgmr.msra.gmra.mrb[68].mxu1 %vm199_vm1, %v2310_v60  ;;  %v4001_v60 = vmov 0.0|0.0  }
 0x3f0   :  { %3529 = vmatpush3.bf16.msra.mxu1 %v4511_v35  ;;  %2459 = vmatprep.mubr.bf16.mxu1 %v2420_v24  ;;  %v2828_v24 = vld [vmem:[%s5088_s5 + $0x10] sm:$0xff] }
 0x3f1   :  { %3530 = vmatprep.subr.bf16.mxu1 %v4517_v50 }
 0x3f4   :  { %3531 = vmatpush3.bf16.msra.mxu1 %v4525_v51 }
 0x3f5   :  { %3532 = vmatprep.subr.bf16.mxu1 %v4533_v52 }
 0x3f8   :  { %3533 = vmatpush3.bf16.msra.mxu1 %v4580_v7 }
 0x3f9   :  { %3534 = vmatprep.subr.bf16.mxu1 %v4586_v8  ;;  %v3519_v22 = vpop.f32.mrb[76].mxu0 }
 0x3fc   :  { %3535 = vmatpush3.bf16.msra.mxu1 %v4592_v10 }
 0x3fd   :  { %3536 = vmatprep.subr.bf16.mxu1 %v4598_v11 }
 0x400   :  { %3537 = vmatpush3.bf16.msra.mxu1 %v4604_v38 }
 0x401   :  { %3538 = vmatprep.subr.bf16.mxu1 %v4610_v53 }
 0x404   :  { %3539 = vmatpush3.bf16.msra.mxu1 %v4692_v34 }
 0x405   :  { %3540 = vmatprep.subr.bf16.mxu1 %v4698_v2 }
 0x408   :  { %3541 = vmatpush3.bf16.msra.mxu1 %v4706_v41 }
 0x409   :  { %3542 = vmatprep.subr.bf16.mxu1 %v4715_v45 }
 0x40c   :  { %3543 = vmatpush3.bf16.msra.mxu1 %v4725_v4 }
 0x40d   :  { %3817 = vmatprep.subr.bf16.mxu1 %v3999_v32 }
 0x40f   :  { %2460 = vmatmul.mubr.bf16.vlgmr.msra.gmra.mrb[72].mxu1 %v4877_v25 }
 0x410   :  { %3818 = vmatpush3.bf16.msra.mxu1 %v4733_v5  ;;  %3821 = vmatprep.mubr.msk.bf16.mxu1 %vm4000_vm0, %v3999_v32  ;;  %v3944_v5 = vld [vmem:[%s5086_s3 + $0x88] sm:$0xff]  }
 0x411   :  { %3819 = vmatprep.subr.bf16.mxu1 %v3999_v32 }
 0x414   :  { %3820 = vmatpush3.bf16.msra.mxu1 %v4742_v6 }
 0x415   :  { %3578 = vmatprep.subr.bf16.mxu1 %v4503_v49  ;;  %v3520_v49 = vpop.f32.mrb[77].mxu0 }
 0x417   :  { %3822 = vmatmul.mubr.msk.bf16.vlgmr.msra.gmra.mrb[76].mxu1 %vm199_vm1, %v2533_v9  ;;  %v3884_v9 = vpack.c.bf16 %v2829_v21, %v2828_v24 }
 0x418   :  { %3579 = vmatpush3.bf16.msra.mxu1 %v4511_v35  ;;  %2683 = vmatprep.mubr.bf16.mxu1 %v2644_v33  ;;  %v3521_v35 = vadd.f32 %v3520_v49, %v3519_v22  ;;  %v2830_v33 = vld [vmem:[%s5088_s5 + $0x20] sm:$0xff]  ;;  %v2831_v22 = vld [vmem:[%s5088_s5 + $0x28] sm:$0xff] }
 0x419   :  { %3580 = vmatprep.subr.bf16.mxu1 %v4517_v50  ;;  %v3522_v50 = vpop.f32.mrb[78].mxu0  ;;  %v3887_v49 = vpack.c.bf16 %v2831_v22, %v2830_v33 }
 0x41a   :  { %v2833_v50 = vld [vmem:[%s5088_s5 + $0x38] sm:$0xff] }
 0x41c   :  { %3581 = vmatpush3.bf16.msra.mxu1 %v4525_v51  ;;  %v3523_v51 = vpop.f32.mrb[79].mxu0 }
 0x41d   :  { %3582 = vmatprep.subr.bf16.mxu1 %v4533_v52  ;;  %v2501_v52 = vpop.f32.mrb[80].mxu0 }
 0x420   :  { %3583 = vmatpush3.bf16.msra.mxu1 %v4580_v7  ;;  %v3815_v7 = vpop.f32.mrb[81].mxu0 }
 0x421   :  { %3584 = vmatprep.subr.bf16.mxu1 %v4586_v8  ;;  %v2504_v8 = vpop.f32.mrb[82].mxu0  ;;  %v2835_v7 = vld [vmem:[%s5088_s5 + $0x48] sm:$0xff] }
 0x424   :  { %3585 = vmatpush3.bf16.msra.mxu1 %v4592_v10  ;;  %v3816_v10 = vpop.f32.mrb[83].mxu0 }
 0x425   :  { %3586 = vmatprep.subr.bf16.mxu1 %v4598_v11  ;;  %v2836_v10 = vld [vmem:[%s5088_s5 + $0x50] sm:$0xff] }
 0x428   :  { %3587 = vmatpush3.bf16.msra.mxu1 %v4604_v38 }
 0x429   :  { %3588 = vmatprep.subr.bf16.mxu1 %v4610_v53 }
 0x42c   :  { %3589 = vmatpush3.bf16.msra.mxu1 %v4692_v34 }
 0x42d   :  { %3590 = vmatprep.subr.bf16.mxu1 %v4698_v2 }
 0x430   :  { %3591 = vmatpush3.bf16.msra.mxu1 %v4706_v41  ;;  %v3943_v41 = vld [vmem:[%s5086_s3 + $0x80] sm:$0xff]  }
 0x431   :  { %3592 = vmatprep.subr.bf16.mxu1 %v4715_v45  ;;  %3834 = vmatpush3.bf16.msra.mxu0 %v3943_v41  ;;  %v2840_v41 = vld [vmem:[%s5088_s5 + $0x70] sm:$0xff] }
 0x432   :  { %3835 = vmatprep.subr.bf16.mxu0 %v3999_v32 }
 0x434   :  { %3593 = vmatpush3.bf16.msra.mxu1 %v4725_v4 }
 0x435   :  { %3836 = vmatpush3.bf16.msra.mxu0 %v3944_v5  ;;  %3880 = vmatprep.subr.bf16.mxu1 %v4001_v60 }
 0x436   :  { %3837 = vmatprep.subr.bf16.mxu0 %v3999_v32 }
 0x437   :  { %2684 = vmatmul.mubr.bf16.vlgmr.msra.gmra.mrb[80].mxu1 %v4922_v20 }
 0x438   :  { %3877 = vmatprep.mubr.msk.f32.mxu1 %vm4000_vm0, %v3999_v32  ;;  %3882 = vmatpush3.bf16.msra.mxu1 %v3881_v56 }
 0x439   :  { %3838 = vmatpush3.bf16.msra.mxu0 %v3945_v36  ;;  %3883 = vmatprep.subr.bf16.mxu1 %v4001_v60 }
 0x43a   :  { %3839 = vmatprep.subr.bf16.mxu0 %v3999_v32 }
 0x43c   :  { %3885 = vmatpush3.bf16.msra.mxu1 %v3884_v9 }
 0x43d   :  { %3840 = vmatpush3.bf16.msra.mxu0 %v3946_v37  ;;  %3886 = vmatprep.subr.bf16.mxu1 %v4001_v60 }
 0x440   :  { %3888 = vmatpush3.bf16.msra.mxu1 %v3887_v49 }
 0x441   :  { %3889 = vmatprep.subr.bf16.mxu1 %v4001_v60 }
 0x460   :  { %v3569_v11 = vpop.f32.mrb[84].mxu0 }
 0x461   :  { %v3570_v38 = vpop.f32.mrb[85].mxu0 }
 0x462   :  { %v3571_v53 = vadd.f32 %v3570_v38, %v3569_v11  ;;  %v3572_v34 = vpop.f32.mrb[86].mxu0  ;;  %v2837_v11 = vld [vmem:[%s5088_s5 + $0x58] sm:$0xff] }
 0x463   :  { %v3573_v2 = vpop.f32.mrb[87].mxu0  ;;  %v3896_v38 = vpack.c.bf16 %v2837_v11, %v2836_v10  ;;  %v2839_v34 = vld [vmem:[%s5088_s5 + $0x68] sm:$0xff] }
 0x468   :  { %v2725_v45 = vpop.f32.mrb[88].mxu0 }
 0x469   :  { %v3831_v4 = vpop.f32.mrb[89].mxu0 }
 0x46a   :  { %v2728_v6 = vpop.f32.mrb[90].mxu0 }
 0x46b   :  { %v3832_v25 = vpop.f32.mrb[91].mxu0  ;;  %v3081_v6 = vld [vmem:[%s5087_s4] ss:$0 sm:$0xff]  ;;  %s4002_s4 = smov [#allocation2]  }
 0x46c   :  { %s2938_s22 = sshll.u32 %s4002_s4, 4  ;;  %s2939_s22 = int_to_ptr.vmem [resolvable:$true] %s2938_s22 }
 0x46d   :  { %p3979_p1 = scmp.lt.s32.totalorder %s2939_s22, %s2939_s22 }
 0x4ba   :  { %v2278_v40 = vpop.f32.mrb[64].mxu1 }
 0x4bb   :  { %v5007_v19 = vadd.f32 %v2278_v40, %v4895_v30  ;;  %v3799_v31 = vpop.f32.mrb[65].mxu1 }
 0x4bc   :  { %v2281_v39 = vpop.f32.mrb[66].mxu1 }
 0x4bd   :  { %v3800_v42 = vpop.f32.mrb[67].mxu1 }
 0x4c2   :  { %v2390_v18 = vpop.f32.mrb[68].mxu1 }
 0x4c3   :  { %v2391_v0 = vadd.f32 %v3521_v35, %v2390_v18  ;;  %v3807_v43 = vpop.f32.mrb[69].mxu1  ;;  %v2832_v35 = vld [vmem:[%s5088_s5 + $0x30] sm:$0xff] }
 0x4c4   :  { %v2393_v1 = vpop.f32.mrb[70].mxu1  ;;  %v3890_v51 = vpack.c.bf16 %v2833_v50, %v2832_v35 }
 0x4c5   :  { %v3808_v44 = vpop.f32.mrb[71].mxu1  ;;  %v3082_v1 = vld [vmem:[%s5089_s6] ss:$0 sm:$0xff]  ;;  %s3974_s6 = scalar_lea.vmem %s2939_s22, 32 }
 0x4c6   :  { %3891 = vmatpush3.bf16.msra.mxu1 %v3890_v51  ;;  %p3975_p0 = scmp.ne.s32.totalorder %s2939_s22, %s3974_s6  ;;  %p3980_p2 = scmp.lt.s32.totalorder %s3974_s6, %s3974_s6 }
 0x4c7   :  { %3892 = vmatprep.subr.bf16.mxu1 %v4001_v60 }
 0x4c8   :  { %p3981_p3 = por %p3980_p2, %p3979_p1 }
 0x4ca   :  { %p3982_p4 = pnand %p3981_p3, %p3975_p0 }
 0x4e2   :  { %v3544_v46 = vpop.f32.mrb[72].mxu1 }
 0x4e3   :  { %v3545_v47 = vpop.f32.mrb[73].mxu1 }
 0x4e4   :  { %v3546_v32 = vadd.f32 %v3545_v47, %v3544_v46  ;;  %v3547_v48 = vpop.f32.mrb[74].mxu1 }
 0x4e5   :  { %v3548_v20 = vpop.f32.mrb[75].mxu1 }
 0x4e6   :  { %v2502_v23 = vadd.f32 %v3546_v32, %v2501_v52  ;;  %v2834_v52 = vld [vmem:[%s5088_s5 + $0x40] sm:$0xff] }
 0x4e7   :  { %v3893_v8 = vpack.c.bf16 %v2835_v7, %v2834_v52 }
 0x4e8   :  { %v2507_v26 = vmax.f32 %v2391_v0, %v2502_v23 }
 0x4e9   :  { %3894 = vmatpush3.bf16.msra.mxu1 %v3893_v8 }
 0x4ea   :  { %v2613_v27 = vpop.f32.mrb[76].mxu1  ;;  %3895 = vmatprep.subr.bf16.mxu1 %v4001_v60 }
 0x4eb   :  { %v2614_v55 = vadd.f32 %v3571_v53, %v2613_v27  ;;  %v3823_v57 = vpop.f32.mrb[77].mxu1  ;;  %v2838_v53 = vld [vmem:[%s5088_s5 + $0x60] sm:$0xff] }
 0x4ec   :  { %v2616_v30 = vpop.f32.mrb[78].mxu1  ;;  %v3899_v2 = vpack.c.bf16 %v2839_v34, %v2838_v53 }
 0x4ed   :  { %v2619_v58 = vmax.f32 %v2507_v26, %v2614_v55  ;;  %v3824_v59 = vpop.f32.mrb[79].mxu1  ;;  %3897 = vmatpush3.bf16.msra.mxu1 %v3896_v38 }
 0x4ee   :  { %3898 = vmatprep.subr.bf16.mxu1 %v4001_v60 }
 0x4f1   :  { %3900 = vmatpush3.bf16.msra.mxu1 %v3899_v2 }
 0x4f2   :  { %3901 = vmatprep.subr.bf16.mxu1 %v4001_v60 }
 0x50a   :  { %v3594_v61 = vpop.f32.mrb[80].mxu1 }
 0x50b   :  { %v3595_v62 = vpop.f32.mrb[81].mxu1 }
 0x50c   :  { %v3596_v63 = vadd.f32 %v3595_v62, %v3594_v61  ;;  %v3597_v12 = vpop.f32.mrb[82].mxu1 }
 0x50d   :  { %v3598_v54 = vpop.f32.mrb[83].mxu1 }
 0x50e   :  { %v2726_v13 = vadd.f32 %v3596_v63, %v2725_v45  ;;  %v2841_v45 = vld [vmem:[%s5088_s5 + $0x78] sm:$0xff] }
 0x50f   :  { %v3902_v4 = vpack.c.bf16 %v2841_v45, %v2840_v41 }
 0x510   :  { %v2731_v16 = vmax.f32 %v2619_v58, %v2726_v13 }
 0x511   :  { %3903 = vmatpush3.bf16.msra.mxu1 %v3902_v4 }
 0x512   :  { %v2732_v15 = vadd.f32 %v3973_v14, %v2731_v16 }
 0x514   :  { %v2733_v17 = vmax.f32 %v2732_v15, 0.0 }
 0x516   :  { %v2734_v28 = vpack.c.bf16 %v2733_v17, %v2733_v17 }
 0x518   :  { %3842 = vmatmul.mubr.msk.bf16.vlgmr.msra.gmra.mrb[92].mxu0 %vm1120_vm2, %v2734_v28 }
 0x5eb   :  { %v2805_v5 = vpop.f32.mrb[92].mxu0 }
 0x5ec   :  { %v2811_v25 = vadd.f32 %v2805_v5, %v5007_v19  ;;  %v3843_v36 = vpop.f32.mrb[93].mxu0 }
 0x5ed   :  { %v2808_v37 = vpop.f32.mrb[94].mxu0 }
 0x5ee   :  { %v2819_v40 = vadd.f32 %v3081_v6, %v2811_v25  ;;  %v3844_v31 = vpop.f32.mrb[95].mxu0 }
 0x5f0   :  { %v2820_v39 = vsub.f32 0.0, %v2819_v40 }
 0x5f2   :  { %v2821_v42 = vmul.f32 1.442695, %v2820_v39 }
 0x5f4   :  { %3947 = vpow2.f32 %v2821_v42 }
 0x5fe   :  { %v3948_v18 = vpop.eup %3947 }
 0x5ff   :  { %v2823_v0 = vadd.f32 1.0, %v3948_v18 }
 0x601   :  { %3949 = vrcp.f32 %v2823_v0 }
 0x60b   :  { %v3950_v43 = vpop.eup %3949 }
 0x60c   :  { %3878 = vmatmul.mubr.f32.vlgmr.msra.gmra.mrb[84].mxu1 %v3950_v43 }
 0x6df   :  { %v2915_v44 = vpop.f32.mrb[84].mxu1 }
 0x6e0   :  { %v2916_v46 = vadd.f32 %v3082_v1, %v2915_v44  ;;  %v3879_v19 = vpop.f32.mrb[85].mxu1 }
 0x6e2   :  { %v2920_v47 = vsel %vm2919_vm3, %v2916_v46, -inf }
 0x6e3   :  { %2921 = vmax.xlane.f32.xlu0 %v2920_v47 }
 0x770   :  { %v2922_v32 = vpop.xlane.xlu0 %2921 }
 0x771   :  { %v2923_v48 = vsub.f32 %v2916_v46, %v2922_v32 }
 0x773   :  { %v2924_v20 = vmul.f32 1.442695, %v2923_v48 }
 0x775   :  { %3951 = vpow2.f32 %v2924_v20 }
 0x77f   :  { %v3952_v23 = vpop.eup %3951 }
 0x780   :  { %v2926_v26 = vsel %vm2919_vm3, %v3952_v23, 0.0 }
 0x781   :  { %2927 = vadd.xlane.f32.xlu0 %v2926_v26 }
 0x80e   :  { %v2928_v27 = vpop.xlane.xlu0 %2927 }
 0x80f   :  { %3953 = vrcp.f32 %v2928_v27 }
 0x819   :  { %v3954_v55 = vpop.eup %3953 }
 0x81a   :  { %v2930_v57 = vmul.f32 %v3954_v55, %v3952_v23 }
 0x81c   :  { %2931 = vst.msk [vmem:[#allocation2] sm:$0x3] %vm2919_vm3, %v2930_v57 }
 0x81d   :  { %3985 = shalt.err (!%p3982_p4)
}
 0x81e   :  { %s3986_s25 = scalar_lea.hbm %s5090_s7, 32 }
 0x81f   :  { %p3987_p5 = scmp.ne.s32.totalorder %s5090_s7, %s3986_s25  ;;  %p3990_p6 = scmp.lt.u32.totalorder %s3986_s25, %s5090_s7 }
 0x821   :  { %p3992_p7 = pnand %p3990_p6, %p3987_p5 }
 0x823   :  { %3995 = shalt.err (!%p3992_p7)
}
 0x824   :  { %2941 = dma.vmem_to_hbm [thread:$0]  %s2939_s22, 32, %s5090_s7, [#allocation3]  }
 0x825   :  { %3996 = dma.done.wait [#allocation3], 32  }
 0x826   :  { %3997 = vsyncadd [#allocation3], 4294967264 }
 0x827   :  { %2945 = vsyncpa [#allocation3], 1 }

</bundles_post_ra>
